<compile_context>
chip_gen: v7x
topology: tpu7x:2x2x1
jax: 0.10.0
libtpu: 0.0.40
codegen_flags: <defaults>
</compile_context>

<pallas_src>
import functools

import jax
import jax.numpy as jnp
import numpy as np
from jax.experimental import pallas as pl
from jax.experimental.pallas import tpu as pltpu

NEG_INF = -1e30
LN_EPS = 1e-5
LEAKY_SLOPE = 0.2


# ----------------------------------------------------------------------------
# Small shared helpers
# ----------------------------------------------------------------------------
def _elu(v):
    return jnp.where(v > 0, v, jnp.exp(jnp.minimum(v, 0.0)) - 1.0)


def _layer_norm(v, w, b):
    """Reference-side LayerNorm over the full last axis."""
    mu = jnp.mean(v, axis=-1, keepdims=True)
    var = jnp.mean((v - mu) ** 2, axis=-1, keepdims=True)
    return (v - mu) * jax.lax.rsqrt(var + LN_EPS) * w + b


def _layer_norm_padded(v, w_row, b_row, c):
    """Kernel-side LayerNorm on a 128-lane padded map whose pad columns are 0.

    Sums over the padded axis equal sums over the valid columns, so dividing by
    the true channel count `c` gives the correct moments; zero-padded ln_w/ln_b
    rows keep the pad columns at exactly 0 afterwards.
    """
    inv_c = 1.0 / float(c)
    mu = jnp.sum(v, axis=-1, keepdims=True) * inv_c
    var = jnp.sum(v * v, axis=-1, keepdims=True) * inv_c - mu * mu
    return (v - mu) * jax.lax.rsqrt(var + LN_EPS) * w_row + b_row


# ----------------------------------------------------------------------------
# Fused whole-network kernel
# ----------------------------------------------------------------------------
def _fused_kernel(x_ref, adj_ref, slab_ref, out_ref, *, cfg):
    x = x_ref[...]                    # [N_pad, 128], valid cols [0:in_features]
    adj_bias = adj_ref[...]           # [N_pad, N_pad] additive mask

    def blk(off, rows=128):
        # Static, sublane-aligned slice of the coalesced parameter slab.
        return slab_ref[off:off + rows, :]

    def prow(off):
        return blk(off, 8)[0:1, :]    # [1, 128] parameter row (zero-padded)

    def gat(x, lc):
        heads = lc["heads"]
        inv_h = 1.0 / float(heads)
        # a_src for all heads in one matmul against host-precomputed
        # (W_h @ att_src_h) columns, then ONE transpose per layer (hoisted).
        a_src_cols = jnp.dot(x, blk(lc["vsrc"]), preferred_element_type=jnp.float32)
        a_srcT = jnp.transpose(a_src_cols)          # [128, N_pad]; row h valid
        adst = blk(lc["adst"], 8)                   # [8, 128]; row h = att_dst_h
        agg = None
        for h in range(heads):
            # Per-head projection from its own 128x128 block: no lane-misaligned
            # slicing of a fused projection, result is lane-dense.
            xp = jnp.dot(x, blk(lc["w"][h]), preferred_element_type=jnp.float32)
            a_dst = jnp.sum(xp * adst[h:h + 1, :], axis=-1, keepdims=True)   # [N,1]
            logits = a_dst + a_srcT[h:h + 1, :]                              # [N,N]
            e = jnp.maximum(logits, LEAKY_SLOPE * logits) + adj_bias         # LeakyReLU + mask
            e = e - jnp.max(e, axis=-1, keepdims=True)                       # keep: pad-row safety
            p = jnp.exp(e)
            p = p / jnp.sum(p, axis=-1, keepdims=True)                       # exact division
            contrib = jnp.dot(p, xp, preferred_element_type=jnp.float32)
            agg = contrib if agg is None else agg + contrib                  # per-head accumulate
        return agg * inv_h + prow(lc["bias"])

    # Residual GAT layers.
    for lc in cfg["res_layers"]:
        g = gat(x, lc)
        ln = _layer_norm_padded(g, prow(lc["ln_w"]), prow(lc["ln_b"]), lc["out_dim"])
        if lc["res_w"] is not None:
            res = jnp.dot(x, blk(lc["res_w"]), preferred_element_type=jnp.float32) \
                  + prow(lc["res_b"])
        else:
            res = x                                   # identity residual
        x = ln + res

    # Final GATConv (heads=1, concat=False).
    x = gat(x, cfg["final"])

    # MLP in [N, F] orientation (no in-kernel transpose); pad columns stay 0
    # through ELU, and the sigmoid'ed pad columns are discarded host-side.
    m = cfg["mlp"]
    h = _elu(jnp.dot(x, blk(m["w1"]), preferred_element_type=jnp.float32) + prow(m["b1"]))
    h = _elu(jnp.dot(h, blk(m["w2"]), preferred_element_type=jnp.float32) + prow(m["b2"]))
    o = jax.nn.sigmoid(jnp.dot(h, blk(m["w3"]), preferred_element_type=jnp.float32)
                       + prow(m["b3"]))
    out_ref[...] = o.astype(out_ref.dtype)            # lane-dense [N_pad, 128] store


# ----------------------------------------------------------------------------
# Host-side parameter slab (one coalesced, (8,128)-tiled DMA)
# ----------------------------------------------------------------------------
def _build_slab_and_cfg(params, in_features):
    blocks = []
    row_count = 0

    def add(arr, rows):
        nonlocal row_count
        a = np.asarray(arr, np.float32)
        if a.ndim == 1:
            a = a.reshape(1, -1)
        assert a.shape[0] <= rows and a.shape[1] <= 128, "dims must fit one lane tile"
        block = np.zeros((rows, 128), np.float32)
        block[:a.shape[0], :a.shape[1]] = a
        blocks.append(block)
        off = row_count
        row_count += rows
        return off

    def gat_cfg(w, att_src, att_dst, bias, heads):
        w = np.asarray(w, np.float32)
        att_src = np.asarray(att_src, np.float32)
        att_dst = np.asarray(att_dst, np.float32)
        out_dim = w.shape[1] // heads
        w_offs = tuple(add(w[:, h * out_dim:(h + 1) * out_dim], 128) for h in range(heads))
        # Host-precomputed v_src_h = W_h @ att_src_h so a_src = x @ v_src (per layer,
        # one matmul + one transpose for all heads).
        vsrc = np.stack([w[:, h * out_dim:(h + 1) * out_dim] @ att_src[h]
                         for h in range(heads)], axis=1)          # [Cin, H]
        return {
            "heads": heads, "out_dim": out_dim,
            "w": w_offs,
            "vsrc": add(vsrc, 128),
            "adst": add(att_dst, 8),
            "bias": add(bias, 8),
        }

    cfg = {"res_layers": []}
    for p in params["res_layers"]:
        lc = gat_cfg(p["w"], p["att_src"], p["att_dst"], p["bias"], p["heads"])
        lc["ln_w"] = add(p["ln_w"], 8)
        lc["ln_b"] = add(p["ln_b"], 8)
        if "res_w" in p:
            lc["res_w"] = add(p["res_w"], 128)
            lc["res_b"] = add(p["res_b"], 8)
        else:
            lc["res_w"] = None
            lc["res_b"] = None
        cfg["res_layers"].append(lc)

    fp = params["final_gat"]
    cfg["final"] = gat_cfg(fp["w"], fp["att_src"], fp["att_dst"], fp["bias"], fp["heads"])

    mp = params["mlp"]
    cfg["mlp"] = {
        "w1": add(mp["w1"], 128), "b1": add(mp["b1"], 8),
        "w2": add(mp["w2"], 128), "b2": add(mp["b2"], 8),
        "w3": add(mp["w3"], 128), "b3": add(mp["b3"], 8),
    }
    cfg["mlp_out"] = int(np.asarray(mp["w3"]).shape[1])

    slab = jnp.asarray(np.concatenate(blocks, axis=0))            # [R_total, 128]
    return slab, cfg


def deep_gat_forward(x, adj, params):
    n, f_in = x.shape
    assert f_in <= 128, "feature dims must fit one lane tile"
    n_pad = ((n + 127) // 128) * 128

    # Pad nodes to a lane-aligned count and features to 128 lanes; padded node
    # rows are fully masked (finite logits, exp underflows to exactly 0 for
    # real rows), padded feature columns stay exactly 0 through every layer.
    x_pad = jnp.zeros((n_pad, 128), jnp.float32).at[:n, :f_in].set(x)
    adj_bias = jnp.full((n_pad, n_pad), NEG_INF, jnp.float32)
    adj_bias = adj_bias.at[:n, :n].set(jnp.where(adj > 0, 0.0, NEG_INF))

    slab, cfg = _build_slab_and_cfg(params, f_in)
    kernel = functools.partial(_fused_kernel, cfg=cfg)

    out = pl.pallas_call(
        kernel,
        out_shape=jax.ShapeDtypeStruct((n_pad, 128), jnp.float32),
        in_specs=[pl.BlockSpec(memory_space=pltpu.MemorySpace.VMEM)] * 3,
        out_specs=pl.BlockSpec(memory_space=pltpu.MemorySpace.VMEM),
        compiler_params=pltpu.CompilerParams(vmem_limit_bytes=32 * 1024 * 1024),
    )(x_pad, adj_bias, slab)
    return jnp.squeeze(out[:n, :cfg["mlp_out"]])


# ----------------------------------------------------------------------------
# Pure-JAX reference (per-head, unpadded) for correctness check
# ----------------------------------------------------------------------------
def _gat_conv_reference(x, w, att_src, att_dst, bias, adj, heads):
    out_dim = w.shape[1] // heads
    n = x.shape[0]
    acc = jnp.zeros((n, out_dim), jnp.float32)
    for h in range(heads):
        w_h = w[:, h * out_dim:(h + 1) * out_dim]
        xp = jnp.dot(x, w_h)
        a_s = jnp.sum(xp * att_src[h], axis=-1, keepdims=True)
        a_d = jnp.sum(xp * att_dst[h], axis=-1, keepdims=True)
        logits = a_d + jnp.transpose(a_s)
        e = jnp.where(logits > 0, logits, LEAKY_SLOPE * logits)
        e = jnp.where(adj > 0, e, NEG_INF)
        e = e - jnp.max(e, axis=-1, keepdims=True)
        p = jnp.exp(e)
        p = p / jnp.sum(p, axis=-1, keepdims=True)
        acc = acc + jnp.dot(p, xp)
    return acc / float(heads) + bias


def deep_gat_reference(x, adj, params):
    for p in params["res_layers"]:
        gat = _gat_conv_reference(x, p["w"], p["att_src"], p["att_dst"], p["bias"],
                                  adj, p["heads"])
        normed = _layer_norm(gat, p["ln_w"], p["ln_b"])
        res = jnp.dot(x, p["res_w"]) + p["res_b"] if "res_w" in p else x
        x = normed + res
    fp = params["final_gat"]
    x = _gat_conv_reference(x, fp["w"], fp["att_src"], fp["att_dst"], fp["bias"],
                            adj, fp["heads"])
    mp = params["mlp"]
    h = _elu(jnp.dot(x, mp["w1"]) + mp["b1"])
    h = _elu(jnp.dot(h, mp["w2"]) + mp["b2"])
    h = jax.nn.sigmoid(jnp.dot(h, mp["w3"]) + mp["b3"])
    return jnp.squeeze(h)


# ----------------------------------------------------------------------------
# Deterministic parameter init
# ----------------------------------------------------------------------------
def _glorot(key, shape):
    fan_in, fan_out = shape[-2], shape[-1]
    std = np.sqrt(2.0 / (fan_in + fan_out))
    return (jax.random.normal(key, shape, jnp.float32) * std).astype(jnp.float32)


def init_params(key, in_features, hidden_dims, heads_per_layer, out_features, mlp_dims):
    keys = iter(jax.random.split(key, 128))
    params = {"res_layers": []}
    cur = in_features
    for dim, heads in zip(hidden_dims, heads_per_layer):
        lp = {
            "heads": heads,
            "w": _glorot(next(keys), (cur, heads * dim)),
            "att_src": _glorot(next(keys), (heads, dim)),
            "att_dst": _glorot(next(keys), (heads, dim)),
            "bias": jnp.zeros((1, dim), jnp.float32),
            "ln_w": jnp.ones((1, dim), jnp.float32),
            "ln_b": jnp.zeros((1, dim), jnp.float32),
        }
        if cur != dim:  # only a real projection when dims differ (identity is free)
            lp["res_w"] = _glorot(next(keys), (cur, dim))
            lp["res_b"] = jnp.zeros((1, dim), jnp.float32)
        params["res_layers"].append(lp)
        cur = dim
    params["final_gat"] = {
        "heads": 1,
        "w": _glorot(next(keys), (cur, out_features)),
        "att_src": _glorot(next(keys), (1, out_features)),
        "att_dst": _glorot(next(keys), (1, out_features)),
        "bias": jnp.zeros((1, out_features), jnp.float32),
    }
    params["mlp"] = {
        "w1": _glorot(next(keys), (out_features, mlp_dims[0])),
        "b1": jnp.zeros((1, mlp_dims[0]), jnp.float32),
        "w2": _glorot(next(keys), (mlp_dims[0], mlp_dims[1])),
        "b2": jnp.zeros((1, mlp_dims[1]), jnp.float32),
        "w3": _glorot(next(keys), (mlp_dims[1], mlp_dims[2])),
        "b3": jnp.zeros((1, mlp_dims[2]), jnp.float32),
    }
    return params


# ----------------------------------------------------------------------------
if __name__ == "__main__":
    in_features = 8
    hidden_dims = [32, 32]
    heads_per_layer = [2, 2]
    out_features = 16
    mlp_dims = [32, 16, 1]
    N, E = 16, 40

    key = jax.random.PRNGKey(0)
    k_x, k_src, k_dst, k_param = jax.random.split(key, 4)

    x = jax.random.normal(k_x, (N, in_features), jnp.float32)
    src = jax.random.randint(k_src, (E,), 0, N)
    dst = jax.random.randint(k_dst, (E,), 0, N)
    edge_index = jnp.stack([src, dst])  # [2, E], row0=source, row1=target

    # Dense adjacency mask adj[dst, src], plus self-loops (GATConv default).
    adj = jnp.zeros((N, N), jnp.float32).at[edge_index[1], edge_index[0]].set(1.0)
    adj = jnp.maximum(adj, jnp.eye(N, dtype=jnp.float32))

    params = init_params(k_param, in_features, hidden_dims, heads_per_layer,
                         out_features, mlp_dims)

    out = deep_gat_forward(x, adj, params)
    out = jax.block_until_ready(out)

    ref = deep_gat_reference(x, adj, params)
    np.testing.assert_allclose(np.asarray(out), np.asarray(ref), atol=5e-3, rtol=5e-3)

    print("KERNEL_OK")
</pallas_src>

<mosaic_0001>
module attributes {stable_mosaic.version = 11 : i64} {
  func.func @_fused_kernel(%arg0: memref<128x128xf32, #tpu.memory_space<vmem>>, %arg1: memref<128x128xf32, #tpu.memory_space<vmem>>, %arg2: memref<1648x128xf32, #tpu.memory_space<vmem>>, %arg3: memref<128x128xf32, #tpu.memory_space<vmem>>) attributes {dimension_semantics = [], scalar_prefetch = 0 : i64, scratch_operands = 0 : i64, tpu.core_type = #tpu.core_type<tc>} {
    %c0 = arith.constant 0 : index
    %c0_0 = arith.constant 0 : index
    %0 = vector.load %arg0[%c0, %c0_0] : memref<128x128xf32, #tpu.memory_space<vmem>>, vector<128x128xf32>
    %c0_1 = arith.constant 0 : index
    %c0_2 = arith.constant 0 : index
    %1 = vector.load %arg1[%c0_1, %c0_2] : memref<128x128xf32, #tpu.memory_space<vmem>>, vector<128x128xf32>
    %c256 = arith.constant 256 : index
    %c0_3 = arith.constant 0 : index
    %2 = vector.load %arg2[%c256, %c0_3] : memref<1648x128xf32, #tpu.memory_space<vmem>>, vector<128x128xf32>
    %cst = arith.constant dense<0.000000e+00> : vector<128x128xf32>
    %3 = tpu.matmul %0, %2, %cst {dimension_numbers = #tpu.dot_dimension_numbers<[1], [0], [0], [1], [0, 0, 1, 1], [], []>} : vector<128x128xf32>, vector<128x128xf32>, vector<128x128xf32> -> vector<128x128xf32>
    %4 = tpu.transpose %3, [1, 0] : vector<128x128xf32> -> vector<128x128xf32>
    %c384 = arith.constant 384 : index
    %c0_4 = arith.constant 0 : index
    %5 = vector.load %arg2[%c384, %c0_4] : memref<1648x128xf32, #tpu.memory_space<vmem>>, vector<8x128xf32>
    %c0_5 = arith.constant 0 : index
    %c0_6 = arith.constant 0 : index
    %6 = vector.load %arg2[%c0_5, %c0_6] : memref<1648x128xf32, #tpu.memory_space<vmem>>, vector<128x128xf32>
    %cst_7 = arith.constant dense<0.000000e+00> : vector<128x128xf32>
    %7 = tpu.matmul %0, %6, %cst_7 {dimension_numbers = #tpu.dot_dimension_numbers<[1], [0], [0], [1], [0, 0, 1, 1], [], []>} : vector<128x128xf32>, vector<128x128xf32>, vector<128x128xf32> -> vector<128x128xf32>
    %8 = vector.extract_strided_slice %5 {offsets = [0, 0], sizes = [1, 128], strides = [1, 1]} : vector<8x128xf32> to vector<1x128xf32>
    %9 = vector.broadcast %8 : vector<1x128xf32> to vector<128x128xf32>
    %10 = arith.mulf %7, %9 : vector<128x128xf32>
    %cst_8 = arith.constant dense<0.000000e+00> : vector<128xf32>
    %11 = vector.multi_reduction <add>, %10, %cst_8 [1] : vector<128x128xf32> to vector<128xf32>
    %12 = vector.shape_cast %11 : vector<128xf32> to vector<128x1xf32>
    %13 = vector.extract_strided_slice %4 {offsets = [0, 0], sizes = [1, 128], strides = [1, 1]} : vector<128x128xf32> to vector<1x128xf32>
    %14 = vector.broadcast %12 : vector<128x1xf32> to vector<128x128xf32>
    %15 = vector.broadcast %13 : vector<1x128xf32> to vector<128x128xf32>
    %16 = arith.addf %14, %15 : vector<128x128xf32>
    %cst_9 = arith.constant 2.000000e-01 : f32
    %17 = vector.broadcast %cst_9 : f32 to vector<128x128xf32>
    %18 = arith.mulf %17, %16 : vector<128x128xf32>
    %19 = arith.maximumf %16, %18 : vector<128x128xf32>
    %20 = arith.addf %19, %1 : vector<128x128xf32>
    %cst_10 = arith.constant dense<0xFF800000> : vector<128xf32>
    %21 = vector.multi_reduction <maximumf>, %20, %cst_10 [1] : vector<128x128xf32> to vector<128xf32>
    %22 = vector.shape_cast %21 : vector<128xf32> to vector<128x1xf32>
    %23 = vector.broadcast %22 : vector<128x1xf32> to vector<128x128xf32>
    %24 = arith.subf %20, %23 : vector<128x128xf32>
    %25 = math.exp %24 : vector<128x128xf32>
    %cst_11 = arith.constant dense<0.000000e+00> : vector<128xf32>
    %26 = vector.multi_reduction <add>, %25, %cst_11 [1] : vector<128x128xf32> to vector<128xf32>
    %27 = vector.shape_cast %26 : vector<128xf32> to vector<128x1xf32>
    %28 = vector.broadcast %27 : vector<128x1xf32> to vector<128x128xf32>
    %29 = arith.divf %25, %28 : vector<128x128xf32>
    %cst_12 = arith.constant dense<0.000000e+00> : vector<128x128xf32>
    %30 = tpu.matmul %29, %7, %cst_12 {dimension_numbers = #tpu.dot_dimension_numbers<[1], [0], [0], [1], [0, 0, 1, 1], [], []>} : vector<128x128xf32>, vector<128x128xf32>, vector<128x128xf32> -> vector<128x128xf32>
    %c128 = arith.constant 128 : index
    %c0_13 = arith.constant 0 : index
    %31 = vector.load %arg2[%c128, %c0_13] : memref<1648x128xf32, #tpu.memory_space<vmem>>, vector<128x128xf32>
    %cst_14 = arith.constant dense<0.000000e+00> : vector<128x128xf32>
    %32 = tpu.matmul %0, %31, %cst_14 {dimension_numbers = #tpu.dot_dimension_numbers<[1], [0], [0], [1], [0, 0, 1, 1], [], []>} : vector<128x128xf32>, vector<128x128xf32>, vector<128x128xf32> -> vector<128x128xf32>
    %33 = vector.extract_strided_slice %5 {offsets = [1, 0], sizes = [1, 128], strides = [1, 1]} : vector<8x128xf32> to vector<1x128xf32>
    %34 = vector.broadcast %33 : vector<1x128xf32> to vector<128x128xf32>
    %35 = arith.mulf %32, %34 : vector<128x128xf32>
    %cst_15 = arith.constant dense<0.000000e+00> : vector<128xf32>
    %36 = vector.multi_reduction <add>, %35, %cst_15 [1] : vector<128x128xf32> to vector<128xf32>
    %37 = vector.shape_cast %36 : vector<128xf32> to vector<128x1xf32>
    %38 = vector.extract_strided_slice %4 {offsets = [1, 0], sizes = [1, 128], strides = [1, 1]} : vector<128x128xf32> to vector<1x128xf32>
    %39 = vector.broadcast %37 : vector<128x1xf32> to vector<128x128xf32>
    %40 = vector.broadcast %38 : vector<1x128xf32> to vector<128x128xf32>
    %41 = arith.addf %39, %40 : vector<128x128xf32>
    %cst_16 = arith.constant 2.000000e-01 : f32
    %42 = vector.broadcast %cst_16 : f32 to vector<128x128xf32>
    %43 = arith.mulf %42, %41 : vector<128x128xf32>
    %44 = arith.maximumf %41, %43 : vector<128x128xf32>
    %45 = arith.addf %44, %1 : vector<128x128xf32>
    %cst_17 = arith.constant dense<0xFF800000> : vector<128xf32>
    %46 = vector.multi_reduction <maximumf>, %45, %cst_17 [1] : vector<128x128xf32> to vector<128xf32>
    %47 = vector.shape_cast %46 : vector<128xf32> to vector<128x1xf32>
    %48 = vector.broadcast %47 : vector<128x1xf32> to vector<128x128xf32>
    %49 = arith.subf %45, %48 : vector<128x128xf32>
    %50 = math.exp %49 : vector<128x128xf32>
    %cst_18 = arith.constant dense<0.000000e+00> : vector<128xf32>
    %51 = vector.multi_reduction <add>, %50, %cst_18 [1] : vector<128x128xf32> to vector<128xf32>
    %52 = vector.shape_cast %51 : vector<128xf32> to vector<128x1xf32>
    %53 = vector.broadcast %52 : vector<128x1xf32> to vector<128x128xf32>
    %54 = arith.divf %50, %53 : vector<128x128xf32>
    %cst_19 = arith.constant dense<0.000000e+00> : vector<128x128xf32>
    %55 = tpu.matmul %54, %32, %cst_19 {dimension_numbers = #tpu.dot_dimension_numbers<[1], [0], [0], [1], [0, 0, 1, 1], [], []>} : vector<128x128xf32>, vector<128x128xf32>, vector<128x128xf32> -> vector<128x128xf32>
    %56 = arith.addf %30, %55 : vector<128x128xf32>
    %cst_20 = arith.constant 5.000000e-01 : f32
    %57 = vector.broadcast %cst_20 : f32 to vector<128x128xf32>
    %58 = arith.mulf %56, %57 : vector<128x128xf32>
    %c392 = arith.constant 392 : index
    %c0_21 = arith.constant 0 : index
    %59 = vector.load %arg2[%c392, %c0_21] : memref<1648x128xf32, #tpu.memory_space<vmem>>, vector<8x128xf32>
    %60 = vector.extract_strided_slice %59 {offsets = [0, 0], sizes = [1, 128], strides = [1, 1]} : vector<8x128xf32> to vector<1x128xf32>
    %61 = vector.broadcast %60 : vector<1x128xf32> to vector<128x128xf32>
    %62 = arith.addf %58, %61 : vector<128x128xf32>
    %c400 = arith.constant 400 : index
    %c0_22 = arith.constant 0 : index
    %63 = vector.load %arg2[%c400, %c0_22] : memref<1648x128xf32, #tpu.memory_space<vmem>>, vector<8x128xf32>
    %64 = vector.extract_strided_slice %63 {offsets = [0, 0], sizes = [1, 128], strides = [1, 1]} : vector<8x128xf32> to vector<1x128xf32>
    %c408 = arith.constant 408 : index
    %c0_23 = arith.constant 0 : index
    %65 = vector.load %arg2[%c408, %c0_23] : memref<1648x128xf32, #tpu.memory_space<vmem>>, vector<8x128xf32>
    %66 = vector.extract_strided_slice %65 {offsets = [0, 0], sizes = [1, 128], strides = [1, 1]} : vector<8x128xf32> to vector<1x128xf32>
    %cst_24 = arith.constant dense<0.000000e+00> : vector<128xf32>
    %67 = vector.multi_reduction <add>, %62, %cst_24 [1] : vector<128x128xf32> to vector<128xf32>
    %68 = vector.shape_cast %67 : vector<128xf32> to vector<128x1xf32>
    %cst_25 = arith.constant 3.125000e-02 : f32
    %69 = vector.broadcast %cst_25 : f32 to vector<128x1xf32>
    %70 = arith.mulf %68, %69 : vector<128x1xf32>
    %71 = arith.mulf %62, %62 : vector<128x128xf32>
    %cst_26 = arith.constant dense<0.000000e+00> : vector<128xf32>
    %72 = vector.multi_reduction <add>, %71, %cst_26 [1] : vector<128x128xf32> to vector<128xf32>
    %73 = vector.shape_cast %72 : vector<128xf32> to vector<128x1xf32>
    %cst_27 = arith.constant 3.125000e-02 : f32
    %74 = vector.broadcast %cst_27 : f32 to vector<128x1xf32>
    %75 = arith.mulf %73, %74 : vector<128x1xf32>
    %76 = arith.mulf %70, %70 : vector<128x1xf32>
    %77 = arith.subf %75, %76 : vector<128x1xf32>
    %78 = vector.broadcast %70 : vector<128x1xf32> to vector<128x128xf32>
    %79 = arith.subf %62, %78 : vector<128x128xf32>
    %cst_28 = arith.constant 9.99999974E-6 : f32
    %80 = vector.broadcast %cst_28 : f32 to vector<128x1xf32>
    %81 = arith.addf %77, %80 : vector<128x1xf32>
    %82 = math.rsqrt %81 : vector<128x1xf32>
    %83 = vector.broadcast %82 : vector<128x1xf32> to vector<128x128xf32>
    %84 = arith.mulf %79, %83 : vector<128x128xf32>
    %85 = vector.broadcast %64 : vector<1x128xf32> to vector<128x128xf32>
    %86 = arith.mulf %84, %85 : vector<128x128xf32>
    %87 = vector.broadcast %66 : vector<1x128xf32> to vector<128x128xf32>
    %88 = arith.addf %86, %87 : vector<128x128xf32>
    %c416 = arith.constant 416 : index
    %c0_29 = arith.constant 0 : index
    %89 = vector.load %arg2[%c416, %c0_29] : memref<1648x128xf32, #tpu.memory_space<vmem>>, vector<128x128xf32>
    %cst_30 = arith.constant dense<0.000000e+00> : vector<128x128xf32>
    %90 = tpu.matmul %0, %89, %cst_30 {dimension_numbers = #tpu.dot_dimension_numbers<[1], [0], [0], [1], [0, 0, 1, 1], [], []>} : vector<128x128xf32>, vector<128x128xf32>, vector<128x128xf32> -> vector<128x128xf32>
    %c544 = arith.constant 544 : index
    %c0_31 = arith.constant 0 : index
    %91 = vector.load %arg2[%c544, %c0_31] : memref<1648x128xf32, #tpu.memory_space<vmem>>, vector<8x128xf32>
    %92 = vector.extract_strided_slice %91 {offsets = [0, 0], sizes = [1, 128], strides = [1, 1]} : vector<8x128xf32> to vector<1x128xf32>
    %93 = vector.broadcast %92 : vector<1x128xf32> to vector<128x128xf32>
    %94 = arith.addf %90, %93 : vector<128x128xf32>
    %95 = arith.addf %88, %94 : vector<128x128xf32>
    %c808 = arith.constant 808 : index
    %c0_32 = arith.constant 0 : index
    %96 = vector.load %arg2[%c808, %c0_32] : memref<1648x128xf32, #tpu.memory_space<vmem>>, vector<128x128xf32>
    %cst_33 = arith.constant dense<0.000000e+00> : vector<128x128xf32>
    %97 = tpu.matmul %95, %96, %cst_33 {dimension_numbers = #tpu.dot_dimension_numbers<[1], [0], [0], [1], [0, 0, 1, 1], [], []>} : vector<128x128xf32>, vector<128x128xf32>, vector<128x128xf32> -> vector<128x128xf32>
    %98 = tpu.transpose %97, [1, 0] : vector<128x128xf32> -> vector<128x128xf32>
    %c936 = arith.constant 936 : index
    %c0_34 = arith.constant 0 : index
    %99 = vector.load %arg2[%c936, %c0_34] : memref<1648x128xf32, #tpu.memory_space<vmem>>, vector<8x128xf32>
    %c552 = arith.constant 552 : index
    %c0_35 = arith.constant 0 : index
    %100 = vector.load %arg2[%c552, %c0_35] : memref<1648x128xf32, #tpu.memory_space<vmem>>, vector<128x128xf32>
    %cst_36 = arith.constant dense<0.000000e+00> : vector<128x128xf32>
    %101 = tpu.matmul %95, %100, %cst_36 {dimension_numbers = #tpu.dot_dimension_numbers<[1], [0], [0], [1], [0, 0, 1, 1], [], []>} : vector<128x128xf32>, vector<128x128xf32>, vector<128x128xf32> -> vector<128x128xf32>
    %102 = vector.extract_strided_slice %99 {offsets = [0, 0], sizes = [1, 128], strides = [1, 1]} : vector<8x128xf32> to vector<1x128xf32>
    %103 = vector.broadcast %102 : vector<1x128xf32> to vector<128x128xf32>
    %104 = arith.mulf %101, %103 : vector<128x128xf32>
    %cst_37 = arith.constant dense<0.000000e+00> : vector<128xf32>
    %105 = vector.multi_reduction <add>, %104, %cst_37 [1] : vector<128x128xf32> to vector<128xf32>
    %106 = vector.shape_cast %105 : vector<128xf32> to vector<128x1xf32>
    %107 = vector.extract_strided_slice %98 {offsets = [0, 0], sizes = [1, 128], strides = [1, 1]} : vector<128x128xf32> to vector<1x128xf32>
    %108 = vector.broadcast %106 : vector<128x1xf32> to vector<128x128xf32>
    %109 = vector.broadcast %107 : vector<1x128xf32> to vector<128x128xf32>
    %110 = arith.addf %108, %109 : vector<128x128xf32>
    %cst_38 = arith.constant 2.000000e-01 : f32
    %111 = vector.broadcast %cst_38 : f32 to vector<128x128xf32>
    %112 = arith.mulf %111, %110 : vector<128x128xf32>
    %113 = arith.maximumf %110, %112 : vector<128x128xf32>
    %114 = arith.addf %113, %1 : vector<128x128xf32>
    %cst_39 = arith.constant dense<0xFF800000> : vector<128xf32>
    %115 = vector.multi_reduction <maximumf>, %114, %cst_39 [1] : vector<128x128xf32> to vector<128xf32>
    %116 = vector.shape_cast %115 : vector<128xf32> to vector<128x1xf32>
    %117 = vector.broadcast %116 : vector<128x1xf32> to vector<128x128xf32>
    %118 = arith.subf %114, %117 : vector<128x128xf32>
    %119 = math.exp %118 : vector<128x128xf32>
    %cst_40 = arith.constant dense<0.000000e+00> : vector<128xf32>
    %120 = vector.multi_reduction <add>, %119, %cst_40 [1] : vector<128x128xf32> to vector<128xf32>
    %121 = vector.shape_cast %120 : vector<128xf32> to vector<128x1xf32>
    %122 = vector.broadcast %121 : vector<128x1xf32> to vector<128x128xf32>
    %123 = arith.divf %119, %122 : vector<128x128xf32>
    %cst_41 = arith.constant dense<0.000000e+00> : vector<128x128xf32>
    %124 = tpu.matmul %123, %101, %cst_41 {dimension_numbers = #tpu.dot_dimension_numbers<[1], [0], [0], [1], [0, 0, 1, 1], [], []>} : vector<128x128xf32>, vector<128x128xf32>, vector<128x128xf32> -> vector<128x128xf32>
    %c680 = arith.constant 680 : index
    %c0_42 = arith.constant 0 : index
    %125 = vector.load %arg2[%c680, %c0_42] : memref<1648x128xf32, #tpu.memory_space<vmem>>, vector<128x128xf32>
    %cst_43 = arith.constant dense<0.000000e+00> : vector<128x128xf32>
    %126 = tpu.matmul %95, %125, %cst_43 {dimension_numbers = #tpu.dot_dimension_numbers<[1], [0], [0], [1], [0, 0, 1, 1], [], []>} : vector<128x128xf32>, vector<128x128xf32>, vector<128x128xf32> -> vector<128x128xf32>
    %127 = vector.extract_strided_slice %99 {offsets = [1, 0], sizes = [1, 128], strides = [1, 1]} : vector<8x128xf32> to vector<1x128xf32>
    %128 = vector.broadcast %127 : vector<1x128xf32> to vector<128x128xf32>
    %129 = arith.mulf %126, %128 : vector<128x128xf32>
    %cst_44 = arith.constant dense<0.000000e+00> : vector<128xf32>
    %130 = vector.multi_reduction <add>, %129, %cst_44 [1] : vector<128x128xf32> to vector<128xf32>
    %131 = vector.shape_cast %130 : vector<128xf32> to vector<128x1xf32>
    %132 = vector.extract_strided_slice %98 {offsets = [1, 0], sizes = [1, 128], strides = [1, 1]} : vector<128x128xf32> to vector<1x128xf32>
    %133 = vector.broadcast %131 : vector<128x1xf32> to vector<128x128xf32>
    %134 = vector.broadcast %132 : vector<1x128xf32> to vector<128x128xf32>
    %135 = arith.addf %133, %134 : vector<128x128xf32>
    %cst_45 = arith.constant 2.000000e-01 : f32
    %136 = vector.broadcast %cst_45 : f32 to vector<128x128xf32>
    %137 = arith.mulf %136, %135 : vector<128x128xf32>
    %138 = arith.maximumf %135, %137 : vector<128x128xf32>
    %139 = arith.addf %138, %1 : vector<128x128xf32>
    %cst_46 = arith.constant dense<0xFF800000> : vector<128xf32>
    %140 = vector.multi_reduction <maximumf>, %139, %cst_46 [1] : vector<128x128xf32> to vector<128xf32>
    %141 = vector.shape_cast %140 : vector<128xf32> to vector<128x1xf32>
    %142 = vector.broadcast %141 : vector<128x1xf32> to vector<128x128xf32>
    %143 = arith.subf %139, %142 : vector<128x128xf32>
    %144 = math.exp %143 : vector<128x128xf32>
    %cst_47 = arith.constant dense<0.000000e+00> : vector<128xf32>
    %145 = vector.multi_reduction <add>, %144, %cst_47 [1] : vector<128x128xf32> to vector<128xf32>
    %146 = vector.shape_cast %145 : vector<128xf32> to vector<128x1xf32>
    %147 = vector.broadcast %146 : vector<128x1xf32> to vector<128x128xf32>
    %148 = arith.divf %144, %147 : vector<128x128xf32>
    %cst_48 = arith.constant dense<0.000000e+00> : vector<128x128xf32>
    %149 = tpu.matmul %148, %126, %cst_48 {dimension_numbers = #tpu.dot_dimension_numbers<[1], [0], [0], [1], [0, 0, 1, 1], [], []>} : vector<128x128xf32>, vector<128x128xf32>, vector<128x128xf32> -> vector<128x128xf32>
    %150 = arith.addf %124, %149 : vector<128x128xf32>
    %cst_49 = arith.constant 5.000000e-01 : f32
    %151 = vector.broadcast %cst_49 : f32 to vector<128x128xf32>
    %152 = arith.mulf %150, %151 : vector<128x128xf32>
    %c944 = arith.constant 944 : index
    %c0_50 = arith.constant 0 : index
    %153 = vector.load %arg2[%c944, %c0_50] : memref<1648x128xf32, #tpu.memory_space<vmem>>, vector<8x128xf32>
    %154 = vector.extract_strided_slice %153 {offsets = [0, 0], sizes = [1, 128], strides = [1, 1]} : vector<8x128xf32> to vector<1x128xf32>
    %155 = vector.broadcast %154 : vector<1x128xf32> to vector<128x128xf32>
    %156 = arith.addf %152, %155 : vector<128x128xf32>
    %c952 = arith.constant 952 : index
    %c0_51 = arith.constant 0 : index
    %157 = vector.load %arg2[%c952, %c0_51] : memref<1648x128xf32, #tpu.memory_space<vmem>>, vector<8x128xf32>
    %158 = vector.extract_strided_slice %157 {offsets = [0, 0], sizes = [1, 128], strides = [1, 1]} : vector<8x128xf32> to vector<1x128xf32>
    %c960 = arith.constant 960 : index
    %c0_52 = arith.constant 0 : index
    %159 = vector.load %arg2[%c960, %c0_52] : memref<1648x128xf32, #tpu.memory_space<vmem>>, vector<8x128xf32>
    %160 = vector.extract_strided_slice %159 {offsets = [0, 0], sizes = [1, 128], strides = [1, 1]} : vector<8x128xf32> to vector<1x128xf32>
    %cst_53 = arith.constant dense<0.000000e+00> : vector<128xf32>
    %161 = vector.multi_reduction <add>, %156, %cst_53 [1] : vector<128x128xf32> to vector<128xf32>
    %162 = vector.shape_cast %161 : vector<128xf32> to vector<128x1xf32>
    %cst_54 = arith.constant 3.125000e-02 : f32
    %163 = vector.broadcast %cst_54 : f32 to vector<128x1xf32>
    %164 = arith.mulf %162, %163 : vector<128x1xf32>
    %165 = arith.mulf %156, %156 : vector<128x128xf32>
    %cst_55 = arith.constant dense<0.000000e+00> : vector<128xf32>
    %166 = vector.multi_reduction <add>, %165, %cst_55 [1] : vector<128x128xf32> to vector<128xf32>
    %167 = vector.shape_cast %166 : vector<128xf32> to vector<128x1xf32>
    %cst_56 = arith.constant 3.125000e-02 : f32
    %168 = vector.broadcast %cst_56 : f32 to vector<128x1xf32>
    %169 = arith.mulf %167, %168 : vector<128x1xf32>
    %170 = arith.mulf %164, %164 : vector<128x1xf32>
    %171 = arith.subf %169, %170 : vector<128x1xf32>
    %172 = vector.broadcast %164 : vector<128x1xf32> to vector<128x128xf32>
    %173 = arith.subf %156, %172 : vector<128x128xf32>
    %cst_57 = arith.constant 9.99999974E-6 : f32
    %174 = vector.broadcast %cst_57 : f32 to vector<128x1xf32>
    %175 = arith.addf %171, %174 : vector<128x1xf32>
    %176 = math.rsqrt %175 : vector<128x1xf32>
    %177 = vector.broadcast %176 : vector<128x1xf32> to vector<128x128xf32>
    %178 = arith.mulf %173, %177 : vector<128x128xf32>
    %179 = vector.broadcast %158 : vector<1x128xf32> to vector<128x128xf32>
    %180 = arith.mulf %178, %179 : vector<128x128xf32>
    %181 = vector.broadcast %160 : vector<1x128xf32> to vector<128x128xf32>
    %182 = arith.addf %180, %181 : vector<128x128xf32>
    %183 = arith.addf %182, %95 : vector<128x128xf32>
    %c1096 = arith.constant 1096 : index
    %c0_58 = arith.constant 0 : index
    %184 = vector.load %arg2[%c1096, %c0_58] : memref<1648x128xf32, #tpu.memory_space<vmem>>, vector<128x128xf32>
    %cst_59 = arith.constant dense<0.000000e+00> : vector<128x128xf32>
    %185 = tpu.matmul %183, %184, %cst_59 {dimension_numbers = #tpu.dot_dimension_numbers<[1], [0], [0], [1], [0, 0, 1, 1], [], []>} : vector<128x128xf32>, vector<128x128xf32>, vector<128x128xf32> -> vector<128x128xf32>
    %186 = tpu.transpose %185, [1, 0] : vector<128x128xf32> -> vector<128x128xf32>
    %c1224 = arith.constant 1224 : index
    %c0_60 = arith.constant 0 : index
    %187 = vector.load %arg2[%c1224, %c0_60] : memref<1648x128xf32, #tpu.memory_space<vmem>>, vector<8x128xf32>
    %c968 = arith.constant 968 : index
    %c0_61 = arith.constant 0 : index
    %188 = vector.load %arg2[%c968, %c0_61] : memref<1648x128xf32, #tpu.memory_space<vmem>>, vector<128x128xf32>
    %cst_62 = arith.constant dense<0.000000e+00> : vector<128x128xf32>
    %189 = tpu.matmul %183, %188, %cst_62 {dimension_numbers = #tpu.dot_dimension_numbers<[1], [0], [0], [1], [0, 0, 1, 1], [], []>} : vector<128x128xf32>, vector<128x128xf32>, vector<128x128xf32> -> vector<128x128xf32>
    %190 = vector.extract_strided_slice %187 {offsets = [0, 0], sizes = [1, 128], strides = [1, 1]} : vector<8x128xf32> to vector<1x128xf32>
    %191 = vector.broadcast %190 : vector<1x128xf32> to vector<128x128xf32>
    %192 = arith.mulf %189, %191 : vector<128x128xf32>
    %cst_63 = arith.constant dense<0.000000e+00> : vector<128xf32>
    %193 = vector.multi_reduction <add>, %192, %cst_63 [1] : vector<128x128xf32> to vector<128xf32>
    %194 = vector.shape_cast %193 : vector<128xf32> to vector<128x1xf32>
    %195 = vector.extract_strided_slice %186 {offsets = [0, 0], sizes = [1, 128], strides = [1, 1]} : vector<128x128xf32> to vector<1x128xf32>
    %196 = vector.broadcast %194 : vector<128x1xf32> to vector<128x128xf32>
    %197 = vector.broadcast %195 : vector<1x128xf32> to vector<128x128xf32>
    %198 = arith.addf %196, %197 : vector<128x128xf32>
    %cst_64 = arith.constant 2.000000e-01 : f32
    %199 = vector.broadcast %cst_64 : f32 to vector<128x128xf32>
    %200 = arith.mulf %199, %198 : vector<128x128xf32>
    %201 = arith.maximumf %198, %200 : vector<128x128xf32>
    %202 = arith.addf %201, %1 : vector<128x128xf32>
    %cst_65 = arith.constant dense<0xFF800000> : vector<128xf32>
    %203 = vector.multi_reduction <maximumf>, %202, %cst_65 [1] : vector<128x128xf32> to vector<128xf32>
    %204 = vector.shape_cast %203 : vector<128xf32> to vector<128x1xf32>
    %205 = vector.broadcast %204 : vector<128x1xf32> to vector<128x128xf32>
    %206 = arith.subf %202, %205 : vector<128x128xf32>
    %207 = math.exp %206 : vector<128x128xf32>
    %cst_66 = arith.constant dense<0.000000e+00> : vector<128xf32>
    %208 = vector.multi_reduction <add>, %207, %cst_66 [1] : vector<128x128xf32> to vector<128xf32>
    %209 = vector.shape_cast %208 : vector<128xf32> to vector<128x1xf32>
    %210 = vector.broadcast %209 : vector<128x1xf32> to vector<128x128xf32>
    %211 = arith.divf %207, %210 : vector<128x128xf32>
    %cst_67 = arith.constant dense<0.000000e+00> : vector<128x128xf32>
    %212 = tpu.matmul %211, %189, %cst_67 {dimension_numbers = #tpu.dot_dimension_numbers<[1], [0], [0], [1], [0, 0, 1, 1], [], []>} : vector<128x128xf32>, vector<128x128xf32>, vector<128x128xf32> -> vector<128x128xf32>
    %cst_68 = arith.constant 1.000000e+00 : f32
    %213 = vector.broadcast %cst_68 : f32 to vector<128x128xf32>
    %214 = arith.mulf %212, %213 : vector<128x128xf32>
    %c1232 = arith.constant 1232 : index
    %c0_69 = arith.constant 0 : index
    %215 = vector.load %arg2[%c1232, %c0_69] : memref<1648x128xf32, #tpu.memory_space<vmem>>, vector<8x128xf32>
    %216 = vector.extract_strided_slice %215 {offsets = [0, 0], sizes = [1, 128], strides = [1, 1]} : vector<8x128xf32> to vector<1x128xf32>
    %217 = vector.broadcast %216 : vector<1x128xf32> to vector<128x128xf32>
    %218 = arith.addf %214, %217 : vector<128x128xf32>
    %c1240 = arith.constant 1240 : index
    %c0_70 = arith.constant 0 : index
    %219 = vector.load %arg2[%c1240, %c0_70] : memref<1648x128xf32, #tpu.memory_space<vmem>>, vector<128x128xf32>
    %cst_71 = arith.constant dense<0.000000e+00> : vector<128x128xf32>
    %220 = tpu.matmul %218, %219, %cst_71 {dimension_numbers = #tpu.dot_dimension_numbers<[1], [0], [0], [1], [0, 0, 1, 1], [], []>} : vector<128x128xf32>, vector<128x128xf32>, vector<128x128xf32> -> vector<128x128xf32>
    %c1368 = arith.constant 1368 : index
    %c0_72 = arith.constant 0 : index
    %221 = vector.load %arg2[%c1368, %c0_72] : memref<1648x128xf32, #tpu.memory_space<vmem>>, vector<8x128xf32>
    %222 = vector.extract_strided_slice %221 {offsets = [0, 0], sizes = [1, 128], strides = [1, 1]} : vector<8x128xf32> to vector<1x128xf32>
    %223 = vector.broadcast %222 : vector<1x128xf32> to vector<128x128xf32>
    %224 = arith.addf %220, %223 : vector<128x128xf32>
    %cst_73 = arith.constant 0.000000e+00 : f32
    %225 = vector.broadcast %cst_73 : f32 to vector<128x128xf32>
    %226 = arith.cmpf ogt, %224, %225 : vector<128x128xf32>
    %cst_74 = arith.constant 0.000000e+00 : f32
    %227 = vector.broadcast %cst_74 : f32 to vector<128x128xf32>
    %228 = arith.minimumf %224, %227 : vector<128x128xf32>
    %229 = math.exp %228 : vector<128x128xf32>
    %cst_75 = arith.constant 1.000000e+00 : f32
    %230 = vector.broadcast %cst_75 : f32 to vector<128x128xf32>
    %231 = arith.subf %229, %230 : vector<128x128xf32>
    %232 = arith.select %226, %224, %231 : vector<128x128xi1>, vector<128x128xf32>
    %c1376 = arith.constant 1376 : index
    %c0_76 = arith.constant 0 : index
    %233 = vector.load %arg2[%c1376, %c0_76] : memref<1648x128xf32, #tpu.memory_space<vmem>>, vector<128x128xf32>
    %cst_77 = arith.constant dense<0.000000e+00> : vector<128x128xf32>
    %234 = tpu.matmul %232, %233, %cst_77 {dimension_numbers = #tpu.dot_dimension_numbers<[1], [0], [0], [1], [0, 0, 1, 1], [], []>} : vector<128x128xf32>, vector<128x128xf32>, vector<128x128xf32> -> vector<128x128xf32>
    %c1504 = arith.constant 1504 : index
    %c0_78 = arith.constant 0 : index
    %235 = vector.load %arg2[%c1504, %c0_78] : memref<1648x128xf32, #tpu.memory_space<vmem>>, vector<8x128xf32>
    %236 = vector.extract_strided_slice %235 {offsets = [0, 0], sizes = [1, 128], strides = [1, 1]} : vector<8x128xf32> to vector<1x128xf32>
    %237 = vector.broadcast %236 : vector<1x128xf32> to vector<128x128xf32>
    %238 = arith.addf %234, %237 : vector<128x128xf32>
    %cst_79 = arith.constant 0.000000e+00 : f32
    %239 = vector.broadcast %cst_79 : f32 to vector<128x128xf32>
    %240 = arith.cmpf ogt, %238, %239 : vector<128x128xf32>
    %cst_80 = arith.constant 0.000000e+00 : f32
    %241 = vector.broadcast %cst_80 : f32 to vector<128x128xf32>
    %242 = arith.minimumf %238, %241 : vector<128x128xf32>
    %243 = math.exp %242 : vector<128x128xf32>
    %cst_81 = arith.constant 1.000000e+00 : f32
    %244 = vector.broadcast %cst_81 : f32 to vector<128x128xf32>
    %245 = arith.subf %243, %244 : vector<128x128xf32>
    %246 = arith.select %240, %238, %245 : vector<128x128xi1>, vector<128x128xf32>
    %c1512 = arith.constant 1512 : index
    %c0_82 = arith.constant 0 : index
    %247 = vector.load %arg2[%c1512, %c0_82] : memref<1648x128xf32, #tpu.memory_space<vmem>>, vector<128x128xf32>
    %cst_83 = arith.constant dense<0.000000e+00> : vector<128x128xf32>
    %248 = tpu.matmul %246, %247, %cst_83 {dimension_numbers = #tpu.dot_dimension_numbers<[1], [0], [0], [1], [0, 0, 1, 1], [], []>} : vector<128x128xf32>, vector<128x128xf32>, vector<128x128xf32> -> vector<128x128xf32>
    %c1640 = arith.constant 1640 : index
    %c0_84 = arith.constant 0 : index
    %249 = vector.load %arg2[%c1640, %c0_84] : memref<1648x128xf32, #tpu.memory_space<vmem>>, vector<8x128xf32>
    %250 = vector.extract_strided_slice %249 {offsets = [0, 0], sizes = [1, 128], strides = [1, 1]} : vector<8x128xf32> to vector<1x128xf32>
    %251 = vector.broadcast %250 : vector<1x128xf32> to vector<128x128xf32>
    %252 = arith.addf %248, %251 : vector<128x128xf32>
    %253 = arith.negf %252 : vector<128x128xf32>
    %254 = math.exp %253 : vector<128x128xf32>
    %cst_85 = arith.constant 1.000000e+00 : f32
    %255 = vector.broadcast %cst_85 : f32 to vector<128x128xf32>
    %256 = arith.addf %255, %254 : vector<128x128xf32>
    %257 = arith.divf %255, %256 : vector<128x128xf32>
    %c0_86 = arith.constant 0 : index
    %c0_87 = arith.constant 0 : index
    %258 = vector.load %arg3[%c0_86, %c0_87] : memref<128x128xf32, #tpu.memory_space<vmem>>, vector<128x128xf32>
    tpu.vector_store %arg3[%c0_86, %c0_87], %257 {strides = array<i32>} : memref<128x128xf32, #tpu.memory_space<vmem>>, vector<128x128xf32>,
    return
  }
}

</mosaic_0001>

<bundles_post_ra>
// kernel: tpu_custom_call.1
= control target key start
LH: loop header
LB: loop body
LE: loop exit
PB: predicated region body
PF: predicated region fallthrough
CT: control target
= control target key end

     0   :  { %8 = vsyncpa [#allocation3], 0  ;;  %s10097_s0 = inlined_call_operand.hbm [shape: f32[128,128], index: 0, kind: input, shape index: {}]   ;;  %s10098_s1 = inlined_call_operand.hbm [shape: f32[128,128], index: 1, kind: input, shape index: {}]   ;;  %s10099_s2 = inlined_call_operand.hbm [shape: f32[1648,128], index: 2, kind: input, shape index: {}]   ;;  %s10100_s3 = inlined_call_operand.hbm [shape: f32[128,128], index: 3, kind: output, shape index: {}]  }
   0x1   :  { %9 = vsyncpa [#allocation6], 0 }
   0x2   :  { %10 = vsyncpa [#allocation4], 0  ;;  %s7912_s12 = smov [#allocation5]   ;;  %s7913_s14 = smov [#allocation2]  }
   0x3   :  { %s28_s13 = sshll.u32 %s7912_s12, 4  ;;  %s16_s15 = sshll.u32 %s7913_s14, 4  ;;  %s29_s13 = int_to_ptr.vmem [resolvable:$true] %s28_s13  ;;  %s7938_s15 = int_to_ptr.vmem [resolvable:$true] %s16_s15 }
   0x4   :  { %s7818_s18 = scalar_lea.hbm %s10098_s1, 2048 }
   0x5   :  { %p7819_p0 = scmp.ne.s32.totalorder %s10098_s1, %s7818_s18  ;;  %p7822_p1 = scmp.lt.u32.totalorder %s7818_s18, %s10098_s1 }
   0x7   :  { %p7824_p2 = pnand %p7822_p1, %p7819_p0 }
   0x9   :  { %7827 = shalt.err (!%p7824_p2)
}
   0xa   :  { %s7828_s23 = scalar_lea.vmem %s29_s13, 2048  ;;  %p7833_p4 = scmp.lt.s32.totalorder %s29_s13, %s29_s13 }
   0xb   :  { %p7829_p3 = scmp.ne.s32.totalorder %s29_s13, %s7828_s23  ;;  %p7834_p5 = scmp.lt.s32.totalorder %s7828_s23, %s7828_s23 }
   0xd   :  { %p7835_p6 = por %p7834_p5, %p7833_p4 }
   0xf   :  { %p7836_p7 = pnand %p7835_p6, %p7829_p3 }
  0x11   :  { %7839 = shalt.err (!%p7836_p7)
}
  0x12   :  { %s7914_s24 = smov 128   ;;  %s7915_s25 = smov 8  }
  0x13   :  { %34 = dma.hbm_to_vmem [thread:$0]  %s10098_s1, 2048, %s29_s13, [#allocation6], %s7914_s24, %s7914_s24, %s7915_s25  }
  0x14   :  { %s7840_s30 = scalar_lea.hbm %s10097_s0, 2048 }
  0x15   :  { %p7841_p8 = scmp.ne.s32.totalorder %s10097_s0, %s7840_s30  ;;  %p7844_p9 = scmp.lt.u32.totalorder %s7840_s30, %s10097_s0 }
  0x17   :  { %p7846_p10 = pnand %p7844_p9, %p7841_p8 }
  0x19   :  { %7849 = shalt.err (!%p7846_p10)
}
  0x1a   :  { %s7850_s8 = scalar_lea.vmem %s7938_s15, 2048  ;;  %p7855_p12 = scmp.lt.s32.totalorder %s7938_s15, %s7938_s15 }
  0x1b   :  { %p7851_p11 = scmp.ne.s32.totalorder %s7938_s15, %s7850_s8  ;;  %p7856_p13 = scmp.lt.s32.totalorder %s7850_s8, %s7850_s8 }
  0x1d   :  { %p7857_p0 = por %p7856_p13, %p7855_p12 }
  0x1f   :  { %p7858_p1 = pnand %p7857_p0, %p7851_p11 }
  0x21   :  { %7861 = shalt.err (!%p7858_p1)
}
  0x22   :  { %22 = dma.hbm_to_vmem [thread:$0]  %s10097_s0, 2048, %s7938_s15, [#allocation3], %s7914_s24, %s7914_s24, %s7915_s25  }
  0x23   :  { %s7916_s10 = smov [#allocation7]   ;;  %s7862_s14 = scalar_lea.hbm %s10099_s2, 26368 }
  0x24   :  { %s40_s11 = sshll.u32 %s7916_s10, 4  ;;  %p7863_p2 = scmp.ne.s32.totalorder %s10099_s2, %s7862_s14  ;;  %s41_s11 = int_to_ptr.vmem [resolvable:$true] %s40_s11 }
  0x25   :  { %p7866_p3 = scmp.lt.u32.totalorder %s7862_s14, %s10099_s2 }
  0x27   :  { %p7868_p4 = pnand %p7866_p3, %p7863_p2 }
  0x29   :  { %7871 = shalt.err (!%p7868_p4)
}
  0x2a   :  { %s7872_s20 = scalar_lea.vmem %s41_s11, 26368  ;;  %p7877_p6 = scmp.lt.s32.totalorder %s41_s11, %s41_s11 }
  0x2b   :  { %p7873_p5 = scmp.ne.s32.totalorder %s41_s11, %s7872_s20  ;;  %p7878_p7 = scmp.lt.s32.totalorder %s7872_s20, %s7872_s20 }
  0x2d   :  { %p7879_p8 = por %p7878_p7, %p7877_p6 }
  0x2f   :  { %p7880_p9 = pnand %p7879_p8, %p7873_p5 }
  0x31   :  { %7883 = shalt.err (!%p7880_p9)
}
  0x32   :  { %46 = dma.hbm_to_vmem [thread:$0]  %s10099_s2, 26368, %s41_s11, [#allocation6], %s7914_s24, %s7914_s24, %s7915_s25  }
  0x33   :  { %7906 = dma.done.wait [#allocation3], 2048  }
  0x34   :  { %7907 = vsyncadd [#allocation3], 4294965248 }
  0x35   :  { %7908 = dma.done.wait [#allocation6], 28416  }
  0x36   :  { %7909 = vsyncadd [#allocation6], 4294938880  ;;  %v88_v0 = vld [vmem:[#allocation7 + $0x100] sm:$0xff]  ;;  %v89_v1 = vld [vmem:[#allocation7 + $0x108] sm:$0xff]  ;;  %s7917_s2 = smov [#allocation8]  }
  0x37   :  { %v90_v2 = vld [vmem:[#allocation7 + $0x110] sm:$0xff]  ;;  %v6661_v3 = vpack.c.bf16 %v89_v1, %v88_v0  ;;  %v91_v4 = vld [vmem:[#allocation7 + $0x118] sm:$0xff]  ;;  %v92_v6 = vld [vmem:[#allocation7 + $0x120] sm:$0xff]  ;;  %s5104_s21 = sshll.u32 %s7917_s2, 4  ;;  %s5105_s21 = int_to_ptr.vmem [resolvable:$true] %s5104_s21 }
  0x38   :  { %v6665_v5 = vpack.c.bf16 %v91_v4, %v90_v2  ;;  %v93_v7 = vld [vmem:[#allocation7 + $0x128] sm:$0xff]  ;;  %v282_v8 = vld [vmem:[#allocation7] sm:$0xff]  ;;  %v94_v10 = vld [vmem:[#allocation7 + $0x130] sm:$0xff]  ;;  %s7884_s22 = scalar_lea.vmem %s5105_s21, 2048  ;;  %p7889_p11 = scmp.lt.s32.totalorder %s5105_s21, %s5105_s21 }
  0x39   :  { %6662 = vmatprep.subr.bf16.mxu0 %v6661_v3  ;;  %v6669_v9 = vpack.c.bf16 %v93_v7, %v92_v6  ;;  %v95_v11 = vld [vmem:[#allocation7 + $0x138] sm:$0xff]  ;;  %v283_v12 = vld [vmem:[#allocation7 + $0x8] sm:$0xff]  ;;  %v7990_v14 = vld [vmem:[#allocation2] sm:$0xff]  ;;  %p7885_p10 = scmp.ne.s32.totalorder %s5105_s21, %s7884_s22  ;;  %p7890_p12 = scmp.lt.s32.totalorder %s7884_s22, %s7884_s22 }
  0x3a   :  { %6664 = vmatpush3.bf16.msra.mxu0 %v6661_v3  ;;  %v6693_v13 = vpack.c.bf16 %v283_v12, %v282_v8  ;;  %v284_v15 = vld [vmem:[#allocation7 + $0x10] sm:$0xff]  ;;  %v285_v16 = vld [vmem:[#allocation7 + $0x18] sm:$0xff]  ;;  %5741 = vmatprep.mubr.f32.mxu0 %v7990_v14  ;;  %v286_v18 = vld [vmem:[#allocation7 + $0x20] sm:$0xff]  ;;  %v6673_v20 = vpack.c.bf16 %v95_v11, %v94_v10 }
  0x3b   :  { %6666 = vmatprep.subr.bf16.mxu0 %v6665_v5  ;;  %v6697_v17 = vpack.c.bf16 %v285_v16, %v284_v15  ;;  %5797 = vmatprep.mubr.f32.mxu1 %v7990_v14  ;;  %v287_v19 = vld [vmem:[#allocation7 + $0x28] sm:$0xff]  ;;  %v96_v21 = vld [vmem:[#allocation7 + $0x140] sm:$0xff]  ;;  %v288_v24 = vld [vmem:[#allocation7 + $0x30] sm:$0xff]  ;;  %p7891_p13 = por %p7890_p12, %p7889_p11 }
  0x3c   :  { %6694 = vmatprep.subr.bf16.mxu1 %v6693_v13  ;;  %v97_v22 = vld [vmem:[#allocation7 + $0x148] sm:$0xff]  ;;  %v6701_v23 = vpack.c.bf16 %v287_v19, %v286_v18  ;;  %v289_v25 = vld [vmem:[#allocation7 + $0x38] sm:$0xff]  ;;  %v98_v27 = vld [vmem:[#allocation7 + $0x150] sm:$0xff] }
  0x3d   :  { %6696 = vmatpush3.bf16.msra.mxu1 %v6693_v13  ;;  %v6677_v26 = vpack.c.bf16 %v97_v22, %v96_v21  ;;  %v99_v28 = vld [vmem:[#allocation7 + $0x158] sm:$0xff]  ;;  %v6705_v29 = vpack.c.bf16 %v289_v25, %v288_v24  ;;  %v290_v30 = vld [vmem:[#allocation7 + $0x40] sm:$0xff]  ;;  %v291_v31 = vld [vmem:[#allocation7 + $0x48] sm:$0xff]  ;;  %v443_v25 = vlaneseq  ;;  %p7892_p0 = pnand %p7891_p13, %p7885_p10 }
  0x3e   :  { %6668 = vmatpush3.bf16.msra.mxu0 %v6665_v5  ;;  %6698 = vmatprep.subr.bf16.mxu1 %v6697_v17  ;;  %v6681_v32 = vpack.c.bf16 %v99_v28, %v98_v27  ;;  %v100_v33 = vld [vmem:[#allocation7 + $0x160] sm:$0xff]  ;;  %v101_v34 = vld [vmem:[#allocation7 + $0x168] sm:$0xff]  ;;  %v6709_v35 = vpack.c.bf16 %v291_v31, %v290_v30  ;;  %v292_v36 = vld [vmem:[#allocation7 + $0x50] sm:$0xff] }
  0x3f   :  { %6670 = vmatprep.subr.bf16.mxu0 %v6669_v9  ;;  %v293_v37 = vld [vmem:[#allocation7 + $0x58] sm:$0xff]  ;;  %v6685_v38 = vpack.c.bf16 %v101_v34, %v100_v33  ;;  %v102_v39 = vld [vmem:[#allocation7 + $0x170] sm:$0xff]  ;;  %v294_v42 = vld [vmem:[#allocation7 + $0x60] sm:$0xff] }
  0x40   :  { %v103_v40 = vld [vmem:[#allocation7 + $0x178] sm:$0xff]  ;;  %v6713_v41 = vpack.c.bf16 %v293_v37, %v292_v36  ;;  %v295_v43 = vld [vmem:[#allocation7 + $0x68] sm:$0xff]  ;;  %v707_v45 = vld [vmem:[#allocation7 + $0x80] sm:$0xff] }
  0x41   :  { %6700 = vmatpush3.bf16.msra.mxu1 %v6697_v17  ;;  %v6689_v44 = vpack.c.bf16 %v103_v40, %v102_v39  ;;  %v708_v46 = vld [vmem:[#allocation7 + $0x88] sm:$0xff]  ;;  %v6717_v47 = vpack.c.bf16 %v295_v43, %v294_v42  ;;  %v296_v48 = vld [vmem:[#allocation7 + $0x70] sm:$0xff]  ;;  %v297_v49 = vld [vmem:[#allocation7 + $0x78] sm:$0xff] }
  0x42   :  { %6672 = vmatpush3.bf16.msra.mxu0 %v6669_v9  ;;  %6702 = vmatprep.subr.bf16.mxu1 %v6701_v23  ;;  %v6725_v50 = vpack.c.bf16 %v708_v46, %v707_v45  ;;  %v709_v51 = vld [vmem:[#allocation7 + $0x90] sm:$0xff]  ;;  %v710_v52 = vld [vmem:[#allocation7 + $0x98] sm:$0xff]  ;;  %v6721_v53 = vpack.c.bf16 %v297_v49, %v296_v48  ;;  %v7994_v54 = vld [vmem:[#allocation2 + $0x8] sm:$0xff] }
  0x43   :  { %6674 = vmatprep.subr.bf16.mxu0 %v6673_v20  ;;  %v7996_v55 = vld [vmem:[#allocation2 + $0x10] sm:$0xff]  ;;  %v6729_v56 = vpack.c.bf16 %v710_v52, %v709_v51  ;;  %v711_v57 = vld [vmem:[#allocation7 + $0xa0] sm:$0xff]  ;;  %v712_v58 = vld [vmem:[#allocation7 + $0xa8] sm:$0xff] }
  0x44   :  { %v8000_v59 = vld [vmem:[#allocation2 + $0x18] sm:$0xff]  ;;  %v8002_v60 = vld [vmem:[#allocation2 + $0x20] sm:$0xff]  ;;  %v6733_v61 = vpack.c.bf16 %v712_v58, %v711_v57  ;;  %v713_v62 = vld [vmem:[#allocation7 + $0xb0] sm:$0xff] }
  0x45   :  { %6704 = vmatpush3.bf16.msra.mxu1 %v6701_v23  ;;  %v714_v63 = vld [vmem:[#allocation7 + $0xb8] sm:$0xff]  ;;  %v8006_v0 = vld [vmem:[#allocation2 + $0x28] sm:$0xff]  ;;  %v8008_v1 = vld [vmem:[#allocation2 + $0x30] sm:$0xff] }
  0x46   :  { %6676 = vmatpush3.bf16.msra.mxu0 %v6673_v20  ;;  %6706 = vmatprep.subr.bf16.mxu1 %v6705_v29  ;;  %v6737_v2 = vpack.c.bf16 %v714_v63, %v713_v62  ;;  %v715_v3 = vld [vmem:[#allocation7 + $0xc0] sm:$0xff]  ;;  %v716_v4 = vld [vmem:[#allocation7 + $0xc8] sm:$0xff]  ;;  %v63_v5 = vld [vmem:[#allocation2 + $0x38] sm:$0xff] }
  0x47   :  { %6678 = vmatprep.subr.bf16.mxu0 %v6677_v26  ;;  %v64_v6 = vld [vmem:[#allocation2 + $0x40] sm:$0xff]  ;;  %v6741_v7 = vpack.c.bf16 %v716_v4, %v715_v3  ;;  %v717_v8 = vld [vmem:[#allocation7 + $0xd0] sm:$0xff]  ;;  %v718_v9 = vld [vmem:[#allocation7 + $0xd8] sm:$0xff] }
  0x48   :  { %v65_v10 = vld [vmem:[#allocation2 + $0x48] sm:$0xff]  ;;  %v66_v11 = vld [vmem:[#allocation2 + $0x50] sm:$0xff]  ;;  %v6745_v12 = vpack.c.bf16 %v718_v9, %v717_v8  ;;  %v719_v13 = vld [vmem:[#allocation7 + $0xe0] sm:$0xff] }
  0x49   :  { %6708 = vmatpush3.bf16.msra.mxu1 %v6705_v29  ;;  %v720_v15 = vld [vmem:[#allocation7 + $0xe8] sm:$0xff]  ;;  %v67_v16 = vld [vmem:[#allocation2 + $0x58] sm:$0xff]  ;;  %v68_v17 = vld [vmem:[#allocation2 + $0x60] sm:$0xff] }
  0x4a   :  { %6680 = vmatpush3.bf16.msra.mxu0 %v6677_v26  ;;  %6710 = vmatprep.subr.bf16.mxu1 %v6709_v35  ;;  %v6749_v18 = vpack.c.bf16 %v720_v15, %v719_v13  ;;  %v721_v19 = vld [vmem:[#allocation7 + $0xf0] sm:$0xff]  ;;  %v722_v20 = vld [vmem:[#allocation7 + $0xf8] sm:$0xff]  ;;  %v69_v21 = vld [vmem:[#allocation2 + $0x68] sm:$0xff]  ;;  %v444_v26 = vshrl.u32 %v443_v25, 7 }
  0x4b   :  { %6682 = vmatprep.subr.bf16.mxu0 %v6681_v32  ;;  %v70_v22 = vld [vmem:[#allocation2 + $0x70] sm:$0xff]  ;;  %v6753_v23 = vpack.c.bf16 %v722_v20, %v721_v19  ;;  %v71_v24 = vld [vmem:[#allocation2 + $0x78] sm:$0xff]  ;;  %v281_v29 = vld [vmem:[#allocation7 + $0x180] sm:$0xff] }
  0x4c   :  { %v8026_v27 = vsub.s32 0, %v444_v26  ;;  %v8095_v3 = vsub.s32 1, %v444_v26 }
  0x4d   :  { %6712 = vmatpush3.bf16.msra.mxu1 %v6709_v35 }
  0x4e   :  { %6684 = vmatpush3.bf16.msra.mxu0 %v6681_v32  ;;  %6714 = vmatprep.subr.bf16.mxu1 %v6713_v41  ;;  %10123 = vst [vmem:[#allocation12_spill] sm:$0xff] %v8026_v27  ;;  %v8033_v31 = vrot.slane %v281_v29, %v8026_v27  ;;  %10124 = vst [vmem:[#allocation13_spill] sm:$0xff] %v8095_v3 }
  0x4f   :  { %6686 = vmatprep.subr.bf16.mxu0 %v6685_v38 }
  0x51   :  { %6716 = vmatpush3.bf16.msra.mxu1 %v6713_v41 }
  0x52   :  { %6688 = vmatpush3.bf16.msra.mxu0 %v6685_v38  ;;  %6718 = vmatprep.subr.bf16.mxu1 %v6717_v47 }
  0x53   :  { %6690 = vmatprep.subr.bf16.mxu0 %v6689_v44 }
  0x55   :  { %6720 = vmatpush3.bf16.msra.mxu1 %v6717_v47 }
  0x56   :  { %6692 = vmatpush3.bf16.msra.mxu0 %v6689_v44  ;;  %6722 = vmatprep.subr.bf16.mxu1 %v6721_v53 }
  0x57   :  { %6726 = vmatprep.subr.bf16.mxu0 %v6725_v50 }
  0x59   :  { %5742 = vmatmul.mubr.f32.vlgmr.msra.gmra.mrb[0].mxu0 %v7994_v54  ;;  %6724 = vmatpush3.bf16.msra.mxu1 %v6721_v53 }
  0x5a   :  { %6728 = vmatpush3.bf16.msra.mxu0 %v6725_v50  ;;  %5744 = vmatprep.mubr.f32.mxu0 %v7996_v55 }
  0x5b   :  { %6730 = vmatprep.subr.bf16.mxu0 %v6729_v56 }
  0x5c   :  { %5798 = vmatmul.mubr.f32.vlgmr.msra.gmra.mrb[0].mxu1 %v7994_v54 }
  0x5d   :  { %5745 = vmatmul.mubr.f32.gmra.mrb[2].mxu0 %v8000_v59  ;;  %5800 = vmatprep.mubr.f32.mxu1 %v7996_v55 }
  0x5e   :  { %6732 = vmatpush3.bf16.msra.mxu0 %v6729_v56  ;;  %5747 = vmatprep.mubr.f32.mxu0 %v8002_v60 }
  0x5f   :  { %6734 = vmatprep.subr.bf16.mxu0 %v6733_v61 }
  0x60   :  { %5801 = vmatmul.mubr.f32.gmra.mrb[2].mxu1 %v8000_v59 }
  0x61   :  { %5748 = vmatmul.mubr.f32.gmra.mrb[4].mxu0 %v8006_v0  ;;  %5803 = vmatprep.mubr.f32.mxu1 %v8002_v60 }
  0x62   :  { %6736 = vmatpush3.bf16.msra.mxu0 %v6733_v61  ;;  %5750 = vmatprep.mubr.f32.mxu0 %v8008_v1 }
  0x63   :  { %6738 = vmatprep.subr.bf16.mxu0 %v6737_v2 }
  0x64   :  { %5804 = vmatmul.mubr.f32.gmra.mrb[4].mxu1 %v8006_v0 }
  0x65   :  { %5751 = vmatmul.mubr.f32.gmra.mrb[6].mxu0 %v63_v5  ;;  %5806 = vmatprep.mubr.f32.mxu1 %v8008_v1 }
  0x66   :  { %6740 = vmatpush3.bf16.msra.mxu0 %v6737_v2  ;;  %5753 = vmatprep.mubr.f32.mxu0 %v64_v6 }
  0x67   :  { %6742 = vmatprep.subr.bf16.mxu0 %v6741_v7 }
  0x68   :  { %5807 = vmatmul.mubr.f32.gmra.mrb[6].mxu1 %v63_v5 }
  0x69   :  { %5754 = vmatmul.mubr.f32.gmra.mrb[8].mxu0 %v65_v10  ;;  %5809 = vmatprep.mubr.f32.mxu1 %v64_v6 }
  0x6a   :  { %6744 = vmatpush3.bf16.msra.mxu0 %v6741_v7  ;;  %5756 = vmatprep.mubr.f32.mxu0 %v66_v11 }
  0x6b   :  { %6746 = vmatprep.subr.bf16.mxu0 %v6745_v12 }
  0x6c   :  { %5810 = vmatmul.mubr.f32.gmra.mrb[8].mxu1 %v65_v10 }
  0x6d   :  { %5757 = vmatmul.mubr.f32.gmra.mrb[10].mxu0 %v67_v16  ;;  %5812 = vmatprep.mubr.f32.mxu1 %v66_v11 }
  0x6e   :  { %6748 = vmatpush3.bf16.msra.mxu0 %v6745_v12  ;;  %5759 = vmatprep.mubr.f32.mxu0 %v68_v17 }
  0x6f   :  { %6750 = vmatprep.subr.bf16.mxu0 %v6749_v18 }
  0x70   :  { %5813 = vmatmul.mubr.f32.gmra.mrb[10].mxu1 %v67_v16 }
  0x71   :  { %5760 = vmatmul.mubr.f32.gmra.mrb[12].mxu0 %v69_v21  ;;  %5815 = vmatprep.mubr.f32.mxu1 %v68_v17 }
  0x72   :  { %6752 = vmatpush3.bf16.msra.mxu0 %v6749_v18  ;;  %5762 = vmatprep.mubr.f32.mxu0 %v70_v22 }
  0x73   :  { %6754 = vmatprep.subr.bf16.mxu0 %v6753_v23 }
  0x74   :  { %5816 = vmatmul.mubr.f32.gmra.mrb[12].mxu1 %v69_v21 }
  0x75   :  { %5763 = vmatmul.mubr.f32.gmra.mrb[14].mxu0 %v71_v24  ;;  %5818 = vmatprep.mubr.f32.mxu1 %v70_v22 }
  0x76   :  { %6756 = vmatpush3.bf16.msra.mxu0 %v6753_v23  ;;  %5853 = vmatprep.mubr.f32.mxu0 %v7990_v14 }
  0x78   :  { %5819 = vmatmul.mubr.f32.gmra.mrb[14].mxu1 %v71_v24 }
  0x79   :  { %5854 = vmatmul.mubr.f32.vlgmr.msra.gmra.mrb[16].mxu0 %v7994_v54 }
  0x7a   :  { %5856 = vmatprep.mubr.f32.mxu0 %v7996_v55 }
  0x7d   :  { %5857 = vmatmul.mubr.f32.gmra.mrb[18].mxu0 %v8000_v59 }
  0x7e   :  { %5859 = vmatprep.mubr.f32.mxu0 %v8002_v60 }
  0x81   :  { %5860 = vmatmul.mubr.f32.gmra.mrb[20].mxu0 %v8006_v0 }
  0x82   :  { %5862 = vmatprep.mubr.f32.mxu0 %v8008_v1 }
  0x85   :  { %5863 = vmatmul.mubr.f32.gmra.mrb[22].mxu0 %v63_v5 }
  0x86   :  { %5865 = vmatprep.mubr.f32.mxu0 %v64_v6 }
  0x89   :  { %5866 = vmatmul.mubr.f32.gmra.mrb[24].mxu0 %v65_v10 }
  0x8a   :  { %5868 = vmatprep.mubr.f32.mxu0 %v66_v11  ;;  %v8110_v11 = vrot.slane %v281_v29, %v8095_v3 }
  0x8d   :  { %5869 = vmatmul.mubr.f32.gmra.mrb[26].mxu0 %v67_v16 }
  0x8e   :  { %5871 = vmatprep.mubr.f32.mxu0 %v68_v17 }
  0x91   :  { %5872 = vmatmul.mubr.f32.gmra.mrb[28].mxu0 %v69_v21 }
  0x92   :  { %5874 = vmatprep.mubr.f32.mxu0 %v70_v22 }
  0x95   :  { %5875 = vmatmul.mubr.f32.gmra.mrb[30].mxu0 %v71_v24 }
  0x96   :  { %6021 = vmatprep.mubr.f32.mxu0 %v7990_v14 }
 0x12c   :  { %v8028_v28 = vpop.f32.mrb[0].mxu0 }
 0x12d   :  { %v8030_v30 = vpop.f32.mrb[1].mxu0 }
 0x12f   :  { %v5799_v34 = vpop.f32.mrb[0].mxu1 }
 0x130   :  { %v8035_v32 = vpop.f32.mrb[2].mxu0  ;;  %v364_v35 = vpop.f32.mrb[1].mxu1  ;;  %v448_v14 = vmul.f32 %v5799_v34, %v8033_v31 }
 0x131   :  { %v8037_v33 = vpop.f32.mrb[3].mxu0  ;;  %v8042_v37 = vpack.c.bf16 %v5799_v34, %v364_v35  ;;  %v447_v38 = vmul.f32 %v8033_v31, %v364_v35 }
 0x132   :  { %465 = vadd.xlane.f32.xlu1 %v448_v14 }
 0x133   :  { %463 = vadd.xlane.f32.xlu0 %v447_v38  ;;  %v5802_v40 = vpop.f32.mrb[2].mxu1 }
 0x134   :  { %v8040_v36 = vpop.f32.mrb[4].mxu0  ;;  %v8047_v41 = vpop.f32.mrb[3].mxu1  ;;  %v8050_v42 = vmul.f32 %v5802_v40, %v8033_v31 }
 0x135   :  { %v8045_v39 = vpop.f32.mrb[5].mxu0  ;;  %v8055_v44 = vpack.c.bf16 %v5802_v40, %v8047_v41 }
 0x137   :  { %v5805_v46 = vpop.f32.mrb[4].mxu1 }
 0x138   :  { %v8052_v43 = vpop.f32.mrb[6].mxu0  ;;  %v384_v47 = vpop.f32.mrb[5].mxu1  ;;  %v8060_v48 = vmul.f32 %v5805_v46, %v8033_v31 }
 0x139   :  { %v8057_v45 = vpop.f32.mrb[7].mxu0  ;;  %v8064_v50 = vpack.c.bf16 %v5805_v46, %v384_v47  ;;  %v8067_v51 = vmul.f32 %v8033_v31, %v384_v47 }
 0x13b   :  { %v5808_v53 = vpop.f32.mrb[6].mxu1 }
 0x13c   :  { %v8062_v49 = vpop.f32.mrb[8].mxu0  ;;  %v394_v54 = vpop.f32.mrb[7].mxu1  ;;  %v8072_v55 = vmul.f32 %v5808_v53, %v8033_v31 }
 0x13d   :  { %v8069_v52 = vpop.f32.mrb[9].mxu0  ;;  %v8076_v57 = vpack.c.bf16 %v5808_v53, %v394_v54  ;;  %v8079_v58 = vmul.f32 %v8033_v31, %v394_v54 }
 0x13f   :  { %v5811_v60 = vpop.f32.mrb[8].mxu1 }
 0x140   :  { %v8074_v56 = vpop.f32.mrb[10].mxu0  ;;  %v404_v61 = vpop.f32.mrb[9].mxu1  ;;  %v8084_v62 = vmul.f32 %v5811_v60, %v8033_v31 }
 0x141   :  { %v8081_v59 = vpop.f32.mrb[11].mxu0  ;;  %v8088_v0 = vpack.c.bf16 %v5811_v60, %v404_v61  ;;  %v8091_v1 = vmul.f32 %v8033_v31, %v404_v61 }
 0x143   :  { %v5814_v4 = vpop.f32.mrb[10].mxu1 }
 0x144   :  { %v8086_v63 = vpop.f32.mrb[12].mxu0  ;;  %v414_v5 = vpop.f32.mrb[11].mxu1  ;;  %v8098_v6 = vmul.f32 %v5814_v4, %v8033_v31 }
 0x145   :  { %v8093_v2 = vpop.f32.mrb[13].mxu0  ;;  %v8102_v8 = vpack.c.bf16 %v5814_v4, %v414_v5  ;;  %v8105_v9 = vmul.f32 %v8033_v31, %v414_v5 }
 0x147   :  { %v5817_v12 = vpop.f32.mrb[12].mxu1 }
 0x148   :  { %v8100_v7 = vpop.f32.mrb[14].mxu0  ;;  %v424_v13 = vpop.f32.mrb[13].mxu1  ;;  %v8113_v15 = vmul.f32 %v5817_v12, %v8033_v31 }
 0x149   :  { %v8107_v10 = vpop.f32.mrb[15].mxu0  ;;  %v8115_v17 = vpack.c.bf16 %v5817_v12, %v424_v13  ;;  %v8118_v18 = vmul.f32 %v8033_v31, %v424_v13 }
 0x14b   :  { %v5820_v22 = vpop.f32.mrb[14].mxu1 }
 0x14c   :  { %v5855_v16 = vpop.f32.mrb[16].mxu0  ;;  %v434_v23 = vpop.f32.mrb[15].mxu1  ;;  %v8122_v24 = vmul.f32 %v5820_v22, %v8033_v31 }
 0x14d   :  { %v789_v19 = vpop.f32.mrb[17].mxu0  ;;  %v873_v20 = vmul.f32 %v5855_v16, %v8110_v11  ;;  %v8124_v26 = vpack.c.bf16 %v5820_v22, %v434_v23  ;;  %v8127_v29 = vmul.f32 %v8033_v31, %v434_v23 }
 0x14e   :  { %v6757_v21 = vpack.c.bf16 %v5855_v16, %v789_v19  ;;  %v872_v35 = vmul.f32 %v8110_v11, %v789_v19 }
 0x14f   :  { %890 = vadd.xlane.f32.xlu0 %v873_v20 }
 0x150   :  { %v5858_v25 = vpop.f32.mrb[18].mxu0  ;;  %6758 = vmatprep.subr.bf16.mxu1 %v6757_v21 }
 0x151   :  { %v799_v34 = vpop.f32.mrb[19].mxu0  ;;  %6760 = vmatpush3.bf16.msra.mxu1 %v6757_v21  ;;  %v875_v14 = vmul.f32 %v5858_v25, %v8110_v11 }
 0x152   :  { %v6761_v38 = vpack.c.bf16 %v5858_v25, %v799_v34  ;;  %v874_v47 = vmul.f32 %v8110_v11, %v799_v34 }
 0x153   :  { %888 = vadd.xlane.f32.xlu0 %v872_v35  ;;  %894 = vadd.xlane.f32.xlu1 %v875_v14 }
 0x154   :  { %v5861_v40 = vpop.f32.mrb[20].mxu0  ;;  %6762 = vmatprep.subr.bf16.mxu1 %v6761_v38 }
 0x155   :  { %v809_v46 = vpop.f32.mrb[21].mxu0  ;;  %6764 = vmatpush3.bf16.msra.mxu1 %v6761_v38  ;;  %v877_v4 = vmul.f32 %v5861_v40, %v8110_v11 }
 0x156   :  { %v6765_v53 = vpack.c.bf16 %v5861_v40, %v809_v46  ;;  %v876_v54 = vmul.f32 %v8110_v11, %v809_v46 }
 0x157   :  { %892 = vadd.xlane.f32.xlu1 %v874_v47 }
 0x158   :  { %6766 = vmatprep.subr.bf16.mxu1 %v6765_v53  ;;  %896 = vadd.xlane.f32.xlu0 %v876_v54  ;;  %v5864_v60 = vpop.f32.mrb[22].mxu0 }
 0x159   :  { %v819_v61 = vpop.f32.mrb[23].mxu0  ;;  %6768 = vmatpush3.bf16.msra.mxu1 %v6765_v53  ;;  %v879_v19 = vmul.f32 %v5864_v60, %v8110_v11 }
 0x15a   :  { %v6769_v5 = vpack.c.bf16 %v5864_v60, %v819_v61  ;;  %v878_v12 = vmul.f32 %v8110_v11, %v819_v61 }
 0x15b   :  { %898 = vadd.xlane.f32.xlu1 %v877_v4 }
 0x15c   :  { %6770 = vmatprep.subr.bf16.mxu1 %v6769_v5  ;;  %900 = vadd.xlane.f32.xlu0 %v878_v12  ;;  %v5867_v13 = vpop.f32.mrb[24].mxu0  ;;  %v449_v12 = vmul.f32 %v8033_v31, %v8047_v41 }
 0x15d   :  { %v829_v16 = vpop.f32.mrb[25].mxu0  ;;  %6772 = vmatpush3.bf16.msra.mxu1 %v6769_v5  ;;  %v881_v25 = vmul.f32 %v5867_v13, %v8110_v11 }
 0x15e   :  { %v6773_v20 = vpack.c.bf16 %v5867_v13, %v829_v16  ;;  %v880_v21 = vmul.f32 %v8110_v11, %v829_v16 }
 0x15f   :  { %902 = vadd.xlane.f32.xlu1 %v879_v19 }
 0x160   :  { %6774 = vmatprep.subr.bf16.mxu1 %v6773_v20  ;;  %904 = vadd.xlane.f32.xlu0 %v880_v21  ;;  %v5870_v22 = vpop.f32.mrb[26].mxu0 }
 0x161   :  { %v839_v23 = vpop.f32.mrb[27].mxu0  ;;  %6776 = vmatpush3.bf16.msra.mxu1 %v6773_v20  ;;  %v883_v40 = vmul.f32 %v5870_v22, %v8110_v11 }
 0x162   :  { %v6777_v34 = vpack.c.bf16 %v5870_v22, %v839_v23  ;;  %v882_v35 = vmul.f32 %v8110_v11, %v839_v23  ;;  %v85_v23 = vld [vmem:[#allocation5 + $0x68] sm:$0xff] }
 0x163   :  { %906 = vadd.xlane.f32.xlu1 %v881_v25  ;;  %v8223_v25 = vld [vmem:[#allocation5 + $0x8] sm:$0xff] }
 0x164   :  { %6778 = vmatprep.subr.bf16.mxu1 %v6777_v34  ;;  %908 = vadd.xlane.f32.xlu0 %v882_v35  ;;  %v5873_v14 = vpop.f32.mrb[28].mxu0 }
 0x165   :  { %v849_v38 = vpop.f32.mrb[29].mxu0  ;;  %6780 = vmatpush3.bf16.msra.mxu1 %v6777_v34  ;;  %v885_v60 = vmul.f32 %v5873_v14, %v8110_v11 }
 0x166   :  { %v6781_v46 = vpack.c.bf16 %v5873_v14, %v849_v38  ;;  %v884_v47 = vmul.f32 %v8110_v11, %v849_v38 }
 0x167   :  { %910 = vadd.xlane.f32.xlu1 %v883_v40 }
 0x168   :  { %6782 = vmatprep.subr.bf16.mxu1 %v6781_v46  ;;  %912 = vadd.xlane.f32.xlu0 %v884_v47  ;;  %v5876_v53 = vpop.f32.mrb[30].mxu0 }
 0x169   :  { %v859_v54 = vpop.f32.mrb[31].mxu0  ;;  %6784 = vmatpush3.bf16.msra.mxu1 %v6781_v46  ;;  %v887_v5 = vmul.f32 %v5876_v53, %v8110_v11 }
 0x16a   :  { %v6785_v61 = vpack.c.bf16 %v5876_v53, %v859_v54  ;;  %v886_v4 = vmul.f32 %v8110_v11, %v859_v54 }
 0x16b   :  { %914 = vadd.xlane.f32.xlu1 %v885_v60  ;;  %v8233_v60 = vld [vmem:[#allocation5] sm:$0xff] }
 0x16c   :  { %6786 = vmatprep.subr.bf16.mxu1 %v6785_v61  ;;  %916 = vadd.xlane.f32.xlu0 %v886_v4 }
 0x16d   :  { %6788 = vmatpush3.bf16.msra.mxu1 %v6785_v61  ;;  %v8235_v61 = vld [vmem:[#allocation5 + $0x48] sm:$0xff] }
 0x16e   :  { %6790 = vmatprep.subr.bf16.mxu1 %v8042_v37 }
 0x16f   :  { %918 = vadd.xlane.f32.xlu1 %v887_v5 }
 0x173   :  { %467 = vadd.xlane.f32.xlu1 %v449_v12 }
 0x177   :  { %469 = vadd.xlane.f32.xlu1 %v8050_v42 }
 0x17b   :  { %471 = vadd.xlane.f32.xlu1 %v8067_v51 }
 0x17f   :  { %473 = vadd.xlane.f32.xlu1 %v8060_v48 }
 0x183   :  { %475 = vadd.xlane.f32.xlu1 %v8079_v58 }
 0x187   :  { %477 = vadd.xlane.f32.xlu1 %v8072_v55 }
 0x18b   :  { %479 = vadd.xlane.f32.xlu1 %v8091_v1 }
 0x18f   :  { %481 = vadd.xlane.f32.xlu1 %v8084_v62 }
 0x193   :  { %483 = vadd.xlane.f32.xlu1 %v8105_v9 }
 0x197   :  { %485 = vadd.xlane.f32.xlu1 %v8098_v6 }
 0x199   :  { %249 = vxpose.xlu0.b32.start [1/16] (narrow) %v8030_v30, 8 }
 0x19b   :  { %487 = vadd.xlane.f32.xlu1 %v8118_v18 }
 0x19d   :  { %250 = vxpose.xlu0.b32.cont [2/16] (narrow) %v8028_v28, 8 }
 0x19f   :  { %489 = vadd.xlane.f32.xlu1 %v8113_v15 }
 0x1a1   :  { %251 = vxpose.xlu0.b32.cont [3/16] (narrow) %v8037_v33, 8 }
 0x1a3   :  { %491 = vadd.xlane.f32.xlu1 %v8127_v29 }
 0x1a5   :  { %252 = vxpose.xlu0.b32.cont [4/16] (narrow) %v8035_v32, 8 }
 0x1a7   :  { %493 = vadd.xlane.f32.xlu1 %v8122_v24 }
 0x1a9   :  { %253 = vxpose.xlu0.b32.cont [5/16] (narrow) %v8045_v39, 8 }
 0x1ad   :  { %254 = vxpose.xlu0.b32.cont [6/16] (narrow) %v8040_v36, 8 }
 0x1b1   :  { %255 = vxpose.xlu0.b32.cont [7/16] (narrow) %v8057_v45, 8 }
 0x1b5   :  { %256 = vxpose.xlu0.b32.cont [8/16] (narrow) %v8052_v43, 8 }
 0x1b9   :  { %257 = vxpose.xlu0.b32.cont [9/16] (narrow) %v8069_v52, 8 }
 0x1bd   :  { %258 = vxpose.xlu0.b32.cont [10/16] (narrow) %v8062_v49, 8 }
 0x1bf   :  { %v8176_v28 = vpop.xlane.xlu1 %465 }
 0x1c0   :  { %v8178_v32 = vpop.xlane.xlu0 %463 }
 0x1c1   :  { %259 = vxpose.xlu0.b32.cont [11/16] (narrow) %v8081_v59, 8 }
 0x1c5   :  { %260 = vxpose.xlu0.b32.cont [12/16] (narrow) %v8074_v56, 8 }
 0x1c9   :  { %261 = vxpose.xlu0.b32.cont [13/16] (narrow) %v8093_v2, 8 }
 0x1cd   :  { %262 = vxpose.xlu0.b32.cont [14/16] (narrow) %v8086_v63, 8 }
 0x1d1   :  { %263 = vxpose.xlu0.b32.cont [15/16] (narrow) %v8107_v10, 8 }
 0x1d5   :  { %264 = vxpose.xlu0.b32.end [16/16] (narrow) %v8100_v7, 8 }
 0x1dc   :  { %v891_v36 = vpop.xlane.xlu0 %890 }
 0x1e0   :  { %v895_v30 = vpop.xlane.xlu1 %894  ;;  %v889_v42 = vpop.xlane.xlu0 %888 }
 0x1e4   :  { %v893_v31 = vpop.xlane.xlu1 %892 }
 0x1e5   :  { %v897_v45 = vpop.xlane.xlu0 %896 }
 0x1e8   :  { %v899_v33 = vpop.xlane.xlu1 %898 }
 0x1e9   :  { %v8188_v51 = vpop.xlane.xlu0 %900 }
 0x1ec   :  { %v8180_v39 = vpop.xlane.xlu1 %902 }
 0x1ed   :  { %v8192_v55 = vpop.xlane.xlu0 %904 }
 0x1f0   :  { %v8182_v41 = vpop.xlane.xlu1 %906 }
 0x1f1   :  { %v8198_v59 = vpop.xlane.xlu0 %908 }
 0x1f4   :  { %v8184_v43 = vpop.xlane.xlu1 %910 }
 0x1f5   :  { %v8202_v63 = vpop.xlane.xlu0 %912 }
 0x1f8   :  { %v915_v48 = vpop.xlane.xlu1 %914 }
 0x1f9   :  { %v8208_v6 = vpop.xlane.xlu0 %916 }
 0x1fc   :  { %v8186_v49 = vpop.xlane.xlu1 %918 }
 0x200   :  { %v8190_v52 = vpop.xlane.xlu1 %467 }
 0x204   :  { %v8194_v56 = vpop.xlane.xlu1 %469 }
 0x208   :  { %v8196_v58 = vpop.xlane.xlu1 %471 }
 0x20c   :  { %v8200_v62 = vpop.xlane.xlu1 %473 }
 0x210   :  { %v8204_v1 = vpop.xlane.xlu1 %475 }
 0x214   :  { %v8206_v2 = vpop.xlane.xlu1 %477 }
 0x218   :  { %v8210_v7 = vpop.xlane.xlu1 %479 }
 0x219   :  { %v265_v9 = vpop.trf.xlu0 }
 0x21a   :  { %v8213_v10 = vrot.slane %v265_v9, %v8026_v27  ;;  %v8216_v11 = vrot.slane %v265_v9, %v8095_v3  ;;  %v8247_v9 = vld [vmem:[#allocation5 + $0x18] sm:$0xff]  ;;  %v8316_v3 = vld [vmem:[#allocation5 + $0x40] sm:$0xff] }
 0x21c   :  { %v482_v15 = vpop.xlane.xlu1 %481  ;;  %v937_v18 = vadd.f32 %v8216_v11, %v915_v48  ;;  %v925_v24 = vadd.f32 %v8216_v11, %v891_v36  ;;  %v924_v29 = vadd.f32 %v8216_v11, %v889_v42  ;;  %v927_v16 = vadd.f32 %v8216_v11, %v895_v30 }
 0x21d   :  { %v508_v13 = vadd.f32 %v8213_v10, %v482_v15  ;;  %v926_v40 = vadd.f32 %v8216_v11, %v893_v31  ;;  %v929_v12 = vadd.f32 %v8216_v11, %v899_v33 }
 0x21e   :  { %v953_v19 = vmul.f32 0.2, %v937_v18  ;;  %v941_v20 = vmul.f32 0.2, %v925_v24  ;;  %v940_v21 = vmul.f32 0.2, %v924_v29 }
 0x21f   :  { %v524_v22 = vmul.f32 0.2, %v508_v13  ;;  %v943_v38 = vmul.f32 0.2, %v927_v16  ;;  %v942_v42 = vmul.f32 0.2, %v926_v40 }
 0x220   :  { %v8225_v34 = vpop.xlane.xlu1 %483  ;;  %v969_v35 = vmax.f32 %v937_v18, %v953_v19  ;;  %v957_v14 = vmax.f32 %v925_v24, %v941_v20  ;;  %v956_v53 = vmax.f32 %v924_v29, %v940_v21  ;;  %v83_v24 = vld [vmem:[#allocation5 + $0x58] sm:$0xff]  ;;  %v928_v19 = vadd.f32 %v8216_v11, %v897_v45  ;;  %v8259_v20 = vld [vmem:[#allocation5 + $0x10] sm:$0xff] }
 0x221   :  { %v540_v54 = vmax.f32 %v508_v13, %v524_v22  ;;  %v959_v36 = vmax.f32 %v927_v16, %v943_v38  ;;  %v958_v29 = vmax.f32 %v926_v40, %v942_v42  ;;  %v945_v13 = vmul.f32 0.2, %v929_v12 }
 0x222   :  { %v8228_v46 = vadd.f32 %v969_v35, %v85_v23  ;;  %v8231_v47 = vadd.f32 %v957_v14, %v8223_v25  ;;  %v8242_v30 = vadd.f32 %v956_v53, %v8233_v60  ;;  %v944_v38 = vmul.f32 0.2, %v928_v19  ;;  %v8269_v53 = vld [vmem:[#allocation5 + $0x28] sm:$0xff] }
 0x223   :  { %v8245_v31 = vadd.f32 %v540_v54, %v8235_v61  ;;  %v8254_v33 = vadd.f32 %v959_v36, %v8247_v9  ;;  %v8265_v35 = vadd.f32 %v958_v29, %v8259_v20  ;;  %v961_v14 = vmax.f32 %v929_v12, %v945_v13 }
 0x224   :  { %v486_v4 = vpop.xlane.xlu1 %485  ;;  %1014 = vmax.xlane.f32.xlu0 %v8228_v46  ;;  %990 = vmax.xlane.f32.xlu1 %v8231_v47  ;;  %v931_v40 = vadd.f32 %v8216_v11, %v8180_v39  ;;  %v960_v36 = vmax.f32 %v928_v19, %v944_v38  ;;  %v930_v12 = vadd.f32 %v8216_v11, %v8188_v51 }
 0x225   :  { %v510_v5 = vadd.f32 %v8213_v10, %v486_v4 }
 0x226   :  { %v947_v42 = vmul.f32 0.2, %v931_v40  ;;  %v946_v19 = vmul.f32 0.2, %v930_v12 }
 0x227   :  { %v526_v48 = vmul.f32 0.2, %v510_v5 }
 0x228   :  { %v8249_v15 = vpop.xlane.xlu1 %487  ;;  %988 = vmax.xlane.f32.xlu1 %v8242_v30  ;;  %581 = vmax.xlane.f32.xlu0 %v8245_v31 }
 0x229   :  { %v542_v18 = vmax.f32 %v510_v5, %v526_v48  ;;  %v8275_v5 = vadd.f32 %v961_v14, %v8269_v53 }
 0x22b   :  { %v8257_v16 = vadd.f32 %v542_v18, %v83_v24  ;;  %v8281_v18 = vld [vmem:[#allocation5 + $0x20] sm:$0xff] }
 0x22c   :  { %v490_v21 = vpop.xlane.xlu1 %489  ;;  %994 = vmax.xlane.f32.xlu1 %v8254_v33  ;;  %v8287_v13 = vadd.f32 %v960_v36, %v8281_v18  ;;  %v932_v36 = vadd.f32 %v8216_v11, %v8192_v55 }
 0x22d   :  { %v512_v22 = vadd.f32 %v8213_v10, %v490_v21  ;;  %585 = vmax.xlane.f32.xlu0 %v8257_v16  ;;  %v963_v21 = vmax.f32 %v931_v40, %v947_v42  ;;  %v8301_v42 = vld [vmem:[#allocation5 + $0x30] sm:$0xff] }
 0x22f   :  { %v528_v45 = vmul.f32 0.2, %v512_v22 }
 0x230   :  { %v8271_v54 = vpop.xlane.xlu1 %491  ;;  %992 = vmax.xlane.f32.xlu1 %v8265_v35 }
 0x231   :  { %v544_v4 = vmax.f32 %v512_v22, %v528_v45  ;;  %v933_v22 = vadd.f32 %v8216_v11, %v8182_v41  ;;  %v87_v45 = vld [vmem:[#allocation5 + $0x78] sm:$0xff] }
 0x233   :  { %v8279_v48 = vadd.f32 %v544_v4, %v85_v23  ;;  %v8291_v23 = vld [vmem:[#allocation5 + $0x38] sm:$0xff]  ;;  %v962_v4 = vmax.f32 %v930_v12, %v946_v19  ;;  %v935_v12 = vadd.f32 %v8216_v11, %v8184_v43  ;;  %v499_v43 = vadd.f32 %v8213_v10, %v8178_v32 }
 0x234   :  { %v494_v39 = vpop.xlane.xlu1 %493  ;;  %998 = vmax.xlane.f32.xlu1 %v8275_v5  ;;  %v8295_v38 = vadd.f32 %v963_v21, %v8291_v23  ;;  %v948_v21 = vmul.f32 0.2, %v932_v36  ;;  %v501_v32 = vadd.f32 %v8213_v10, %v8190_v52  ;;  %v936_v52 = vadd.f32 %v8216_v11, %v8202_v63 }
 0x235   :  { %v514_v29 = vadd.f32 %v8213_v10, %v494_v39  ;;  %589 = vmax.xlane.f32.xlu0 %v8279_v48  ;;  %v949_v39 = vmul.f32 0.2, %v933_v22  ;;  %v8306_v41 = vadd.f32 %v962_v4, %v8301_v42  ;;  %v938_v63 = vadd.f32 %v8216_v11, %v8208_v6  ;;  %v86_v6 = vld [vmem:[#allocation5 + $0x70] sm:$0xff] }
 0x236   :  { %v964_v19 = vmax.f32 %v932_v36, %v948_v21  ;;  %v8329_v21 = vld [vmem:[#allocation5 + $0x50] sm:$0xff] }
 0x237   :  { %v530_v51 = vmul.f32 0.2, %v514_v29 }
 0x238   :  { %996 = vmax.xlane.f32.xlu1 %v8287_v13 }
 0x239   :  { %v546_v14 = vmax.f32 %v514_v29, %v530_v51  ;;  %v965_v29 = vmax.f32 %v933_v22, %v949_v39  ;;  %v951_v51 = vmul.f32 0.2, %v935_v12  ;;  %v8320_v22 = vadd.f32 %v964_v19, %v8316_v3 }
 0x23b   :  { %v8299_v40 = vadd.f32 %v546_v14, %v87_v45  ;;  %v8312_v55 = vadd.f32 %v965_v29, %v8235_v61  ;;  %v934_v14 = vadd.f32 %v8216_v11, %v8198_v59  ;;  %v967_v4 = vmax.f32 %v935_v12, %v951_v51 }
 0x23c   :  { %1002 = vmax.xlane.f32.xlu1 %v8295_v38  ;;  %v515_v29 = vmul.f32 0.2, %v499_v43  ;;  %v500_v59 = vadd.f32 %v8213_v10, %v8176_v28  ;;  %v502_v28 = vadd.f32 %v8213_v10, %v8194_v56  ;;  %v939_v56 = vadd.f32 %v8216_v11, %v8186_v49 }
 0x23d   :  { %593 = vmax.xlane.f32.xlu0 %v8299_v40  ;;  %v950_v39 = vmul.f32 0.2, %v934_v14  ;;  %v8325_v61 = vadd.f32 %v967_v4, %v83_v24  ;;  %v517_v4 = vmul.f32 0.2, %v501_v32  ;;  %v503_v49 = vadd.f32 %v8213_v10, %v8196_v58 }
 0x23e   :  { %v531_v12 = vmax.f32 %v499_v43, %v515_v29  ;;  %v516_v51 = vmul.f32 0.2, %v500_v59 }
 0x23f   :  { %v966_v36 = vmax.f32 %v934_v14, %v950_v39  ;;  %v533_v43 = vmax.f32 %v501_v32, %v517_v4  ;;  %v84_v32 = vld [vmem:[#allocation5 + $0x60] sm:$0xff]  ;;  %v954_v4 = vmul.f32 0.2, %v938_v63 }
 0x240   :  { %1000 = vmax.xlane.f32.xlu1 %v8306_v41  ;;  %v8339_v24 = vadd.f32 %v531_v12, %v8233_v60  ;;  %v532_v14 = vmax.f32 %v500_v59, %v516_v51  ;;  %v952_v59 = vmul.f32 0.2, %v936_v52  ;;  %v955_v51 = vmul.f32 0.2, %v939_v56 }
 0x241   :  { %v8333_v19 = vadd.f32 %v966_v36, %v8329_v21  ;;  %v518_v36 = vmul.f32 0.2, %v502_v28  ;;  %v8351_v60 = vadd.f32 %v533_v43, %v8259_v20  ;;  %v519_v43 = vmul.f32 0.2, %v503_v49 }
 0x242   :  { %v8345_v39 = vadd.f32 %v532_v14, %v8223_v25  ;;  %v968_v12 = vmax.f32 %v936_v52, %v952_v59  ;;  %v971_v14 = vmax.f32 %v939_v56, %v955_v51  ;;  %v505_v59 = vadd.f32 %v8213_v10, %v8204_v1 }
 0x243   :  { %v534_v29 = vmax.f32 %v502_v28, %v518_v36  ;;  %v504_v36 = vadd.f32 %v8213_v10, %v8200_v62  ;;  %v535_v52 = vmax.f32 %v503_v49, %v519_v43  ;;  %v506_v62 = vadd.f32 %v8213_v10, %v8206_v2 }
 0x244   :  { %1006 = vmax.xlane.f32.xlu1 %v8312_v55  ;;  %v8362_v20 = vadd.f32 %v968_v12, %v84_v32  ;;  %v8367_v28 = vadd.f32 %v971_v14, %v87_v45  ;;  %v521_v56 = vmul.f32 0.2, %v505_v59  ;;  %v507_v1 = vadd.f32 %v8213_v10, %v8210_v7 }
 0x245   :  { %v8357_v25 = vadd.f32 %v534_v29, %v8247_v9  ;;  %v970_v9 = vmax.f32 %v938_v63, %v954_v4  ;;  %v520_v29 = vmul.f32 0.2, %v504_v36  ;;  %v8378_v58 = vadd.f32 %v535_v52, %v8281_v18 }
 0x246   :  { %v537_v51 = vmax.f32 %v505_v59, %v521_v56  ;;  %v522_v63 = vmul.f32 0.2, %v506_v62  ;;  %v509_v18 = vadd.f32 %v8213_v10, %v8225_v34  ;;  %v523_v2 = vmul.f32 0.2, %v507_v1 }
 0x247   :  { %v8372_v11 = vadd.f32 %v970_v9, %v86_v6  ;;  %v536_v45 = vmax.f32 %v504_v36, %v520_v29  ;;  %v513_v34 = vadd.f32 %v8213_v10, %v8271_v54 }
 0x248   :  { %1004 = vmax.xlane.f32.xlu1 %v8320_v22  ;;  %v8392_v14 = vadd.f32 %v537_v51, %v8301_v42  ;;  %v538_v4 = vmax.f32 %v506_v62, %v522_v63  ;;  %v525_v49 = vmul.f32 0.2, %v509_v18  ;;  %v539_v7 = vmax.f32 %v507_v1, %v523_v2 }
 0x249   :  { %v8384_v12 = vadd.f32 %v536_v45, %v8269_v53  ;;  %v511_v53 = vadd.f32 %v8213_v10, %v8249_v15  ;;  %v529_v52 = vmul.f32 0.2, %v513_v34 }
 0x24a   :  { %v8398_v9 = vadd.f32 %v538_v4, %v8291_v23  ;;  %v8404_v42 = vadd.f32 %v539_v7, %v8316_v3  ;;  %v541_v36 = vmax.f32 %v509_v18, %v525_v49 }
 0x24b   :  { %v527_v43 = vmul.f32 0.2, %v511_v53  ;;  %v545_v23 = vmax.f32 %v513_v34, %v529_v52 }
 0x24c   :  { %1010 = vmax.xlane.f32.xlu1 %v8325_v61  ;;  %v8408_v29 = vadd.f32 %v541_v36, %v8329_v21 }
 0x24d   :  { %v543_v15 = vmax.f32 %v511_v53, %v527_v43  ;;  %v8414_v45 = vadd.f32 %v545_v23, %v86_v6 }
 0x24f   :  { %v8411_v59 = vadd.f32 %v543_v15, %v84_v32 }
 0x250   :  { %1008 = vmax.xlane.f32.xlu1 %v8333_v19 }
 0x254   :  { %563 = vmax.xlane.f32.xlu1 %v8339_v24 }
 0x258   :  { %565 = vmax.xlane.f32.xlu1 %v8345_v39 }
 0x25c   :  { %567 = vmax.xlane.f32.xlu1 %v8351_v60 }
 0x260   :  { %569 = vmax.xlane.f32.xlu1 %v8357_v25 }
 0x264   :  { %1012 = vmax.xlane.f32.xlu1 %v8362_v20 }
 0x268   :  { %1018 = vmax.xlane.f32.xlu1 %v8367_v28 }
 0x26c   :  { %1016 = vmax.xlane.f32.xlu1 %v8372_v11 }
 0x270   :  { %571 = vmax.xlane.f32.xlu1 %v8378_v58 }
 0x274   :  { %573 = vmax.xlane.f32.xlu1 %v8384_v12 }
 0x278   :  { %575 = vmax.xlane.f32.xlu1 %v8392_v14 }
 0x27c   :  { %577 = vmax.xlane.f32.xlu1 %v8398_v9 }
 0x280   :  { %579 = vmax.xlane.f32.xlu1 %v8404_v42 }
 0x284   :  { %583 = vmax.xlane.f32.xlu1 %v8408_v29 }
 0x288   :  { %587 = vmax.xlane.f32.xlu1 %v8411_v59 }
 0x28c   :  { %591 = vmax.xlane.f32.xlu1 %v8414_v45 }
 0x2b1   :  { %v991_v3 = vpop.xlane.xlu1 %990 }
 0x2b2   :  { %v1021_v10 = vsub.f32 %v8231_v47, %v991_v3 }
 0x2b4   :  { %v1038_v54 = vmul.f32 1.442695, %v1021_v10 }
 0x2b5   :  { %v989_v56 = vpop.xlane.xlu1 %988 }
 0x2b6   :  { %v1020_v21 = vsub.f32 %v8242_v30, %v989_v56  ;;  %7259 = vpow2.f32 %v1038_v54 }
 0x2b8   :  { %v1036_v62 = vmul.f32 1.442695, %v1020_v21  ;;  %v1015_v21 = vpop.xlane.xlu0 %1014 }
 0x2b9   :  { %v995_v51 = vpop.xlane.xlu1 %994 }
 0x2ba   :  { %7261 = vpow2.f32 %v1036_v62  ;;  %v1023_v32 = vsub.f32 %v8254_v33, %v995_v51 }
 0x2bc   :  { %v1042_v63 = vmul.f32 1.442695, %v1023_v32  ;;  %v1033_v32 = vsub.f32 %v8228_v46, %v1015_v21 }
 0x2bd   :  { %v993_v1 = vpop.xlane.xlu1 %992 }
 0x2be   :  { %7263 = vpow2.f32 %v1042_v63  ;;  %v1022_v6 = vsub.f32 %v8265_v35, %v993_v1 }
 0x2c0   :  { %v1040_v18 = vmul.f32 1.442695, %v1022_v6  ;;  %v8421_v4 = vpop.eup %7259 }
 0x2c1   :  { %v999_v2 = vpop.xlane.xlu1 %998  ;;  %1070 = vadd.xlane.f32.xlu0 %v8421_v4 }
 0x2c2   :  { %7265 = vpow2.f32 %v1040_v18  ;;  %v1025_v47 = vsub.f32 %v8275_v5, %v999_v2  ;;  %v1062_v18 = vmul.f32 1.442695, %v1033_v32 }
 0x2c4   :  { %v8425_v30 = vpop.eup %7261  ;;  %v1046_v49 = vmul.f32 1.442695, %v1025_v47 }
 0x2c5   :  { %v997_v53 = vpop.xlane.xlu1 %996  ;;  %1068 = vadd.xlane.f32.xlu1 %v8425_v30 }
 0x2c6   :  { %7267 = vpow2.f32 %v1046_v49  ;;  %v1024_v33 = vsub.f32 %v8287_v13, %v997_v53 }
 0x2c8   :  { %v8429_v7 = vpop.eup %7263  ;;  %v1044_v35 = vmul.f32 1.442695, %v1024_v33 }
 0x2c9   :  { %v1003_v43 = vpop.xlane.xlu1 %1002  ;;  %1074 = vadd.xlane.f32.xlu0 %v8429_v7 }
 0x2ca   :  { %7269 = vpow2.f32 %v1044_v35  ;;  %v1027_v5 = vsub.f32 %v8295_v38, %v1003_v43 }
 0x2cc   :  { %v8433_v34 = vpop.eup %7265  ;;  %v1050_v36 = vmul.f32 1.442695, %v1027_v5 }
 0x2cd   :  { %v1001_v52 = vpop.xlane.xlu1 %1000  ;;  %1072 = vadd.xlane.f32.xlu1 %v8433_v34 }
 0x2ce   :  { %7271 = vpow2.f32 %v1050_v36  ;;  %v1026_v15 = vsub.f32 %v8306_v41, %v1001_v52 }
 0x2d0   :  { %v8437_v23 = vpop.eup %7267  ;;  %v1048_v13 = vmul.f32 1.442695, %v1026_v15 }
 0x2d1   :  { %v1007_v3 = vpop.xlane.xlu1 %1006  ;;  %1078 = vadd.xlane.f32.xlu0 %v8437_v23 }
 0x2d2   :  { %7273 = vpow2.f32 %v1048_v13  ;;  %v1029_v10 = vsub.f32 %v8312_v55, %v1007_v3 }
 0x2d4   :  { %v8441_v54 = vpop.eup %7269  ;;  %v1054_v38 = vmul.f32 1.442695, %v1029_v10 }
 0x2d5   :  { %v1005_v56 = vpop.xlane.xlu1 %1004  ;;  %1076 = vadd.xlane.f32.xlu1 %v8441_v54 }
 0x2d6   :  { %7275 = vpow2.f32 %v1054_v38  ;;  %v1028_v62 = vsub.f32 %v8320_v22, %v1005_v56 }
 0x2d8   :  { %v8445_v41 = vpop.eup %7271  ;;  %v1052_v51 = vmul.f32 1.442695, %v1028_v62 }
 0x2d9   :  { %v1011_v63 = vpop.xlane.xlu1 %1010  ;;  %1082 = vadd.xlane.f32.xlu0 %v8445_v41 }
 0x2da   :  { %7277 = vpow2.f32 %v1052_v51  ;;  %v1031_v55 = vsub.f32 %v8325_v61, %v1011_v63 }
 0x2dc   :  { %v8450_v1 = vpop.eup %7273  ;;  %v1058_v6 = vmul.f32 1.442695, %v1031_v55 }
 0x2dd   :  { %v1009_v2 = vpop.xlane.xlu1 %1008  ;;  %1080 = vadd.xlane.f32.xlu1 %v8450_v1 }
 0x2de   :  { %7279 = vpow2.f32 %v1058_v6  ;;  %v1030_v22 = vsub.f32 %v8333_v19, %v1009_v2 }
 0x2df   :  { %7281 = vpow2.f32 %v1062_v18 }
 0x2e0   :  { %v8454_v47 = vpop.eup %7275  ;;  %v1056_v49 = vmul.f32 1.442695, %v1030_v22  ;;  %v582_v22 = vpop.xlane.xlu0 %581 }
 0x2e1   :  { %1086 = vadd.xlane.f32.xlu0 %v8454_v47  ;;  %v564_v46 = vpop.xlane.xlu1 %563 }
 0x2e2   :  { %7283 = vpow2.f32 %v1056_v49  ;;  %v595_v56 = vsub.f32 %v8339_v24, %v564_v46 }
 0x2e4   :  { %v8457_v53 = vpop.eup %7277  ;;  %v611_v55 = vmul.f32 1.442695, %v595_v56 }
 0x2e5   :  { %1084 = vadd.xlane.f32.xlu1 %v8457_v53  ;;  %v566_v61 = vpop.xlane.xlu1 %565 }
 0x2e6   :  { %v596_v13 = vsub.f32 %v8345_v39, %v566_v61 }
 0x2e8   :  { %v8460_v33 = vpop.eup %7279  ;;  %v613_v21 = vmul.f32 1.442695, %v596_v13 }
 0x2e9   :  { %1090 = vadd.xlane.f32.xlu0 %v8460_v33  ;;  %v568_v35 = vpop.xlane.xlu1 %567  ;;  %v8463_v43 = vpop.eup %7281 }
 0x2ec   :  { %v8465_v19 = vpop.eup %7283 }
 0x2ed   :  { %1094 = vadd.xlane.f32.xlu0 %v8463_v43  ;;  %1088 = vadd.xlane.f32.xlu1 %v8465_v19  ;;  %v570_v5 = vpop.xlane.xlu1 %569 }
 0x2ee   :  { %v598_v51 = vsub.f32 %v8357_v25, %v570_v5 }
 0x2f0   :  { %v617_v6 = vmul.f32 1.442695, %v598_v51 }
 0x2f1   :  { %v1013_v36 = vpop.xlane.xlu1 %1012 }
 0x2f2   :  { %v1032_v52 = vsub.f32 %v8362_v20, %v1013_v36  ;;  %v597_v20 = vsub.f32 %v8351_v60, %v568_v35 }
 0x2f4   :  { %v1060_v15 = vmul.f32 1.442695, %v1032_v52  ;;  %v586_v52 = vpop.xlane.xlu0 %585 }
 0x2f5   :  { %v1019_v3 = vpop.xlane.xlu1 %1018 }
 0x2f6   :  { %7285 = vpow2.f32 %v1060_v15  ;;  %v1035_v10 = vsub.f32 %v8367_v28, %v1019_v3  ;;  %v615_v28 = vmul.f32 1.442695, %v597_v20 }
 0x2f8   :  { %v1066_v38 = vmul.f32 1.442695, %v1035_v10  ;;  %v590_v56 = vpop.xlane.xlu0 %589 }
 0x2f9   :  { %v1017_v62 = vpop.xlane.xlu1 %1016 }
 0x2fa   :  { %7287 = vpow2.f32 %v1066_v38  ;;  %v1034_v32 = vsub.f32 %v8372_v11, %v1017_v62  ;;  %v606_v38 = vsub.f32 %v8257_v16, %v586_v52 }
 0x2fb   :  { %7289 = vpow2.f32 %v613_v21 }
 0x2fc   :  { %v1064_v63 = vmul.f32 1.442695, %v1034_v32  ;;  %v633_v32 = vmul.f32 1.442695, %v606_v38 }
 0x2fd   :  { %v572_v39 = vpop.xlane.xlu1 %571 }
 0x2fe   :  { %7291 = vpow2.f32 %v1064_v63  ;;  %v599_v25 = vsub.f32 %v8378_v58, %v572_v39  ;;  %v604_v58 = vsub.f32 %v8245_v31, %v582_v22  ;;  %v608_v63 = vsub.f32 %v8279_v48, %v590_v56 }
 0x2ff   :  { %7293 = vpow2.f32 %v611_v55  ;;  %v594_v55 = vpop.xlane.xlu0 %593 }
 0x300   :  { %v8476_v18 = vpop.eup %7285  ;;  %7295 = vpow2.f32 %v617_v6  ;;  %v619_v46 = vmul.f32 1.442695, %v599_v25  ;;  %v629_v10 = vmul.f32 1.442695, %v604_v58  ;;  %v637_v6 = vmul.f32 1.442695, %v608_v63 }
 0x301   :  { %1092 = vadd.xlane.f32.xlu1 %v8476_v18  ;;  %v574_v24 = vpop.xlane.xlu1 %573  ;;  %7297 = vpow2.f32 %v615_v28  ;;  %v610_v28 = vsub.f32 %v8299_v40, %v594_v55  ;;  %v1715_v63 = vld [vmem:[#allocation7 + $0x1d0] sm:$0xff] }
 0x302   :  { %v600_v11 = vsub.f32 %v8384_v12, %v574_v24 }
 0x304   :  { %v8481_v2 = vpop.eup %7287  ;;  %v621_v49 = vmul.f32 1.442695, %v600_v11 }
 0x305   :  { %1098 = vadd.xlane.f32.xlu0 %v8481_v2  ;;  %v576_v60 = vpop.xlane.xlu1 %575  ;;  %v8485_v35 = vpop.eup %7289 }
 0x306   :  { %7299 = vpow2.f32 %v621_v49  ;;  %v601_v61 = vsub.f32 %v8392_v14, %v576_v60 }
 0x307   :  { %7301 = vpow2.f32 %v619_v46 }
 0x308   :  { %v8487_v5 = vpop.eup %7291  ;;  %v623_v36 = vmul.f32 1.442695, %v601_v61 }
 0x309   :  { %645 = vadd.xlane.f32.xlu0 %v8485_v35  ;;  %1096 = vadd.xlane.f32.xlu1 %v8487_v5  ;;  %v578_v12 = vpop.xlane.xlu1 %577  ;;  %v8493_v13 = vpop.eup %7293 }
 0x30a   :  { %v602_v15 = vsub.f32 %v8398_v9, %v578_v12  ;;  %v8495_v3 = vpop.eup %7295  ;;  %7303 = vpow2.f32 %v623_v36 }
 0x30b   :  { %v8501_v62 = vpop.eup %7297 }
 0x30c   :  { %v625_v14 = vmul.f32 1.442695, %v602_v15  ;;  %v1709_v15 = vld [vmem:[#allocation7 + $0x1a0] sm:$0xff] }
 0x30d   :  { %649 = vadd.xlane.f32.xlu0 %v8495_v3  ;;  %643 = vadd.xlane.f32.xlu1 %v8493_v13  ;;  %v580_v31 = vpop.xlane.xlu1 %579 }
 0x30e   :  { %7305 = vpow2.f32 %v625_v14  ;;  %v603_v21 = vsub.f32 %v8404_v42, %v580_v31  ;;  %v1710_v14 = vld [vmem:[#allocation7 + $0x1a8] sm:$0xff]  ;;  %v1712_v31 = vld [vmem:[#allocation7 + $0x1b8] sm:$0xff] }
 0x30f   :  { %7307 = vpow2.f32 %v629_v10  ;;  %v1711_v10 = vld [vmem:[#allocation7 + $0x1b0] sm:$0xff]  ;;  %v6821_v38 = vpack.c.bf16 %v1710_v14, %v1709_v15 }
 0x310   :  { %v8503_v9 = vpop.eup %7299  ;;  %v627_v51 = vmul.f32 1.442695, %v603_v21  ;;  %v6825_v56 = vpack.c.bf16 %v1712_v31, %v1711_v10  ;;  %v1713_v21 = vld [vmem:[#allocation7 + $0x1c0] sm:$0xff]  ;;  %v1724_v31 = vld [vmem:[#allocation7 + $0x218] sm:$0xff] }
 0x311   :  { %647 = vadd.xlane.f32.xlu1 %v8501_v62  ;;  %653 = vadd.xlane.f32.xlu0 %v8503_v9  ;;  %v584_v16 = vpop.xlane.xlu1 %583  ;;  %v8509_v39 = vpop.eup %7301 }
 0x312   :  { %7309 = vpow2.f32 %v627_v51  ;;  %v605_v20 = vsub.f32 %v8408_v29, %v584_v16  ;;  %v641_v29 = vmul.f32 1.442695, %v610_v28  ;;  %v1714_v51 = vld [vmem:[#allocation7 + $0x1c8] sm:$0xff]  ;;  %6822 = vmatprep.subr.bf16.mxu0 %v6821_v38  ;;  %v1716_v16 = vld [vmem:[#allocation7 + $0x1d8] sm:$0xff] }
 0x313   :  { %7311 = vpow2.f32 %v633_v32  ;;  %6824 = vmatpush3.bf16.msra.mxu0 %v6821_v38  ;;  %v6829_v32 = vpack.c.bf16 %v1714_v51, %v1713_v21  ;;  %v1723_v38 = vld [vmem:[#allocation7 + $0x210] sm:$0xff] }
 0x314   :  { %v631_v42 = vmul.f32 1.442695, %v605_v20  ;;  %v8514_v25 = vpop.eup %7303  ;;  %6826 = vmatprep.subr.bf16.mxu0 %v6825_v56  ;;  %v6833_v20 = vpack.c.bf16 %v1716_v16, %v1715_v63  ;;  %v6849_v63 = vpack.c.bf16 %v1724_v31, %v1723_v38  ;;  %v7780_v31 = vld [vmem:[#allocation2 + $0x50] sm:$0xff] }
 0x315   :  { %651 = vadd.xlane.f32.xlu1 %v8509_v39  ;;  %v588_v24 = vpop.xlane.xlu1 %587 }
 0x316   :  { %7313 = vpow2.f32 %v631_v42  ;;  %v607_v48 = vsub.f32 %v8411_v59, %v588_v24  ;;  %v1717_v42 = vld [vmem:[#allocation7 + $0x1e0] sm:$0xff] }
 0x317   :  { %7315 = vpow2.f32 %v637_v6  ;;  %6828 = vmatpush3.bf16.msra.mxu0 %v6825_v56  ;;  %v1718_v6 = vld [vmem:[#allocation7 + $0x1e8] sm:$0xff] }
 0x318   :  { %v8516_v11 = vpop.eup %7305  ;;  %v635_v22 = vmul.f32 1.442695, %v607_v48  ;;  %6830 = vmatprep.subr.bf16.mxu0 %v6829_v32  ;;  %v6837_v24 = vpack.c.bf16 %v1718_v6, %v1717_v42  ;;  %v1719_v48 = vld [vmem:[#allocation7 + $0x1f0] sm:$0xff] }
 0x319   :  { %655 = vadd.xlane.f32.xlu1 %v8514_v25  ;;  %657 = vadd.xlane.f32.xlu0 %v8516_v11  ;;  %v592_v49 = vpop.xlane.xlu1 %591  ;;  %v8521_v60 = vpop.eup %7307 }
 0x31a   :  { %7317 = vpow2.f32 %v635_v22  ;;  %v609_v40 = vsub.f32 %v8414_v45, %v592_v49  ;;  %v1720_v22 = vld [vmem:[#allocation7 + $0x1f8] sm:$0xff] }
 0x31b   :  { %7319 = vpow2.f32 %v641_v29  ;;  %6832 = vmatpush3.bf16.msra.mxu0 %v6829_v32  ;;  %v6841_v49 = vpack.c.bf16 %v1720_v22, %v1719_v48  ;;  %v7774_v48 = vld [vmem:[#allocation2 + $0x20] sm:$0xff] }
 0x31c   :  { %v8523_v46 = vpop.eup %7309  ;;  %v639_v59 = vmul.f32 1.442695, %v609_v40  ;;  %6834 = vmatprep.subr.bf16.mxu0 %v6833_v20  ;;  %v1721_v40 = vld [vmem:[#allocation7 + $0x200] sm:$0xff] }
 0x31d   :  { %661 = vadd.xlane.f32.xlu0 %v8521_v60  ;;  %659 = vadd.xlane.f32.xlu1 %v8523_v46  ;;  %v8527_v61 = vpop.eup %7311 }
 0x31e   :  { %7321 = vpow2.f32 %v639_v59  ;;  %v1722_v59 = vld [vmem:[#allocation7 + $0x208] sm:$0xff] }
 0x31f   :  { %6836 = vmatpush3.bf16.msra.mxu0 %v6833_v20  ;;  %v6845_v14 = vpack.c.bf16 %v1722_v59, %v1721_v40  ;;  %v7776_v40 = vld [vmem:[#allocation2 + $0x30] sm:$0xff]  ;;  %v7777_v59 = vld [vmem:[#allocation2 + $0x38] sm:$0xff] }
 0x320   :  { %v8529_v58 = vpop.eup %7313  ;;  %6838 = vmatprep.subr.bf16.mxu0 %v6837_v24 }
 0x321   :  { %665 = vadd.xlane.f32.xlu0 %v8527_v61  ;;  %663 = vadd.xlane.f32.xlu1 %v8529_v58  ;;  %v8533_v45 = vpop.eup %7315 }
 0x323   :  { %6840 = vmatpush3.bf16.msra.mxu0 %v6837_v24  ;;  %v7773_v24 = vld [vmem:[#allocation2 + $0x18] sm:$0xff] }
 0x324   :  { %v8535_v36 = vpop.eup %7317  ;;  %6842 = vmatprep.subr.bf16.mxu0 %v6841_v49 }
 0x325   :  { %669 = vadd.xlane.f32.xlu0 %v8533_v45  ;;  %667 = vadd.xlane.f32.xlu1 %v8535_v36  ;;  %v8539_v12 = vpop.eup %7319 }
 0x327   :  { %6844 = vmatpush3.bf16.msra.mxu0 %v6841_v49 }
 0x328   :  { %v8541_v52 = vpop.eup %7321  ;;  %6846 = vmatprep.subr.bf16.mxu0 %v6845_v14 }
 0x329   :  { %673 = vadd.xlane.f32.xlu0 %v8539_v12  ;;  %671 = vadd.xlane.f32.xlu1 %v8541_v52 }
 0x32b   :  { %6848 = vmatpush3.bf16.msra.mxu0 %v6845_v14 }
 0x32c   :  { %6850 = vmatprep.subr.bf16.mxu0 %v6849_v63 }
 0x32f   :  { %6852 = vmatpush3.bf16.msra.mxu0 %v6849_v63 }
 0x34e   :  { %v1071_v55 = vpop.xlane.xlu0 %1070 }
 0x34f   :  { %7323 = vrcp.f32 %v1071_v55 }
 0x352   :  { %v1069_v28 = vpop.xlane.xlu1 %1068 }
 0x353   :  { %7325 = vrcp.f32 %v1069_v28  ;;  %v7772_v28 = vld [vmem:[#allocation2 + $0x10] sm:$0xff] }
 0x356   :  { %v1075_v29 = vpop.xlane.xlu0 %1074 }
 0x357   :  { %7327 = vrcp.f32 %v1075_v29  ;;  %v7775_v29 = vld [vmem:[#allocation2 + $0x28] sm:$0xff] }
 0x359   :  { %v7324_v10 = vpop.eup %7323 }
 0x35a   :  { %v1073_v15 = vpop.xlane.xlu1 %1072  ;;  %v1103_v32 = vmul.f32 %v7324_v10, %v8421_v4  ;;  %v7779_v10 = vld [vmem:[#allocation2 + $0x48] sm:$0xff] }
 0x35b   :  { %7329 = vrcp.f32 %v1073_v15  ;;  %v7778_v15 = vld [vmem:[#allocation2 + $0x40] sm:$0xff] }
 0x35d   :  { %v7326_v56 = vpop.eup %7325 }
 0x35e   :  { %v1101_v21 = vmul.f32 %v7326_v56, %v8425_v30  ;;  %v1079_v51 = vpop.xlane.xlu0 %1078  ;;  %v7781_v56 = vld [vmem:[#allocation2 + $0x58] sm:$0xff] }
 0x35f   :  { %7331 = vrcp.f32 %v1079_v51 }
 0x360   :  { %5909 = vmatprep.mubr.f32.mxu1 %v1101_v21  ;;  %v7782_v21 = vld [vmem:[#allocation2 + $0x60] sm:$0xff] }
 0x361   :  { %5910 = vmatmul.mubr.f32.vlgmr.msra.gmra.mrb[16].mxu1 %v1103_v32  ;;  %v7328_v55 = vpop.eup %7327  ;;  %v7784_v32 = vld [vmem:[#allocation2 + $0x70] sm:$0xff] }
 0x362   :  { %6792 = vmatpush3.bf16.msra.mxu1 %v8042_v37  ;;  %v1077_v16 = vpop.xlane.xlu1 %1076  ;;  %v1107_v42 = vmul.f32 %v7328_v55, %v8429_v7  ;;  %v7771_v37 = vld [vmem:[#allocation2 + $0x8] sm:$0xff] }
 0x363   :  { %6794 = vmatprep.subr.bf16.mxu1 %v8055_v44  ;;  %7333 = vrcp.f32 %v1077_v16  ;;  %6022 = vmatmul.mubr.f32.vlgmr.msra.gmra.mrb[32].mxu0 %v7771_v37  ;;  %v7785_v16 = vld [vmem:[#allocation2 + $0x78] sm:$0xff] }
 0x364   :  { %6024 = vmatprep.mubr.f32.mxu0 %v7772_v28 }
 0x365   :  { %v7330_v20 = vpop.eup %7329 }
 0x366   :  { %6796 = vmatpush3.bf16.msra.mxu1 %v8055_v44  ;;  %v1105_v30 = vmul.f32 %v7330_v20, %v8433_v34  ;;  %v1083_v4 = vpop.xlane.xlu0 %1082 }
 0x367   :  { %6798 = vmatprep.subr.bf16.mxu1 %v8064_v50  ;;  %7335 = vrcp.f32 %v1083_v4  ;;  %6025 = vmatmul.mubr.f32.gmra.mrb[34].mxu0 %v7773_v24 }
 0x368   :  { %5912 = vmatprep.mubr.f32.mxu1 %v1105_v30  ;;  %6027 = vmatprep.mubr.f32.mxu0 %v7774_v48 }
 0x369   :  { %5913 = vmatmul.mubr.f32.gmra.mrb[18].mxu1 %v1107_v42  ;;  %v7332_v44 = vpop.eup %7331 }
 0x36a   :  { %6800 = vmatpush3.bf16.msra.mxu1 %v8064_v50  ;;  %v1081_v6 = vpop.xlane.xlu1 %1080  ;;  %v1111_v50 = vmul.f32 %v7332_v44, %v8437_v23 }
 0x36b   :  { %6802 = vmatprep.subr.bf16.mxu1 %v8076_v57  ;;  %7337 = vrcp.f32 %v1081_v6  ;;  %6028 = vmatmul.mubr.f32.gmra.mrb[36].mxu0 %v7775_v29 }
 0x36c   :  { %6030 = vmatprep.mubr.f32.mxu0 %v7776_v40 }
 0x36d   :  { %v7334_v34 = vpop.eup %7333 }
 0x36e   :  { %6804 = vmatpush3.bf16.msra.mxu1 %v8076_v57  ;;  %v1109_v7 = vmul.f32 %v7334_v34, %v8441_v54  ;;  %v1087_v22 = vpop.xlane.xlu0 %1086 }
 0x36f   :  { %6806 = vmatprep.subr.bf16.mxu1 %v8088_v0  ;;  %7339 = vrcp.f32 %v1087_v22  ;;  %6031 = vmatmul.mubr.f32.gmra.mrb[38].mxu0 %v7777_v59 }
 0x370   :  { %5915 = vmatprep.mubr.f32.mxu1 %v1109_v7  ;;  %6033 = vmatprep.mubr.f32.mxu0 %v7778_v15 }
 0x371   :  { %5916 = vmatmul.mubr.f32.gmra.mrb[20].mxu1 %v1111_v50  ;;  %v7336_v57 = vpop.eup %7335 }
 0x372   :  { %6808 = vmatpush3.bf16.msra.mxu1 %v8088_v0  ;;  %v1085_v49 = vpop.xlane.xlu1 %1084  ;;  %v1115_v0 = vmul.f32 %v7336_v57, %v8445_v41 }
 0x373   :  { %6810 = vmatprep.subr.bf16.mxu1 %v8102_v8  ;;  %7341 = vrcp.f32 %v1085_v49  ;;  %6034 = vmatmul.mubr.f32.gmra.mrb[40].mxu0 %v7779_v10 }
 0x374   :  { %6036 = vmatprep.mubr.f32.mxu0 %v7780_v31 }
 0x375   :  { %v7338_v54 = vpop.eup %7337 }
 0x376   :  { %6812 = vmatpush3.bf16.msra.mxu1 %v8102_v8  ;;  %v1113_v23 = vmul.f32 %v7338_v54, %v8450_v1  ;;  %v1091_v14 = vpop.xlane.xlu0 %1090 }
 0x377   :  { %6814 = vmatprep.subr.bf16.mxu1 %v8115_v17  ;;  %7343 = vrcp.f32 %v1091_v14  ;;  %6037 = vmatmul.mubr.f32.gmra.mrb[42].mxu0 %v7781_v56 }
 0x378   :  { %5918 = vmatprep.mubr.f32.mxu1 %v1113_v23  ;;  %6039 = vmatprep.mubr.f32.mxu0 %v7782_v21 }
 0x379   :  { %5919 = vmatmul.mubr.f32.gmra.mrb[22].mxu1 %v1115_v0  ;;  %v7340_v8 = vpop.eup %7339 }
 0x37a   :  { %6816 = vmatpush3.bf16.msra.mxu1 %v8115_v17  ;;  %v1089_v38 = vpop.xlane.xlu1 %1088  ;;  %v1119_v51 = vmul.f32 %v7340_v8, %v8454_v47  ;;  %v7783_v17 = vld [vmem:[#allocation2 + $0x68] sm:$0xff] }
 0x37b   :  { %6818 = vmatprep.subr.bf16.mxu1 %v8124_v26  ;;  %7345 = vrcp.f32 %v1089_v38  ;;  %6040 = vmatmul.mubr.f32.gmra.mrb[44].mxu0 %v7783_v17 }
 0x37c   :  { %6042 = vmatprep.mubr.f32.mxu0 %v7784_v32 }
 0x37d   :  { %v7342_v1 = vpop.eup %7341 }
 0x37e   :  { %6820 = vmatpush3.bf16.msra.mxu1 %v8124_v26  ;;  %v1117_v41 = vmul.f32 %v7342_v1, %v8457_v53  ;;  %v1095_v53 = vpop.xlane.xlu0 %1094 }
 0x37f   :  { %6043 = vmatmul.mubr.f32.gmra.mrb[46].mxu0 %v7785_v16  ;;  %7347 = vrcp.f32 %v1095_v53 }
 0x380   :  { %5921 = vmatprep.mubr.f32.mxu1 %v1117_v41 }
 0x381   :  { %5922 = vmatmul.mubr.f32.gmra.mrb[24].mxu1 %v1119_v51  ;;  %v7344_v63 = vpop.eup %7343 }
 0x382   :  { %v1123_v26 = vmul.f32 %v7344_v63, %v8460_v33 }
 0x385   :  { %v7346_v55 = vpop.eup %7345 }
 0x386   :  { %v1121_v20 = vmul.f32 %v7346_v55, %v8465_v19 }
 0x388   :  { %5924 = vmatprep.mubr.f32.mxu1 %v1121_v20 }
 0x389   :  { %5925 = vmatmul.mubr.f32.gmra.mrb[26].mxu1 %v1123_v26  ;;  %v7348_v37 = vpop.eup %7347 }
 0x38a   :  { %v1127_v33 = vmul.f32 %v7348_v37, %v8463_v43  ;;  %v2086_v37 = vld [vmem:[#allocation7 + $0x230] sm:$0xff] }
 0x38e   :  { %v1093_v30 = vpop.xlane.xlu1 %1092 }
 0x38f   :  { %7349 = vrcp.f32 %v1093_v30 }
 0x392   :  { %v1099_v47 = vpop.xlane.xlu0 %1098 }
 0x393   :  { %7351 = vrcp.f32 %v1099_v47 }
 0x396   :  { %v646_v4 = vpop.xlane.xlu0 %645  ;;  %v1097_v42 = vpop.xlane.xlu1 %1096 }
 0x397   :  { %7353 = vrcp.f32 %v1097_v42 }
 0x398   :  { %7355 = vrcp.f32 %v646_v4  ;;  %v2085_v4 = vld [vmem:[#allocation7 + $0x228] sm:$0xff] }
 0x399   :  { %v7350_v6 = vpop.eup %7349 }
 0x39a   :  { %v650_v28 = vpop.xlane.xlu0 %649  ;;  %v644_v44 = vpop.xlane.xlu1 %643  ;;  %v1125_v34 = vmul.f32 %v7350_v6, %v8476_v18  ;;  %v6885_v6 = vpack.c.bf16 %v2086_v37, %v2085_v4  ;;  %v2091_v4 = vld [vmem:[#allocation7 + $0x258] sm:$0xff] }
 0x39b   :  { %7357 = vrcp.f32 %v644_v44 }
 0x39c   :  { %5927 = vmatprep.mubr.f32.mxu1 %v1125_v34  ;;  %7359 = vrcp.f32 %v650_v28  ;;  %6886 = vmatprep.subr.bf16.mxu1 %v6885_v6 }
 0x39d   :  { %5928 = vmatmul.mubr.f32.gmra.mrb[28].mxu1 %v1127_v33  ;;  %v7352_v7 = vpop.eup %7351 }
 0x39e   :  { %v648_v19 = vpop.xlane.xlu1 %647  ;;  %v654_v24 = vpop.xlane.xlu0 %653  ;;  %v1131_v29 = vmul.f32 %v7352_v7, %v8481_v2 }
 0x39f   :  { %7361 = vrcp.f32 %v648_v19 }
 0x3a0   :  { %7363 = vrcp.f32 %v654_v24 }
 0x3a1   :  { %v7354_v48 = vpop.eup %7353 }
 0x3a2   :  { %v652_v22 = vpop.xlane.xlu1 %651  ;;  %v1129_v50 = vmul.f32 %v7354_v48, %v8487_v5  ;;  %v7356_v18 = vpop.eup %7355 }
 0x3a3   :  { %7365 = vrcp.f32 %v652_v22  ;;  %v678_v54 = vmul.f32 %v7356_v18, %v8485_v35 }
 0x3a4   :  { %5930 = vmatprep.mubr.f32.mxu1 %v1129_v50 }
 0x3a5   :  { %v7358_v49 = vpop.eup %7357  ;;  %5931 = vmatmul.mubr.f32.gmra.mrb[30].mxu1 %v1131_v29 }
 0x3a6   :  { %v658_v43 = vpop.xlane.xlu0 %657  ;;  %v656_v40 = vpop.xlane.xlu1 %655  ;;  %v676_v57 = vmul.f32 %v7358_v49, %v8493_v13 }
 0x3a7   :  { %7367 = vrcp.f32 %v658_v43  ;;  %v7360_v59 = vpop.eup %7359 }
 0x3a8   :  { %7369 = vrcp.f32 %v656_v40  ;;  %5965 = vmatprep.mubr.f32.mxu1 %v676_v57  ;;  %v682_v14 = vmul.f32 %v7360_v59, %v8495_v3 }
 0x3a9   :  { %v7362_v23 = vpop.eup %7361  ;;  %5966 = vmatmul.mubr.f32.vlgmr.msra.gmra.mrb[16].mxu1 %v678_v54 }
 0x3aa   :  { %v662_v15 = vpop.xlane.xlu0 %661  ;;  %v660_v5 = vpop.xlane.xlu1 %659  ;;  %v680_v2 = vmul.f32 %v7362_v23, %v8501_v62  ;;  %6888 = vmatpush3.bf16.msra.mxu1 %v6885_v6 }
 0x3ab   :  { %7371 = vrcp.f32 %v662_v15  ;;  %v7364_v0 = vpop.eup %7363 }
 0x3ac   :  { %7373 = vrcp.f32 %v660_v5  ;;  %5968 = vmatprep.mubr.f32.mxu1 %v680_v2  ;;  %v686_v31 = vmul.f32 %v7364_v0, %v8503_v9 }
 0x3ad   :  { %v7366_v10 = vpop.eup %7365  ;;  %5969 = vmatmul.mubr.f32.gmra.mrb[18].mxu1 %v682_v14 }
 0x3ae   :  { %v666_v13 = vpop.xlane.xlu0 %665  ;;  %v664_v38 = vpop.xlane.xlu1 %663  ;;  %v684_v35 = vmul.f32 %v7366_v10, %v8509_v39 }
 0x3af   :  { %7375 = vrcp.f32 %v666_v13 }
 0x3b0   :  { %7377 = vrcp.f32 %v664_v38  ;;  %5971 = vmatprep.mubr.f32.mxu1 %v684_v35  ;;  %v1893_v38 = vld [vmem:[#allocation7 + $0x338] sm:$0xff]  ;;  %v1894_v35 = vld [vmem:[#allocation7 + $0x340] sm:$0xff] }
 0x3b1   :  { %v7368_v8 = vpop.eup %7367  ;;  %5972 = vmatmul.mubr.f32.gmra.mrb[20].mxu1 %v686_v31  ;;  %v2087_v31 = vld [vmem:[#allocation7 + $0x238] sm:$0xff] }
 0x3b2   :  { %v7370_v1 = vpop.eup %7369  ;;  %v670_v62 = vpop.xlane.xlu0 %669  ;;  %v690_v41 = vmul.f32 %v7368_v8, %v8516_v11 }
 0x3b3   :  { %v668_v56 = vpop.xlane.xlu1 %667  ;;  %7379 = vrcp.f32 %v670_v62  ;;  %v688_v3 = vmul.f32 %v7370_v1, %v8514_v25  ;;  %v6857_v62 = vpack.c.bf16 %v1894_v35, %v1893_v38 }
 0x3b4   :  { %7381 = vrcp.f32 %v668_v56  ;;  %v2088_v56 = vld [vmem:[#allocation7 + $0x240] sm:$0xff] }
 0x3b5   :  { %v7372_v21 = vpop.eup %7371  ;;  %5974 = vmatprep.mubr.f32.mxu1 %v688_v3 }
 0x3b6   :  { %v7374_v51 = vpop.eup %7373  ;;  %5975 = vmatmul.mubr.f32.gmra.mrb[22].mxu1 %v690_v41  ;;  %v674_v39 = vpop.xlane.xlu0 %673  ;;  %v694_v32 = vmul.f32 %v7372_v21, %v8521_v60 }
 0x3b7   :  { %v672_v17 = vpop.xlane.xlu1 %671  ;;  %7383 = vrcp.f32 %v674_v39  ;;  %v692_v9 = vmul.f32 %v7374_v51, %v8523_v46  ;;  %v6889_v51 = vpack.c.bf16 %v2088_v56, %v2087_v31 }
 0x3b8   :  { %7385 = vrcp.f32 %v672_v17 }
 0x3b9   :  { %v7376_v63 = vpop.eup %7375  ;;  %5977 = vmatprep.mubr.f32.mxu1 %v692_v9  ;;  %6890 = vmatprep.subr.bf16.mxu1 %v6889_v51 }
 0x3ba   :  { %v7378_v16 = vpop.eup %7377  ;;  %5978 = vmatmul.mubr.f32.gmra.mrb[24].mxu1 %v694_v32  ;;  %v698_v11 = vmul.f32 %v7376_v63, %v8527_v61  ;;  %v1891_v61 = vld [vmem:[#allocation7 + $0x328] sm:$0xff] }
 0x3bb   :  { %v696_v25 = vmul.f32 %v7378_v16, %v8529_v58  ;;  %v1892_v58 = vld [vmem:[#allocation7 + $0x330] sm:$0xff]  ;;  %6892 = vmatpush3.bf16.msra.mxu1 %v6889_v51  ;;  %v1895_v16 = vld [vmem:[#allocation7 + $0x348] sm:$0xff]  ;;  %v1906_v51 = vld [vmem:[#allocation7 + $0x3a0] sm:$0xff] }
 0x3bc   :  { %v6853_v42 = vpack.c.bf16 %v1892_v58, %v1891_v61 }
 0x3bd   :  { %v7380_v55 = vpop.eup %7379  ;;  %5980 = vmatprep.mubr.f32.mxu1 %v696_v25  ;;  %v2089_v25 = vld [vmem:[#allocation7 + $0x248] sm:$0xff] }
 0x3be   :  { %v7382_v20 = vpop.eup %7381  ;;  %5981 = vmatmul.mubr.f32.gmra.mrb[26].mxu1 %v698_v11  ;;  %v702_v26 = vmul.f32 %v7380_v55, %v8533_v45  ;;  %6854 = vmatprep.subr.bf16.mxu0 %v6853_v42  ;;  %v1438_v45 = vld [vmem:[#allocation7 + $0x188] sm:$0xff]  ;;  %v1896_v11 = vld [vmem:[#allocation7 + $0x350] sm:$0xff] }
 0x3bf   :  { %v700_v60 = vmul.f32 %v7382_v20, %v8535_v36  ;;  %6856 = vmatpush3.bf16.msra.mxu0 %v6853_v42  ;;  %v8593_v36 = vrot.slane %v1438_v45, %v8026_v27  ;;  %v2092_v42 = vld [vmem:[#allocation7 + $0x260] sm:$0xff] }
 0x3c0   :  { %6858 = vmatprep.subr.bf16.mxu0 %v6857_v62  ;;  %v6897_v37 = vpack.c.bf16 %v2092_v42, %v2091_v4 }
 0x3c1   :  { %v7384_v53 = vpop.eup %7383  ;;  %5983 = vmatprep.mubr.f32.mxu1 %v700_v60  ;;  %v2090_v60 = vld [vmem:[#allocation7 + $0x250] sm:$0xff] }
 0x3c2   :  { %v7386_v46 = vpop.eup %7385  ;;  %5984 = vmatmul.mubr.f32.gmra.mrb[28].mxu1 %v702_v26  ;;  %v706_v30 = vmul.f32 %v7384_v53, %v8539_v12  ;;  %v6861_v26 = vpack.c.bf16 %v1896_v11, %v1895_v16  ;;  %v1897_v53 = vld [vmem:[#allocation7 + $0x358] sm:$0xff]  ;;  %v6893_v61 = vpack.c.bf16 %v2090_v60, %v2089_v25  ;;  %v2100_v11 = vld [vmem:[#allocation7 + $0x2a0] sm:$0xff] }
 0x3c3   :  { %v704_v47 = vmul.f32 %v7386_v46, %v8541_v52  ;;  %6860 = vmatpush3.bf16.msra.mxu0 %v6857_v62  ;;  %v1898_v46 = vld [vmem:[#allocation7 + $0x360] sm:$0xff]  ;;  %v2099_v16 = vld [vmem:[#allocation7 + $0x298] sm:$0xff] }
 0x3c4   :  { %v6865_v58 = vpack.c.bf16 %v1898_v46, %v1897_v53  ;;  %6862 = vmatprep.subr.bf16.mxu0 %v6861_v26  ;;  %6894 = vmatprep.subr.bf16.mxu1 %v6893_v61  ;;  %v6913_v25 = vpack.c.bf16 %v2100_v11, %v2099_v16 }
 0x3c5   :  { %5986 = vmatprep.mubr.f32.mxu1 %v704_v47  ;;  %6896 = vmatpush3.bf16.msra.mxu1 %v6893_v61 }
 0x3c6   :  { %5987 = vmatmul.mubr.f32.gmra.mrb[30].mxu1 %v706_v30  ;;  %6898 = vmatprep.subr.bf16.mxu1 %v6897_v37 }
 0x3c7   :  { %6864 = vmatpush3.bf16.msra.mxu0 %v6861_v26 }
 0x3c8   :  { %6866 = vmatprep.subr.bf16.mxu0 %v6865_v58 }
 0x3c9   :  { %6900 = vmatpush3.bf16.msra.mxu1 %v6897_v37 }
 0x3cb   :  { %6868 = vmatpush3.bf16.msra.mxu0 %v6865_v58 }
 0x47c   :  { %v5967_v28 = vpop.f32.mrb[16].mxu1 }
 0x47d   :  { %v1423_v12 = vmul.f32 0.5, %v5967_v28  ;;  %v1343_v44 = vpop.f32.mrb[17].mxu1  ;;  %v1899_v28 = vld [vmem:[#allocation7 + $0x368] sm:$0xff] }
 0x47e   :  { %v1422_v52 = vmul.f32 0.5, %v1343_v44  ;;  %v2093_v44 = vld [vmem:[#allocation7 + $0x268] sm:$0xff] }
 0x47f   :  { %v8596_v34 = vadd.f32 %v8593_v36, %v1423_v12  ;;  %v1900_v12 = vld [vmem:[#allocation7 + $0x370] sm:$0xff] }
 0x480   :  { %v8599_v33 = vadd.f32 %v8593_v36, %v1422_v52  ;;  %v5970_v19 = vpop.f32.mrb[18].mxu1 }
 0x481   :  { %1463 = vadd.xlane.f32.xlu0 %v8596_v34  ;;  %v1353_v24 = vpop.f32.mrb[19].mxu1  ;;  %v1425_v7 = vmul.f32 0.5, %v5970_v19  ;;  %v1510_v48 = vmul.f32 %v8596_v34, %v8596_v34 }
 0x482   :  { %1461 = vadd.xlane.f32.xlu1 %v8599_v33  ;;  %v1424_v22 = vmul.f32 0.5, %v1353_v24  ;;  %v1509_v29 = vmul.f32 %v8599_v33, %v8599_v33  ;;  %v6869_v24 = vpack.c.bf16 %v1900_v12, %v1899_v28  ;;  %v2510_v12 = vld [vmem:[#allocation7 + $0x2a8] sm:$0xff] }
 0x483   :  { %v8608_v49 = vadd.f32 %v8593_v36, %v1425_v7  ;;  %v2094_v7 = vld [vmem:[#allocation7 + $0x270] sm:$0xff] }
 0x484   :  { %v5973_v50 = vpop.f32.mrb[20].mxu1  ;;  %v8611_v43 = vadd.f32 %v8593_v36, %v1424_v22  ;;  %v1902_v22 = vld [vmem:[#allocation7 + $0x380] sm:$0xff]  ;;  %6870 = vmatprep.subr.bf16.mxu0 %v6869_v24 }
 0x485   :  { %1527 = vadd.xlane.f32.xlu0 %v1510_v48  ;;  %v1363_v18 = vpop.f32.mrb[21].mxu1  ;;  %v1427_v54 = vmul.f32 0.5, %v5973_v50  ;;  %v1512_v59 = vmul.f32 %v8608_v49, %v8608_v49  ;;  %v1901_v48 = vld [vmem:[#allocation7 + $0x378] sm:$0xff]  ;;  %6872 = vmatpush3.bf16.msra.mxu0 %v6869_v24 }
 0x486   :  { %1525 = vadd.xlane.f32.xlu1 %v1509_v29  ;;  %v1426_v23 = vmul.f32 0.5, %v1363_v18  ;;  %v1511_v5 = vmul.f32 %v8611_v43, %v8611_v43  ;;  %v6901_v18 = vpack.c.bf16 %v2094_v7, %v2093_v44  ;;  %v2511_v44 = vld [vmem:[#allocation7 + $0x2b0] sm:$0xff] }
 0x487   :  { %v8620_v0 = vadd.f32 %v8593_v36, %v1427_v54  ;;  %v2096_v54 = vld [vmem:[#allocation7 + $0x280] sm:$0xff] }
 0x488   :  { %v8623_v14 = vadd.f32 %v8593_v36, %v1426_v23  ;;  %6902 = vmatprep.subr.bf16.mxu1 %v6901_v18 }
 0x489   :  { %v5976_v40 = vpop.f32.mrb[22].mxu1  ;;  %1467 = vadd.xlane.f32.xlu0 %v8608_v49  ;;  %v1514_v1 = vmul.f32 %v8620_v0, %v8620_v0  ;;  %6904 = vmatpush3.bf16.msra.mxu1 %v6901_v18 }
 0x48a   :  { %v1373_v57 = vpop.f32.mrb[23].mxu1  ;;  %1465 = vadd.xlane.f32.xlu1 %v8611_v43  ;;  %v1429_v8 = vmul.f32 0.5, %v5976_v40  ;;  %v1513_v21 = vmul.f32 %v8623_v14, %v8623_v14  ;;  %v6873_v40 = vpack.c.bf16 %v1902_v22, %v1901_v48 }
 0x48b   :  { %v1428_v41 = vmul.f32 0.5, %v1373_v57  ;;  %v2095_v57 = vld [vmem:[#allocation7 + $0x278] sm:$0xff] }
 0x48c   :  { %v8638_v17 = vadd.f32 %v8593_v36, %v1429_v8  ;;  %6874 = vmatprep.subr.bf16.mxu0 %v6873_v40  ;;  %v2098_v8 = vld [vmem:[#allocation7 + $0x290] sm:$0xff] }
 0x48d   :  { %v5979_v15 = vpop.f32.mrb[24].mxu1  ;;  %1531 = vadd.xlane.f32.xlu0 %v1512_v59  ;;  %v8641_v32 = vadd.f32 %v8593_v36, %v1428_v41  ;;  %v6905_v59 = vpack.c.bf16 %v2096_v54, %v2095_v57  ;;  %6876 = vmatpush3.bf16.msra.mxu0 %v6873_v40 }
 0x48e   :  { %v1383_v2 = vpop.f32.mrb[25].mxu1  ;;  %1529 = vadd.xlane.f32.xlu1 %v1511_v5  ;;  %v1431_v55 = vmul.f32 0.5, %v5979_v15  ;;  %v1516_v20 = vmul.f32 %v8638_v17, %v8638_v17  ;;  %v1903_v5 = vld [vmem:[#allocation7 + $0x388] sm:$0xff] }
 0x48f   :  { %v1430_v30 = vmul.f32 0.5, %v1383_v2  ;;  %v1515_v47 = vmul.f32 %v8641_v32, %v8641_v32  ;;  %6906 = vmatprep.subr.bf16.mxu1 %v6905_v59  ;;  %v1904_v2 = vld [vmem:[#allocation7 + $0x390] sm:$0xff] }
 0x490   :  { %v8654_v6 = vadd.f32 %v8593_v36, %v1431_v55  ;;  %6908 = vmatpush3.bf16.msra.mxu1 %v6905_v59  ;;  %v6877_v31 = vpack.c.bf16 %v1904_v2, %v1903_v5 }
 0x491   :  { %v5982_v10 = vpop.f32.mrb[26].mxu1  ;;  %1471 = vadd.xlane.f32.xlu0 %v8620_v0  ;;  %v8657_v45 = vadd.f32 %v8593_v36, %v1430_v30 }
 0x492   :  { %v8626_v13 = vpop.f32.mrb[27].mxu1  ;;  %1469 = vadd.xlane.f32.xlu1 %v8623_v14  ;;  %v1433_v52 = vmul.f32 0.5, %v5982_v10  ;;  %v1518_v19 = vmul.f32 %v8654_v6, %v8654_v6  ;;  %v2097_v10 = vld [vmem:[#allocation7 + $0x288] sm:$0xff]  ;;  %6878 = vmatprep.subr.bf16.mxu0 %v6877_v31 }
 0x493   :  { %v1432_v50 = vmul.f32 0.5, %v8626_v13  ;;  %v1517_v29 = vmul.f32 %v8657_v45, %v8657_v45  ;;  %v8674_v13 = vpop.f32.mrb[32].mxu0  ;;  %v6909_v41 = vpack.c.bf16 %v2098_v8, %v2097_v10  ;;  %6880 = vmatpush3.bf16.msra.mxu0 %v6877_v31 }
 0x494   :  { %v8667_v23 = vadd.f32 %v8593_v36, %v1433_v52  ;;  %v8726_v52 = vpack.c.bf16 %v2511_v44, %v2510_v12 }
 0x495   :  { %v8631_v3 = vpop.f32.mrb[28].mxu1  ;;  %1535 = vadd.xlane.f32.xlu0 %v1514_v1  ;;  %v8670_v15 = vadd.f32 %v8593_v36, %v1432_v50  ;;  %v8679_v1 = vpop.f32.mrb[33].mxu0  ;;  %6910 = vmatprep.subr.bf16.mxu1 %v6909_v41 }
 0x496   :  { %v8635_v39 = vpop.f32.mrb[29].mxu1  ;;  %1533 = vadd.xlane.f32.xlu1 %v1513_v21  ;;  %v1435_v38 = vmul.f32 0.5, %v8631_v3  ;;  %v1520_v35 = vmul.f32 %v8667_v23, %v8667_v23  ;;  %v1905_v21 = vld [vmem:[#allocation7 + $0x398] sm:$0xff]  ;;  %6912 = vmatpush3.bf16.msra.mxu1 %v6909_v41 }
 0x497   :  { %v1434_v62 = vmul.f32 0.5, %v8635_v39  ;;  %v1519_v56 = vmul.f32 %v8670_v15, %v8670_v15  ;;  %v6881_v3 = vpack.c.bf16 %v1906_v51, %v1905_v21  ;;  %6914 = vmatprep.subr.bf16.mxu1 %v6913_v25 }
 0x498   :  { %v8685_v55 = vadd.f32 %v8593_v36, %v1435_v38 }
 0x499   :  { %v8643_v9 = vpop.f32.mrb[30].mxu1  ;;  %1475 = vadd.xlane.f32.xlu0 %v8638_v17  ;;  %v8688_v39 = vadd.f32 %v8593_v36, %v1434_v62  ;;  %6882 = vmatprep.subr.bf16.mxu0 %v6881_v3 }
 0x49a   :  { %v8646_v63 = vpop.f32.mrb[31].mxu1  ;;  %1473 = vadd.xlane.f32.xlu1 %v8641_v32  ;;  %v1437_v26 = vmul.f32 0.5, %v8643_v9  ;;  %v1522_v60 = vmul.f32 %v8685_v55, %v8685_v55  ;;  %6884 = vmatpush3.bf16.msra.mxu0 %v6881_v3 }
 0x49b   :  { %6916 = vmatpush3.bf16.msra.mxu1 %v6913_v25  ;;  %v1436_v46 = vmul.f32 0.5, %v8646_v63  ;;  %v1521_v30 = vmul.f32 %v8688_v39, %v8688_v39  ;;  %6918 = vmatprep.subr.bf16.mxu0 %v8726_v52 }
 0x49d   :  { %1539 = vadd.xlane.f32.xlu0 %v1516_v20  ;;  %v8692_v20 = vpop.f32.mrb[34].mxu0  ;;  %v8706_v61 = vadd.f32 %v8593_v36, %v1436_v46 }
 0x49e   :  { %1537 = vadd.xlane.f32.xlu1 %v1515_v47  ;;  %v8697_v53 = vpop.f32.mrb[35].mxu0  ;;  %v8703_v47 = vadd.f32 %v8593_v36, %v1437_v26 }
 0x49f   :  { %v8710_v9 = vpop.f32.mrb[36].mxu0  ;;  %v1523_v4 = vmul.f32 %v8706_v61, %v8706_v61 }
 0x4a0   :  { %v1524_v63 = vmul.f32 %v8703_v47, %v8703_v47  ;;  %v8714_v58 = vpop.f32.mrb[37].mxu0 }
 0x4a1   :  { %1479 = vadd.xlane.f32.xlu0 %v8654_v6  ;;  %v8718_v42 = vpop.f32.mrb[38].mxu0 }
 0x4a2   :  { %1477 = vadd.xlane.f32.xlu1 %v8657_v45  ;;  %v8720_v36 = vpop.f32.mrb[39].mxu0 }
 0x4a3   :  { %v8722_v37 = vpop.f32.mrb[40].mxu0 }
 0x4a4   :  { %v8724_v28 = vpop.f32.mrb[41].mxu0 }
 0x4a5   :  { %1543 = vadd.xlane.f32.xlu0 %v1518_v19  ;;  %v8729_v19 = vpop.f32.mrb[42].mxu0 }
 0x4a6   :  { %1541 = vadd.xlane.f32.xlu1 %v1517_v29  ;;  %v8731_v24 = vpop.f32.mrb[43].mxu0 }
 0x4a7   :  { %v8733_v7 = vpop.f32.mrb[44].mxu0 }
 0x4a8   :  { %v8735_v48 = vpop.f32.mrb[45].mxu0 }
 0x4a9   :  { %1483 = vadd.xlane.f32.xlu0 %v8667_v23  ;;  %v8737_v22 = vpop.f32.mrb[46].mxu0 }
 0x4aa   :  { %1481 = vadd.xlane.f32.xlu1 %v8670_v15  ;;  %v8739_v50 = vpop.f32.mrb[47].mxu0 }
 0x4ad   :  { %1547 = vadd.xlane.f32.xlu0 %v1520_v35 }
 0x4ae   :  { %1545 = vadd.xlane.f32.xlu1 %v1519_v56 }
 0x4b1   :  { %1487 = vadd.xlane.f32.xlu0 %v8685_v55 }
 0x4b2   :  { %1485 = vadd.xlane.f32.xlu1 %v8688_v39 }
 0x4b5   :  { %1551 = vadd.xlane.f32.xlu0 %v1522_v60 }
 0x4b6   :  { %1549 = vadd.xlane.f32.xlu1 %v1521_v30 }
 0x4b9   :  { %1491 = vadd.xlane.f32.xlu0 %v8703_v47 }
 0x4ba   :  { %1489 = vadd.xlane.f32.xlu1 %v8706_v61 }
 0x4bd   :  { %1555 = vadd.xlane.f32.xlu0 %v1524_v63 }
 0x4be   :  { %1553 = vadd.xlane.f32.xlu1 %v1523_v4 }
 0x50e   :  { %v1464_v29 = vpop.xlane.xlu0 %1463 }
 0x50f   :  { %v1494_v18 = vmul.f32 0.03125, %v1464_v29  ;;  %v1462_v40 = vpop.xlane.xlu1 %1461  ;;  %v1459_v29 = vld [vmem:[#allocation7 + $0x190] sm:$0xff] }
 0x510   :  { %v1493_v57 = vmul.f32 0.03125, %v1462_v40 }
 0x511   :  { %v1574_v59 = vmul.f32 %v1494_v18, %v1494_v18 }
 0x512   :  { %v1528_v54 = vpop.xlane.xlu0 %1527  ;;  %v1573_v10 = vmul.f32 %v1493_v57, %v1493_v57 }
 0x513   :  { %v1558_v5 = vmul.f32 0.03125, %v1528_v54  ;;  %v1526_v2 = vpop.xlane.xlu1 %1525 }
 0x514   :  { %v1557_v38 = vmul.f32 0.03125, %v1526_v2  ;;  %v1606_v2 = vsub.f32 %v8596_v34, %v1494_v18 }
 0x515   :  { %v1590_v35 = vsub.f32 %v1558_v5, %v1574_v59  ;;  %v1725_v59 = vld [vmem:[#allocation7 + $0x220] sm:$0xff]  ;;  %v1460_v5 = vld [vmem:[#allocation7 + $0x198] sm:$0xff] }
 0x516   :  { %v1589_v31 = vsub.f32 %v1557_v38, %v1573_v10  ;;  %v1468_v8 = vpop.xlane.xlu0 %1467  ;;  %v8755_v38 = vrot.slane %v1459_v29, %v8026_v27  ;;  %v2512_v29 = vld [vmem:[#allocation7 + $0x2b8] sm:$0xff] }
 0x517   :  { %v1622_v62 = vadd.f32 1e-05, %v1590_v35  ;;  %v8741_v56 = vmul.f32 0.03125, %v1468_v8  ;;  %v1466_v41 = vpop.xlane.xlu1 %1465 }
 0x518   :  { %v1621_v21 = vadd.f32 1e-05, %v1589_v31  ;;  %v8743_v51 = vmul.f32 0.03125, %v1466_v41  ;;  %v1605_v31 = vsub.f32 %v8599_v33, %v1493_v57 }
 0x519   :  { %7387 = vrsqrt.f32 %v1622_v62  ;;  %v1576_v16 = vmul.f32 %v8741_v56, %v8741_v56 }
 0x51a   :  { %7389 = vrsqrt.f32 %v1621_v21  ;;  %v1532_v3 = vpop.xlane.xlu0 %1531  ;;  %v1575_v26 = vmul.f32 %v8743_v51, %v8743_v51  ;;  %v8761_v21 = vrot.slane %v1725_v59, %v8026_v27 }
 0x51b   :  { %v1560_v11 = vmul.f32 0.03125, %v1532_v3  ;;  %v1530_v25 = vpop.xlane.xlu1 %1529 }
 0x51c   :  { %v1559_v60 = vmul.f32 0.03125, %v1530_v25 }
 0x51d   :  { %v1592_v46 = vsub.f32 %v1560_v11, %v1576_v16  ;;  %v8766_v11 = vrot.slane %v1460_v5, %v8026_v27 }
 0x51e   :  { %v1591_v30 = vsub.f32 %v1559_v60, %v1575_v26  ;;  %v1472_v63 = vpop.xlane.xlu0 %1471 }
 0x51f   :  { %v1624_v4 = vadd.f32 1e-05, %v1592_v46  ;;  %v8749_v12 = vmul.f32 0.03125, %v1472_v63  ;;  %v1470_v44 = vpop.xlane.xlu1 %1469 }
 0x520   :  { %v1623_v40 = vadd.f32 1e-05, %v1591_v30  ;;  %v8751_v54 = vmul.f32 0.03125, %v1470_v44  ;;  %v1797_v44 = vadd.f32 %v8679_v1, %v8761_v21 }
 0x521   :  { %7391 = vrsqrt.f32 %v1624_v4  ;;  %v1578_v8 = vmul.f32 %v8749_v12, %v8749_v12 }
 0x522   :  { %7393 = vrsqrt.f32 %v1623_v40  ;;  %v1536_v10 = vpop.xlane.xlu0 %1535  ;;  %v1577_v34 = vmul.f32 %v8751_v54, %v8751_v54  ;;  %v2513_v40 = vld [vmem:[#allocation7 + $0x2c0] sm:$0xff] }
 0x523   :  { %v7388_v35 = vpop.eup %7387  ;;  %v1562_v62 = vmul.f32 0.03125, %v1536_v10  ;;  %v1534_v41 = vpop.xlane.xlu1 %1533 }
 0x524   :  { %v7390_v3 = vpop.eup %7389  ;;  %v1561_v18 = vmul.f32 0.03125, %v1534_v41  ;;  %v1654_v16 = vmul.f32 %v7388_v35, %v1606_v2  ;;  %v1802_v2 = vadd.f32 %v8674_v13, %v8761_v21  ;;  %v1607_v41 = vsub.f32 %v8611_v43, %v8743_v51  ;;  %v2514_v51 = vld [vmem:[#allocation7 + $0x2c8] sm:$0xff] }
 0x525   :  { %v1594_v25 = vsub.f32 %v1562_v62, %v1578_v8  ;;  %v1653_v26 = vmul.f32 %v7390_v3, %v1605_v31  ;;  %v1608_v31 = vsub.f32 %v8608_v49, %v8741_v56  ;;  %v6921_v62 = vpack.c.bf16 %v2513_v40, %v2512_v29 }
 0x526   :  { %v1593_v33 = vsub.f32 %v1561_v18, %v1577_v34  ;;  %v1476_v57 = vpop.xlane.xlu0 %1475  ;;  %v1674_v60 = vmul.f32 %v8755_v38, %v1654_v16 }
 0x527   :  { %v1626_v46 = vadd.f32 1e-05, %v1594_v25  ;;  %v8769_v30 = vmul.f32 0.03125, %v1476_v57  ;;  %v1474_v63 = vpop.xlane.xlu1 %1473  ;;  %v1673_v4 = vmul.f32 %v8755_v38, %v1653_v26  ;;  %v2515_v57 = vld [vmem:[#allocation7 + $0x2d0] sm:$0xff] }
 0x528   :  { %v1625_v59 = vadd.f32 1e-05, %v1593_v33  ;;  %v1694_v5 = vadd.f32 %v8766_v11, %v1674_v60  ;;  %v8777_v10 = vmul.f32 0.03125, %v1474_v63 }
 0x529   :  { %7395 = vrsqrt.f32 %v1626_v46  ;;  %v1693_v35 = vadd.f32 %v8766_v11, %v1673_v4  ;;  %v1580_v3 = vmul.f32 %v8769_v30, %v8769_v30  ;;  %v1812_v4 = vadd.f32 %v8692_v20, %v8761_v21 }
 0x52a   :  { %7397 = vrsqrt.f32 %v1625_v59  ;;  %v1540_v8 = vpop.xlane.xlu0 %1539  ;;  %v8788_v25 = vadd.f32 %v1802_v2, %v1694_v5  ;;  %v1579_v49 = vmul.f32 %v8777_v10, %v8777_v10  ;;  %v1807_v5 = vadd.f32 %v8697_v53, %v8761_v21  ;;  %v2516_v2 = vld [vmem:[#allocation7 + $0x2d8] sm:$0xff] }
 0x52b   :  { %v7392_v1 = vpop.eup %7391  ;;  %v8786_v34 = vadd.f32 %v1797_v44, %v1693_v35  ;;  %v1564_v13 = vmul.f32 0.03125, %v1540_v8  ;;  %v1538_v18 = vpop.xlane.xlu1 %1537  ;;  %v2517_v35 = vld [vmem:[#allocation7 + $0x2e0] sm:$0xff]  ;;  %v6925_v20 = vpack.c.bf16 %v2515_v57, %v2514_v51 }
 0x52c   :  { %v7394_v16 = vpop.eup %7393  ;;  %10126 = vst [vmem:[#allocation15_spill] sm:$0xff] %v8788_v25  ;;  %v1563_v56 = vmul.f32 0.03125, %v1538_v18  ;;  %v1656_v26 = vmul.f32 %v7392_v1, %v1608_v31  ;;  %v6929_v53 = vpack.c.bf16 %v2517_v35, %v2516_v2  ;;  %v1817_v2 = vadd.f32 %v8714_v58, %v8761_v21  ;;  %v2520_v35 = vld [vmem:[#allocation7 + $0x2f8] sm:$0xff] }
 0x52d   :  { %10125 = vst [vmem:[#allocation14_spill] sm:$0xff] %v8786_v34  ;;  %v1596_v33 = vsub.f32 %v1564_v13, %v1580_v3  ;;  %6077 = vmatprep.mubr.f32.mxu0 %v8786_v34  ;;  %6133 = vmatprep.mubr.f32.mxu1 %v8786_v34  ;;  %v1655_v43 = vmul.f32 %v7394_v16, %v1607_v41 }
 0x52e   :  { %v1595_v60 = vsub.f32 %v1563_v56, %v1579_v49  ;;  %v1480_v46 = vpop.xlane.xlu0 %1479  ;;  %6078 = vmatmul.mubr.f32.vlgmr.msra.gmra.mrb[48].mxu0 %v8788_v25  ;;  %6134 = vmatmul.mubr.f32.vlgmr.msra.gmra.mrb[32].mxu1 %v8788_v25  ;;  %v1676_v63 = vmul.f32 %v8755_v38, %v1656_v26  ;;  %v1610_v3 = vsub.f32 %v8620_v0, %v8749_v12 }
 0x52f   :  { %v1628_v44 = vadd.f32 1e-05, %v1596_v33  ;;  %v8799_v29 = vmul.f32 0.03125, %v1480_v46  ;;  %v1478_v40 = vpop.xlane.xlu1 %1477  ;;  %v1675_v59 = vmul.f32 %v8755_v38, %v1655_v43  ;;  %6920 = vmatpush3.bf16.msra.mxu0 %v8726_v52  ;;  %v1609_v52 = vsub.f32 %v8623_v14, %v8751_v54  ;;  %v2518_v54 = vld [vmem:[#allocation7 + $0x2e8] sm:$0xff] }
 0x530   :  { %v1627_v31 = vadd.f32 1e-05, %v1595_v60  ;;  %v1696_v8 = vadd.f32 %v8766_v11, %v1676_v63  ;;  %v8806_v1 = vmul.f32 0.03125, %v1478_v40  ;;  %6922 = vmatprep.subr.bf16.mxu0 %v6921_v62  ;;  %v2519_v60 = vld [vmem:[#allocation7 + $0x2f0] sm:$0xff] }
 0x531   :  { %7399 = vrsqrt.f32 %v1628_v44  ;;  %v1695_v41 = vadd.f32 %v8766_v11, %v1675_v59  ;;  %v1582_v16 = vmul.f32 %v8799_v29, %v8799_v29 }
 0x532   :  { %7401 = vrsqrt.f32 %v1627_v31  ;;  %v1544_v13 = vpop.xlane.xlu0 %1543  ;;  %v8817_v43 = vadd.f32 %v1812_v4, %v1696_v8  ;;  %v1581_v0 = vmul.f32 %v8806_v1, %v8806_v1  ;;  %v1822_v4 = vadd.f32 %v8710_v9, %v8761_v21  ;;  %v2521_v31 = vld [vmem:[#allocation7 + $0x300] sm:$0xff] }
 0x533   :  { %v7396_v18 = vpop.eup %7395  ;;  %v8815_v49 = vadd.f32 %v1807_v5, %v1695_v41  ;;  %v1566_v56 = vmul.f32 0.03125, %v1544_v13  ;;  %v1542_v26 = vpop.xlane.xlu1 %1541  ;;  %6924 = vmatpush3.bf16.msra.mxu0 %v6921_v62  ;;  %v6933_v13 = vpack.c.bf16 %v2519_v60, %v2518_v54  ;;  %v2523_v54 = vld [vmem:[#allocation7 + $0x310] sm:$0xff] }
 0x534   :  { %v7398_v33 = vpop.eup %7397  ;;  %10128 = vst [vmem:[#allocation17_spill] sm:$0xff] %v8817_v43  ;;  %v1565_v12 = vmul.f32 0.03125, %v1542_v26  ;;  %v1658_v51 = vmul.f32 %v7396_v18, %v1610_v3  ;;  %6926 = vmatprep.subr.bf16.mxu0 %v6925_v20  ;;  %v1612_v18 = vsub.f32 %v8638_v17, %v8769_v30 }
 0x535   :  { %10127 = vst [vmem:[#allocation16_spill] sm:$0xff] %v8815_v49  ;;  %v1598_v57 = vsub.f32 %v1566_v56, %v1582_v16  ;;  %6080 = vmatprep.mubr.f32.mxu0 %v8815_v49  ;;  %6136 = vmatprep.mubr.f32.mxu1 %v8815_v49  ;;  %v1657_v14 = vmul.f32 %v7398_v33, %v1609_v52 }
 0x536   :  { %v1597_v46 = vsub.f32 %v1565_v12, %v1581_v0  ;;  %v1484_v63 = vpop.xlane.xlu0 %1483  ;;  %6081 = vmatmul.mubr.f32.gmra.mrb[50].mxu0 %v8817_v43  ;;  %6137 = vmatmul.mubr.f32.gmra.mrb[34].mxu1 %v8817_v43  ;;  %v1678_v62 = vmul.f32 %v8755_v38, %v1658_v51  ;;  %v6937_v16 = vpack.c.bf16 %v2521_v31, %v2520_v35  ;;  %v2525_v35 = vld [vmem:[#allocation7 + $0x320] sm:$0xff] }
 0x537   :  { %v1630_v44 = vadd.f32 1e-05, %v1598_v57  ;;  %v8828_v40 = vmul.f32 0.03125, %v1484_v63  ;;  %v1482_v59 = vpop.xlane.xlu1 %1481  ;;  %v1677_v5 = vmul.f32 %v8755_v38, %v1657_v14  ;;  %6928 = vmatpush3.bf16.msra.mxu0 %v6925_v20  ;;  %v1611_v20 = vsub.f32 %v8641_v32, %v8777_v10  ;;  %v2522_v10 = vld [vmem:[#allocation7 + $0x308] sm:$0xff] }
 0x538   :  { %v1629_v8 = vadd.f32 1e-05, %v1597_v46  ;;  %v1698_v41 = vadd.f32 %v8766_v11, %v1678_v62  ;;  %v8834_v3 = vmul.f32 0.03125, %v1482_v59  ;;  %6930 = vmatprep.subr.bf16.mxu0 %v6929_v53  ;;  %v1832_v63 = vadd.f32 %v8718_v42, %v8761_v21 }
 0x539   :  { %7403 = vrsqrt.f32 %v1630_v44  ;;  %v1697_v9 = vadd.f32 %v8766_v11, %v1677_v5  ;;  %v1584_v56 = vmul.f32 %v8828_v40, %v8828_v40  ;;  %v1827_v5 = vadd.f32 %v8720_v36, %v8761_v21 }
 0x53a   :  { %7405 = vrsqrt.f32 %v1629_v8  ;;  %v1548_v52 = vpop.xlane.xlu0 %1547  ;;  %v8845_v51 = vadd.f32 %v1822_v4, %v1698_v41  ;;  %v1583_v17 = vmul.f32 %v8834_v3, %v8834_v3 }
 0x53b   :  { %v7400_v58 = vpop.eup %7399  ;;  %v8843_v26 = vadd.f32 %v1817_v2, %v1697_v9  ;;  %v1568_v33 = vmul.f32 0.03125, %v1548_v52  ;;  %v1546_v0 = vpop.xlane.xlu1 %1545  ;;  %6932 = vmatpush3.bf16.msra.mxu0 %v6929_v53  ;;  %v2524_v2 = vld [vmem:[#allocation7 + $0x318] sm:$0xff]  ;;  %v6941_v9 = vpack.c.bf16 %v2523_v54, %v2522_v10 }
 0x53c   :  { %v7402_v12 = vpop.eup %7401  ;;  %10130 = vst [vmem:[#allocation19_spill] sm:$0xff] %v8845_v51  ;;  %v1567_v30 = vmul.f32 0.03125, %v1546_v0  ;;  %v1660_v57 = vmul.f32 %v7400_v58, %v1612_v18  ;;  %6934 = vmatprep.subr.bf16.mxu0 %v6933_v13  ;;  %v1614_v18 = vsub.f32 %v8654_v6, %v8799_v29  ;;  %v6945_v58 = vpack.c.bf16 %v2525_v35, %v2524_v2 }
 0x53d   :  { %10129 = vst [vmem:[#allocation18_spill] sm:$0xff] %v8843_v26  ;;  %v1600_v14 = vsub.f32 %v1568_v33, %v1584_v56  ;;  %6083 = vmatprep.mubr.f32.mxu0 %v8843_v26  ;;  %6139 = vmatprep.mubr.f32.mxu1 %v8843_v26  ;;  %v1659_v32 = vmul.f32 %v7402_v12, %v1611_v20 }
 0x53e   :  { %v1599_v60 = vsub.f32 %v1567_v30, %v1583_v17  ;;  %v1488_v46 = vpop.xlane.xlu0 %1487  ;;  %6084 = vmatmul.mubr.f32.gmra.mrb[52].mxu0 %v8845_v51  ;;  %6140 = vmatmul.mubr.f32.gmra.mrb[36].mxu1 %v8845_v51  ;;  %v1680_v53 = vmul.f32 %v8755_v38, %v1660_v57 }
 0x53f   :  { %v1632_v62 = vadd.f32 1e-05, %v1600_v14  ;;  %v8856_v4 = vmul.f32 0.03125, %v1488_v46  ;;  %v1486_v44 = vpop.xlane.xlu1 %1485  ;;  %v1679_v59 = vmul.f32 %v8755_v38, %v1659_v32  ;;  %6936 = vmatpush3.bf16.msra.mxu0 %v6933_v13  ;;  %v1613_v13 = vsub.f32 %v8657_v45, %v8806_v1 }
 0x540   :  { %v1631_v31 = vadd.f32 1e-05, %v1599_v60  ;;  %v1700_v8 = vadd.f32 %v8766_v11, %v1680_v53  ;;  %v8862_v41 = vmul.f32 0.03125, %v1486_v44  ;;  %6938 = vmatprep.subr.bf16.mxu0 %v6937_v16  ;;  %v1837_v46 = vadd.f32 %v8724_v28, %v8761_v21 }
 0x541   :  { %7407 = vrsqrt.f32 %v1632_v62  ;;  %v1699_v42 = vadd.f32 %v8766_v11, %v1679_v59  ;;  %v1586_v20 = vmul.f32 %v8856_v4, %v8856_v4  ;;  %v1842_v62 = vadd.f32 %v8722_v37, %v8761_v21 }
 0x542   :  { %7409 = vrsqrt.f32 %v1631_v31  ;;  %v1552_v52 = vpop.xlane.xlu0 %1551  ;;  %v8873_v17 = vadd.f32 %v1832_v63, %v1700_v8  ;;  %v1585_v6 = vmul.f32 %v8862_v41, %v8862_v41  ;;  %v1615_v28 = vsub.f32 %v8670_v15, %v8834_v3 }
 0x543   :  { %v7404_v36 = vpop.eup %7403  ;;  %v8871_v56 = vadd.f32 %v1827_v5, %v1699_v42  ;;  %v1570_v33 = vmul.f32 0.03125, %v1552_v52  ;;  %v1550_v0 = vpop.xlane.xlu1 %1549  ;;  %6940 = vmatpush3.bf16.msra.mxu0 %v6937_v16  ;;  %v1616_v5 = vsub.f32 %v8667_v23, %v8828_v40 }
 0x544   :  { %v7406_v12 = vpop.eup %7405  ;;  %10132 = vst [vmem:[#allocation21_spill] sm:$0xff] %v8873_v17  ;;  %v1569_v29 = vmul.f32 0.03125, %v1550_v0  ;;  %v1662_v30 = vmul.f32 %v7404_v36, %v1614_v18  ;;  %6942 = vmatprep.subr.bf16.mxu0 %v6941_v9 }
 0x545   :  { %10131 = vst [vmem:[#allocation20_spill] sm:$0xff] %v8871_v56  ;;  %v1602_v57 = vsub.f32 %v1570_v33, %v1586_v20  ;;  %6086 = vmatprep.mubr.f32.mxu0 %v8871_v56  ;;  %6142 = vmatprep.mubr.f32.mxu1 %v8871_v56  ;;  %v1661_v45 = vmul.f32 %v7406_v12, %v1613_v13 }
 0x546   :  { %v1601_v1 = vsub.f32 %v1569_v29, %v1585_v6  ;;  %v1492_v14 = vpop.xlane.xlu0 %1491  ;;  %6087 = vmatmul.mubr.f32.gmra.mrb[54].mxu0 %v8873_v17  ;;  %6143 = vmatmul.mubr.f32.gmra.mrb[38].mxu1 %v8873_v17  ;;  %v1682_v16 = vmul.f32 %v8755_v38, %v1662_v30  ;;  %v1847_v33 = vadd.f32 %v8731_v24, %v8761_v21 }
 0x547   :  { %v1634_v32 = vadd.f32 1e-05, %v1602_v57  ;;  %v8882_v10 = vmul.f32 0.03125, %v1492_v14  ;;  %v1490_v54 = vpop.xlane.xlu1 %1489  ;;  %v1681_v60 = vmul.f32 %v8755_v38, %v1661_v45  ;;  %6944 = vmatpush3.bf16.msra.mxu0 %v6941_v9  ;;  %v1852_v6 = vadd.f32 %v8729_v19, %v8761_v21 }
 0x548   :  { %v1633_v53 = vadd.f32 1e-05, %v1601_v1  ;;  %v1702_v63 = vadd.f32 %v8766_v11, %v1682_v16  ;;  %v8890_v44 = vmul.f32 0.03125, %v1490_v54  ;;  %6946 = vmatprep.subr.bf16.mxu0 %v6945_v58  ;;  %v1618_v30 = vsub.f32 %v8685_v55, %v8856_v4 }
 0x549   :  { %7411 = vrsqrt.f32 %v1634_v32  ;;  %v1701_v59 = vadd.f32 %v8766_v11, %v1681_v60  ;;  %v1588_v31 = vmul.f32 %v8882_v10, %v8882_v10  ;;  %v1617_v45 = vsub.f32 %v8688_v39, %v8862_v41 }
 0x54a   :  { %7413 = vrsqrt.f32 %v1633_v53  ;;  %v1556_v2 = vpop.xlane.xlu0 %1555  ;;  %v8901_v18 = vadd.f32 %v1842_v62, %v1702_v63  ;;  %v1587_v23 = vmul.f32 %v8890_v44, %v8890_v44  ;;  %v1857_v39 = vadd.f32 %v8735_v48, %v8761_v21 }
 0x54b   :  { %v7408_v35 = vpop.eup %7407  ;;  %v8899_v8 = vadd.f32 %v1837_v46, %v1701_v59  ;;  %v1572_v37 = vmul.f32 0.03125, %v1556_v2  ;;  %v1554_v9 = vpop.xlane.xlu1 %1553  ;;  %6948 = vmatpush3.bf16.msra.mxu0 %v6945_v58  ;;  %v1862_v32 = vadd.f32 %v8733_v7, %v8761_v21  ;;  %v1620_v60 = vsub.f32 %v8703_v47, %v8882_v10 }
 0x54c   :  { %v7410_v42 = vpop.eup %7409  ;;  %10134 = vst [vmem:[#allocation23_spill] sm:$0xff] %v8901_v18  ;;  %v1571_v40 = vmul.f32 0.03125, %v1554_v9  ;;  %v1664_v52 = vmul.f32 %v7408_v35, %v1616_v5  ;;  %v1619_v53 = vsub.f32 %v8706_v61, %v8890_v44  ;;  %v1867_v61 = vadd.f32 %v8739_v50, %v8761_v21 }
 0x54d   :  { %10133 = vst [vmem:[#allocation22_spill] sm:$0xff] %v8899_v8  ;;  %v1604_v36 = vsub.f32 %v1572_v37, %v1588_v31  ;;  %6089 = vmatprep.mubr.f32.mxu0 %v8899_v8  ;;  %6145 = vmatprep.mubr.f32.mxu1 %v8899_v8  ;;  %v1663_v15 = vmul.f32 %v7410_v42, %v1615_v28 }
 0x54e   :  { %v1603_v3 = vsub.f32 %v1571_v40, %v1587_v23  ;;  %6090 = vmatmul.mubr.f32.gmra.mrb[56].mxu0 %v8901_v18  ;;  %6146 = vmatmul.mubr.f32.gmra.mrb[40].mxu1 %v8901_v18  ;;  %v1684_v58 = vmul.f32 %v8755_v38, %v1664_v52  ;;  %v1872_v5 = vadd.f32 %v8737_v22, %v8761_v21  ;;  %v2084_v22 = vld [vmem:[#allocation7 + $0x3a8] sm:$0xff] }
 0x54f   :  { %v1636_v13 = vadd.f32 1e-05, %v1604_v36  ;;  %v1683_v20 = vmul.f32 %v8755_v38, %v1663_v15  ;;  %v2249_v50 = vrot.slane %v2084_v22, %v8026_v27 }
 0x550   :  { %v1635_v0 = vadd.f32 1e-05, %v1603_v3  ;;  %v1704_v12 = vadd.f32 %v8766_v11, %v1684_v58 }
 0x551   :  { %7415 = vrsqrt.f32 %v1636_v13  ;;  %v1703_v29 = vadd.f32 %v8766_v11, %v1683_v20 }
 0x552   :  { %7417 = vrsqrt.f32 %v1635_v0  ;;  %v8923_v14 = vadd.f32 %v1852_v6, %v1704_v12 }
 0x553   :  { %v7412_v57 = vpop.eup %7411  ;;  %v8921_v1 = vadd.f32 %v1847_v33, %v1703_v29 }
 0x554   :  { %v7414_v24 = vpop.eup %7413  ;;  %10136 = vst [vmem:[#allocation25_spill] sm:$0xff] %v8923_v14  ;;  %v1666_v16 = vmul.f32 %v7412_v57, %v1618_v30 }
 0x555   :  { %10135 = vst [vmem:[#allocation24_spill] sm:$0xff] %v8921_v1  ;;  %6092 = vmatprep.mubr.f32.mxu0 %v8921_v1  ;;  %6148 = vmatprep.mubr.f32.mxu1 %v8921_v1  ;;  %v1665_v19 = vmul.f32 %v7414_v24, %v1617_v45 }
 0x556   :  { %6093 = vmatmul.mubr.f32.gmra.mrb[58].mxu0 %v8923_v14  ;;  %6149 = vmatmul.mubr.f32.gmra.mrb[42].mxu1 %v8923_v14  ;;  %v1686_v55 = vmul.f32 %v8755_v38, %v1666_v16 }
 0x557   :  { %v1685_v4 = vmul.f32 %v8755_v38, %v1665_v19 }
 0x558   :  { %v1706_v41 = vadd.f32 %v8766_v11, %v1686_v55 }
 0x559   :  { %v1705_v54 = vadd.f32 %v8766_v11, %v1685_v4 }
 0x55a   :  { %v8943_v59 = vadd.f32 %v1862_v32, %v1706_v41 }
 0x55b   :  { %v7416_v46 = vpop.eup %7415  ;;  %v8941_v63 = vadd.f32 %v1857_v39, %v1705_v54 }
 0x55c   :  { %v7418_v62 = vpop.eup %7417  ;;  %10138 = vst [vmem:[#allocation27_spill] sm:$0xff] %v8943_v59  ;;  %v1668_v48 = vmul.f32 %v7416_v46, %v1620_v60 }
 0x55d   :  { %10137 = vst [vmem:[#allocation26_spill] sm:$0xff] %v8941_v63  ;;  %6095 = vmatprep.mubr.f32.mxu0 %v8941_v63  ;;  %6151 = vmatprep.mubr.f32.mxu1 %v8941_v63  ;;  %v1667_v7 = vmul.f32 %v7418_v62, %v1619_v53 }
 0x55e   :  { %6096 = vmatmul.mubr.f32.gmra.mrb[60].mxu0 %v8943_v59  ;;  %6152 = vmatmul.mubr.f32.gmra.mrb[44].mxu1 %v8943_v59  ;;  %v1688_v47 = vmul.f32 %v8755_v38, %v1668_v48 }
 0x55f   :  { %v1687_v10 = vmul.f32 %v8755_v38, %v1667_v7 }
 0x560   :  { %v1708_v44 = vadd.f32 %v8766_v11, %v1688_v47 }
 0x561   :  { %v1707_v2 = vadd.f32 %v8766_v11, %v1687_v10 }
 0x562   :  { %v8959_v28 = vadd.f32 %v1872_v5, %v1708_v44 }
 0x563   :  { %v8957_v35 = vadd.f32 %v1867_v61, %v1707_v2 }
 0x564   :  { %10140 = vst [vmem:[#allocation29_spill] sm:$0xff] %v8959_v28 }
 0x565   :  { %10139 = vst [vmem:[#allocation28_spill] sm:$0xff] %v8957_v35  ;;  %6098 = vmatprep.mubr.f32.mxu0 %v8957_v35  ;;  %6154 = vmatprep.mubr.f32.mxu1 %v8957_v35 }
 0x566   :  { %6099 = vmatmul.mubr.f32.gmra.mrb[62].mxu0 %v8959_v28  ;;  %6155 = vmatmul.mubr.f32.gmra.mrb[46].mxu1 %v8959_v28 }
 0x567   :  { %6189 = vmatprep.mubr.f32.mxu0 %v8786_v34 }
 0x56a   :  { %6190 = vmatmul.mubr.f32.vlgmr.msra.gmra.mrb[64].mxu0 %v8788_v25 }
 0x56b   :  { %6192 = vmatprep.mubr.f32.mxu0 %v8815_v49  ;;  %v9210_v49 = vld [vmem:[#allocation5 + $0x28] sm:$0xff] }
 0x56e   :  { %6193 = vmatmul.mubr.f32.gmra.mrb[66].mxu0 %v8817_v43 }
 0x56f   :  { %6195 = vmatprep.mubr.f32.mxu0 %v8843_v26 }
 0x572   :  { %6196 = vmatmul.mubr.f32.gmra.mrb[68].mxu0 %v8845_v51 }
 0x573   :  { %6198 = vmatprep.mubr.f32.mxu0 %v8871_v56 }
 0x576   :  { %6199 = vmatmul.mubr.f32.gmra.mrb[70].mxu0 %v8873_v17  ;;  %v9177_v17 = vld [vmem:[#allocation5] sm:$0xff] }
 0x577   :  { %6201 = vmatprep.mubr.f32.mxu0 %v8899_v8 }
 0x57a   :  { %6202 = vmatmul.mubr.f32.gmra.mrb[72].mxu0 %v8901_v18 }
 0x57b   :  { %6204 = vmatprep.mubr.f32.mxu0 %v8921_v1 }
 0x57e   :  { %6205 = vmatmul.mubr.f32.gmra.mrb[74].mxu0 %v8923_v14 }
 0x57f   :  { %6207 = vmatprep.mubr.f32.mxu0 %v8941_v63 }
 0x582   :  { %6208 = vmatmul.mubr.f32.gmra.mrb[76].mxu0 %v8943_v59 }
 0x583   :  { %6210 = vmatprep.mubr.f32.mxu0 %v8957_v35 }
 0x586   :  { %6211 = vmatmul.mubr.f32.gmra.mrb[78].mxu0 %v8959_v28 }
 0x601   :  { %v8982_v38 = vpop.f32.mrb[48].mxu0  ;;  %v6135_v21 = vpop.f32.mrb[32].mxu1 }
 0x602   :  { %v8984_v11 = vpop.f32.mrb[49].mxu0  ;;  %v2167_v31 = vpop.f32.mrb[33].mxu1  ;;  %v2251_v37 = vmul.f32 %v6135_v21, %v2249_v50 }
 0x603   :  { %v2250_v9 = vmul.f32 %v2249_v50, %v2167_v31  ;;  %v8986_v42 = vpack.c.bf16 %v6135_v21, %v2167_v31 }
 0x604   :  { %2268 = vadd.xlane.f32.xlu0 %v2251_v37 }
 0x605   :  { %2266 = vadd.xlane.f32.xlu1 %v2250_v9 }
 0x609   :  { %v8988_v23 = vpop.f32.mrb[50].mxu0  ;;  %v6138_v40 = vpop.f32.mrb[34].mxu1 }
 0x60a   :  { %v8990_v52 = vmul.f32 %v6138_v40, %v2249_v50  ;;  %v8992_v36 = vpop.f32.mrb[51].mxu0  ;;  %v2177_v15 = vpop.f32.mrb[35].mxu1 }
 0x60b   :  { %v8994_v3 = vmul.f32 %v2249_v50, %v2177_v15  ;;  %v8996_v58 = vpack.c.bf16 %v6138_v40, %v2177_v15 }
 0x611   :  { %v8998_v13 = vpop.f32.mrb[52].mxu0  ;;  %v6141_v20 = vpop.f32.mrb[36].mxu1 }
 0x612   :  { %v9000_v33 = vmul.f32 %v6141_v20, %v2249_v50  ;;  %v9002_v0 = vpop.f32.mrb[53].mxu0  ;;  %v2187_v12 = vpop.f32.mrb[37].mxu1 }
 0x613   :  { %v9004_v6 = vmul.f32 %v2249_v50, %v2187_v12  ;;  %v9006_v29 = vpack.c.bf16 %v6141_v20, %v2187_v12 }
 0x619   :  { %v9008_v30 = vpop.f32.mrb[54].mxu0  ;;  %v6144_v57 = vpop.f32.mrb[38].mxu1 }
 0x61a   :  { %v9010_v45 = vmul.f32 %v6144_v57, %v2249_v50  ;;  %v9012_v24 = vpop.f32.mrb[55].mxu0  ;;  %v2197_v16 = vpop.f32.mrb[39].mxu1 }
 0x61b   :  { %v9014_v19 = vmul.f32 %v2249_v50, %v2197_v16  ;;  %v9016_v55 = vpack.c.bf16 %v6144_v57, %v2197_v16  ;;  %v10142_v16 = vld [vmem:[#allocation13_spill] sm:$0xff] }
 0x621   :  { %v9018_v4 = vpop.f32.mrb[56].mxu0  ;;  %v6147_v39 = vpop.f32.mrb[40].mxu1 }
 0x622   :  { %v9020_v41 = vmul.f32 %v6147_v39, %v2249_v50  ;;  %v9022_v32 = vpop.f32.mrb[57].mxu0  ;;  %v2207_v54 = vpop.f32.mrb[41].mxu1 }
 0x623   :  { %v9024_v60 = vmul.f32 %v2249_v50, %v2207_v54  ;;  %v9026_v46 = vpack.c.bf16 %v6147_v39, %v2207_v54  ;;  %v9055_v39 = vrot.slane %v2084_v22, %v10142_v16 }
 0x629   :  { %v9028_v53 = vpop.f32.mrb[58].mxu0  ;;  %v6150_v62 = vpop.f32.mrb[42].mxu1 }
 0x62a   :  { %v9030_v48 = vmul.f32 %v6150_v62, %v2249_v50  ;;  %v9032_v7 = vpop.f32.mrb[59].mxu0  ;;  %v2217_v47 = vpop.f32.mrb[43].mxu1 }
 0x62b   :  { %v9034_v10 = vmul.f32 %v2249_v50, %v2217_v47  ;;  %v9036_v61 = vpack.c.bf16 %v6150_v62, %v2217_v47 }
 0x631   :  { %v9038_v44 = vpop.f32.mrb[60].mxu0  ;;  %v6153_v5 = vpop.f32.mrb[44].mxu1 }
 0x632   :  { %v9040_v2 = vmul.f32 %v6153_v5, %v2249_v50  ;;  %v9042_v21 = vpop.f32.mrb[61].mxu0  ;;  %v2227_v31 = vpop.f32.mrb[45].mxu1 }
 0x633   :  { %v9044_v37 = vmul.f32 %v2249_v50, %v2227_v31  ;;  %v9046_v9 = vpack.c.bf16 %v6153_v5, %v2227_v31 }
 0x635   :  { %10141 = vst [vmem:[#allocation30_spill] sm:$0xff] %v9046_v9 }
 0x639   :  { %v9048_v40 = vpop.f32.mrb[62].mxu0  ;;  %v6156_v15 = vpop.f32.mrb[46].mxu1 }
 0x63a   :  { %v9050_v20 = vmul.f32 %v6156_v15, %v2249_v50  ;;  %v9052_v12 = vpop.f32.mrb[63].mxu0  ;;  %v2237_v57 = vpop.f32.mrb[47].mxu1 }
 0x63b   :  { %v9057_v54 = vmul.f32 %v2249_v50, %v2237_v57  ;;  %v9059_v62 = vpack.c.bf16 %v6156_v15, %v2237_v57 }
 0x63d   :  { %10143 = vst [vmem:[#allocation13_spill] sm:$0xff] %v9059_v62  ;;  %v6191_v47 = vpop.f32.mrb[64].mxu0  ;;  %v9248_v62 = vld [vmem:[#allocation5 + $0x40] sm:$0xff] }
 0x63e   :  { %v2592_v28 = vpop.f32.mrb[65].mxu0  ;;  %v2676_v5 = vmul.f32 %v6191_v47, %v9055_v39 }
 0x63f   :  { %v2675_v31 = vmul.f32 %v9055_v39, %v2592_v28  ;;  %v6949_v35 = vpack.c.bf16 %v6191_v47, %v2592_v28 }
 0x640   :  { %2693 = vadd.xlane.f32.xlu0 %v2676_v5 }
 0x641   :  { %6950 = vmatprep.subr.bf16.mxu1 %v6949_v35  ;;  %2691 = vadd.xlane.f32.xlu1 %v2675_v31  ;;  %v6194_v59 = vpop.f32.mrb[66].mxu0 }
 0x642   :  { %v2678_v63 = vmul.f32 %v6194_v59, %v9055_v39  ;;  %v2602_v14 = vpop.f32.mrb[67].mxu0  ;;  %6952 = vmatpush3.bf16.msra.mxu1 %v6949_v35 }
 0x643   :  { %v2677_v22 = vmul.f32 %v9055_v39, %v2602_v14  ;;  %v6953_v50 = vpack.c.bf16 %v6194_v59, %v2602_v14 }
 0x644   :  { %2697 = vadd.xlane.f32.xlu0 %v2678_v63 }
 0x645   :  { %6954 = vmatprep.subr.bf16.mxu1 %v6953_v50  ;;  %2695 = vadd.xlane.f32.xlu1 %v2677_v22  ;;  %v6197_v15 = vpop.f32.mrb[68].mxu0 }
 0x646   :  { %v2680_v57 = vmul.f32 %v6197_v15, %v9055_v39  ;;  %v2612_v1 = vpop.f32.mrb[69].mxu0  ;;  %6956 = vmatpush3.bf16.msra.mxu1 %v6953_v50 }
 0x647   :  { %v2679_v28 = vmul.f32 %v9055_v39, %v2612_v1  ;;  %v6957_v47 = vpack.c.bf16 %v6197_v15, %v2612_v1 }
 0x648   :  { %2701 = vadd.xlane.f32.xlu0 %v2680_v57 }
 0x649   :  { %6958 = vmatprep.subr.bf16.mxu1 %v6957_v47  ;;  %2699 = vadd.xlane.f32.xlu1 %v2679_v28  ;;  %v6200_v5 = vpop.f32.mrb[70].mxu0 }
 0x64a   :  { %v2682_v35 = vmul.f32 %v6200_v5, %v9055_v39  ;;  %v2622_v31 = vpop.f32.mrb[71].mxu0  ;;  %6960 = vmatpush3.bf16.msra.mxu1 %v6957_v47 }
 0x64b   :  { %v2681_v14 = vmul.f32 %v9055_v39, %v2622_v31  ;;  %v6961_v63 = vpack.c.bf16 %v6200_v5, %v2622_v31 }
 0x64c   :  { %2705 = vadd.xlane.f32.xlu0 %v2682_v35 }
 0x64d   :  { %6962 = vmatprep.subr.bf16.mxu1 %v6961_v63  ;;  %2703 = vadd.xlane.f32.xlu1 %v2681_v14  ;;  %v6203_v59 = vpop.f32.mrb[72].mxu0 }
 0x64e   :  { %v2684_v22 = vmul.f32 %v6203_v59, %v9055_v39  ;;  %v2632_v50 = vpop.f32.mrb[73].mxu0  ;;  %6964 = vmatpush3.bf16.msra.mxu1 %v6961_v63 }
 0x64f   :  { %v2683_v1 = vmul.f32 %v9055_v39, %v2632_v50  ;;  %v6965_v15 = vpack.c.bf16 %v6203_v59, %v2632_v50 }
 0x650   :  { %2709 = vadd.xlane.f32.xlu0 %v2684_v22 }
 0x651   :  { %6966 = vmatprep.subr.bf16.mxu1 %v6965_v15  ;;  %2707 = vadd.xlane.f32.xlu1 %v2683_v1  ;;  %v6206_v57 = vpop.f32.mrb[74].mxu0 }
 0x652   :  { %v2686_v28 = vmul.f32 %v6206_v57, %v9055_v39  ;;  %v2642_v47 = vpop.f32.mrb[75].mxu0  ;;  %6968 = vmatpush3.bf16.msra.mxu1 %v6965_v15 }
 0x653   :  { %v2685_v5 = vmul.f32 %v9055_v39, %v2642_v47  ;;  %v6969_v35 = vpack.c.bf16 %v6206_v57, %v2642_v47 }
 0x654   :  { %2713 = vadd.xlane.f32.xlu0 %v2686_v28 }
 0x655   :  { %6970 = vmatprep.subr.bf16.mxu1 %v6969_v35  ;;  %2711 = vadd.xlane.f32.xlu1 %v2685_v5  ;;  %v6209_v31 = vpop.f32.mrb[76].mxu0 }
 0x656   :  { %v2688_v14 = vmul.f32 %v6209_v31, %v9055_v39  ;;  %v2652_v63 = vpop.f32.mrb[77].mxu0  ;;  %6972 = vmatpush3.bf16.msra.mxu1 %v6969_v35 }
 0x657   :  { %v2687_v59 = vmul.f32 %v9055_v39, %v2652_v63  ;;  %v6973_v22 = vpack.c.bf16 %v6209_v31, %v2652_v63 }
 0x658   :  { %2717 = vadd.xlane.f32.xlu0 %v2688_v14 }
 0x659   :  { %6974 = vmatprep.subr.bf16.mxu1 %v6973_v22  ;;  %2715 = vadd.xlane.f32.xlu1 %v2687_v59  ;;  %v6212_v50 = vpop.f32.mrb[78].mxu0 }
 0x65a   :  { %v2690_v1 = vmul.f32 %v6212_v50, %v9055_v39  ;;  %v2662_v15 = vpop.f32.mrb[79].mxu0  ;;  %6976 = vmatpush3.bf16.msra.mxu1 %v6973_v22 }
 0x65b   :  { %v2689_v57 = vmul.f32 %v9055_v39, %v2662_v15  ;;  %v6977_v28 = vpack.c.bf16 %v6212_v50, %v2662_v15 }
 0x65c   :  { %2721 = vadd.xlane.f32.xlu0 %v2690_v1 }
 0x65d   :  { %6978 = vmatprep.subr.bf16.mxu1 %v6977_v28  ;;  %2719 = vadd.xlane.f32.xlu1 %v2689_v57 }
 0x65e   :  { %6980 = vmatpush3.bf16.msra.mxu1 %v6977_v28 }
 0x65f   :  { %6982 = vmatprep.subr.bf16.mxu1 %v8986_v42 }
 0x660   :  { %2270 = vadd.xlane.f32.xlu0 %v8994_v3 }
 0x664   :  { %2272 = vadd.xlane.f32.xlu0 %v8990_v52 }
 0x668   :  { %2274 = vadd.xlane.f32.xlu0 %v9004_v6 }
 0x66c   :  { %2276 = vadd.xlane.f32.xlu0 %v9000_v33 }
 0x670   :  { %2278 = vadd.xlane.f32.xlu0 %v9014_v19 }
 0x674   :  { %2280 = vadd.xlane.f32.xlu0 %v9010_v45 }
 0x678   :  { %2282 = vadd.xlane.f32.xlu0 %v9024_v60 }
 0x67c   :  { %2284 = vadd.xlane.f32.xlu0 %v9020_v41 }
 0x680   :  { %2286 = vadd.xlane.f32.xlu0 %v9034_v10 }
 0x684   :  { %2288 = vadd.xlane.f32.xlu0 %v9030_v48 }
 0x688   :  { %2290 = vadd.xlane.f32.xlu0 %v9044_v37 }
 0x68c   :  { %2292 = vadd.xlane.f32.xlu0 %v9040_v2 }
 0x690   :  { %2294 = vadd.xlane.f32.xlu0 %v9057_v54  ;;  %2052 = vxpose.xlu1.b32.start [1/16] (narrow) %v8984_v11, 8 }
 0x694   :  { %2296 = vadd.xlane.f32.xlu0 %v9050_v20  ;;  %2053 = vxpose.xlu1.b32.cont [2/16] (narrow) %v8982_v38, 8  ;;  %v9107_v38 = vpop.xlane.xlu0 %2268 }
 0x698   :  { %2054 = vxpose.xlu1.b32.cont [3/16] (narrow) %v8992_v36, 8 }
 0x69c   :  { %2055 = vxpose.xlu1.b32.cont [4/16] (narrow) %v8988_v23, 8 }
 0x6a0   :  { %2056 = vxpose.xlu1.b32.cont [5/16] (narrow) %v9002_v0, 8 }
 0x6a4   :  { %2057 = vxpose.xlu1.b32.cont [6/16] (narrow) %v8998_v13, 8  ;;  %v9114_v13 = vpop.xlane.xlu1 %2266 }
 0x6a8   :  { %2058 = vxpose.xlu1.b32.cont [7/16] (narrow) %v9012_v24, 8 }
 0x6ac   :  { %2059 = vxpose.xlu1.b32.cont [8/16] (narrow) %v9008_v30, 8 }
 0x6b0   :  { %2060 = vxpose.xlu1.b32.cont [9/16] (narrow) %v9022_v32, 8 }
 0x6b4   :  { %2061 = vxpose.xlu1.b32.cont [10/16] (narrow) %v9018_v4, 8 }
 0x6b8   :  { %2062 = vxpose.xlu1.b32.cont [11/16] (narrow) %v9032_v7, 8 }
 0x6bc   :  { %2063 = vxpose.xlu1.b32.cont [12/16] (narrow) %v9028_v53, 8 }
 0x6c0   :  { %2064 = vxpose.xlu1.b32.cont [13/16] (narrow) %v9042_v21, 8 }
 0x6c4   :  { %2065 = vxpose.xlu1.b32.cont [14/16] (narrow) %v9038_v44, 8 }
 0x6c8   :  { %2066 = vxpose.xlu1.b32.cont [15/16] (narrow) %v9052_v12, 8 }
 0x6cc   :  { %2067 = vxpose.xlu1.b32.end [16/16] (narrow) %v9048_v40, 8 }
 0x6cd   :  { %v2694_v11 = vpop.xlane.xlu0 %2693 }
 0x6ce   :  { %v2692_v0 = vpop.xlane.xlu1 %2691 }
 0x6d1   :  { %v2698_v23 = vpop.xlane.xlu0 %2697 }
 0x6d2   :  { %v2696_v30 = vpop.xlane.xlu1 %2695 }
 0x6d5   :  { %v2702_v52 = vpop.xlane.xlu0 %2701 }
 0x6d6   :  { %v2700_v19 = vpop.xlane.xlu1 %2699 }
 0x6d9   :  { %v9110_v36 = vpop.xlane.xlu0 %2705 }
 0x6da   :  { %v9126_v41 = vpop.xlane.xlu1 %2703 }
 0x6dd   :  { %v9112_v3 = vpop.xlane.xlu0 %2709 }
 0x6de   :  { %v9132_v53 = vpop.xlane.xlu1 %2707 }
 0x6e1   :  { %v9116_v33 = vpop.xlane.xlu0 %2713 }
 0x6e2   :  { %v9136_v7 = vpop.xlane.xlu1 %2711 }
 0x6e5   :  { %v9118_v6 = vpop.xlane.xlu0 %2717 }
 0x6e6   :  { %v9142_v2 = vpop.xlane.xlu1 %2715 }
 0x6e9   :  { %v9120_v45 = vpop.xlane.xlu0 %2721 }
 0x6ea   :  { %v2720_v37 = vpop.xlane.xlu1 %2719 }
 0x6ed   :  { %v9122_v24 = vpop.xlane.xlu0 %2270 }
 0x6f1   :  { %v9124_v4 = vpop.xlane.xlu0 %2272 }
 0x6f5   :  { %v9128_v32 = vpop.xlane.xlu0 %2274 }
 0x6f9   :  { %v9130_v60 = vpop.xlane.xlu0 %2276 }
 0x6fd   :  { %v9134_v48 = vpop.xlane.xlu0 %2278 }
 0x701   :  { %v9138_v10 = vpop.xlane.xlu0 %2280 }
 0x705   :  { %v9140_v44 = vpop.xlane.xlu0 %2282 }
 0x709   :  { %v2285_v21 = vpop.xlane.xlu0 %2284 }
 0x70d   :  { %v9144_v40 = vpop.xlane.xlu0 %2286 }
 0x710   :  { %v2068_v20 = vpop.trf.xlu1 }
 0x711   :  { %v9147_v12 = vrot.slane %v2068_v20, %v8026_v27  ;;  %v9150_v39 = vrot.slane %v2068_v20, %v10142_v16  ;;  %v2289_v54 = vpop.xlane.xlu0 %2288 }
 0x713   :  { %v2741_v47 = vadd.f32 %v9150_v39, %v2720_v37  ;;  %v2728_v5 = vadd.f32 %v9150_v39, %v2694_v11  ;;  %v2727_v35 = vadd.f32 %v9150_v39, %v2692_v0  ;;  %v2313_v31 = vadd.f32 %v9147_v12, %v2289_v54  ;;  %v9161_v0 = vld [vmem:[#allocation5 + $0x70] sm:$0xff] }
 0x714   :  { %v2311_v14 = vadd.f32 %v9147_v12, %v2285_v21  ;;  %v2730_v63 = vadd.f32 %v9150_v39, %v2698_v23  ;;  %v2729_v11 = vadd.f32 %v9150_v39, %v2696_v30  ;;  %v9166_v21 = vld [vmem:[#allocation5 + $0x8] sm:$0xff]  ;;  %v2735_v34 = vadd.f32 %v9150_v39, %v9132_v53 }
 0x715   :  { %v9158_v59 = vpop.xlane.xlu0 %2290  ;;  %v2757_v22 = vmul.f32 0.2, %v2741_v47  ;;  %v2744_v50 = vmul.f32 0.2, %v2728_v5  ;;  %v2743_v1 = vmul.f32 0.2, %v2727_v35  ;;  %v2738_v27 = vadd.f32 %v9150_v39, %v9116_v33 }
 0x716   :  { %v2327_v16 = vmul.f32 0.2, %v2311_v14  ;;  %v2329_v28 = vmul.f32 0.2, %v2313_v31  ;;  %v2746_v37 = vmul.f32 0.2, %v2730_v63  ;;  %v2737_v53 = vadd.f32 %v9150_v39, %v9136_v7 }
 0x717   :  { %v2773_v15 = vmax.f32 %v2741_v47, %v2757_v22  ;;  %v2760_v57 = vmax.f32 %v2728_v5, %v2744_v50  ;;  %v2759_v18 = vmax.f32 %v2727_v35, %v2743_v1  ;;  %v2745_v5 = vmul.f32 0.2, %v2729_v11  ;;  %v7789_v35 = vld [vmem:[#allocation5 + $0x48] sm:$0xff] }
 0x718   :  { %v2343_v8 = vmax.f32 %v2311_v14, %v2327_v16  ;;  %v2345_v30 = vmax.f32 %v2313_v31, %v2329_v28  ;;  %v2732_v22 = vadd.f32 %v9150_v39, %v2702_v52  ;;  %v2762_v1 = vmax.f32 %v2730_v63, %v2746_v37 }
 0x719   :  { %v2293_v20 = vpop.xlane.xlu0 %2292  ;;  %v9164_v54 = vadd.f32 %v9161_v0, %v2773_v15  ;;  %v9169_v23 = vadd.f32 %v9166_v21, %v2760_v57  ;;  %v9180_v57 = vadd.f32 %v9177_v17, %v2759_v18  ;;  %v2761_v31 = vmax.f32 %v2729_v11, %v2745_v5  ;;  %v7791_v18 = vld [vmem:[#allocation5 + $0x58] sm:$0xff]  ;;  %v9197_v11 = vld [vmem:[#allocation5 + $0x10] sm:$0xff] }
 0x71a   :  { %v2315_v47 = vadd.f32 %v9147_v12, %v2293_v20  ;;  %v9182_v14 = vadd.f32 %v7789_v35, %v2343_v8  ;;  %v2731_v16 = vadd.f32 %v9150_v39, %v2700_v19  ;;  %v9187_v20 = vld [vmem:[#allocation5 + $0x18] sm:$0xff]  ;;  %v9192_v51 = vadd.f32 %v7791_v18, %v2345_v30 }
 0x71b   :  { %2819 = vmax.xlane.f32.xlu1 %v9164_v54  ;;  %2793 = vmax.xlane.f32.xlu0 %v9169_v23  ;;  %v9190_v56 = vadd.f32 %v9187_v20, %v2762_v1  ;;  %v2748_v8 = vmul.f32 0.2, %v2732_v22  ;;  %v9200_v19 = vadd.f32 %v9197_v11, %v2761_v31  ;;  %v2734_v30 = vadd.f32 %v9150_v39, %v9110_v36  ;;  %v9219_v36 = vld [vmem:[#allocation5 + $0x20] sm:$0xff] }
 0x71c   :  { %v2331_v50 = vmul.f32 0.2, %v2315_v47  ;;  %v2747_v1 = vmul.f32 0.2, %v2731_v16  ;;  %v2740_v33 = vadd.f32 %v9150_v39, %v9118_v6  ;;  %v2739_v7 = vadd.f32 %v9150_v39, %v9142_v2 }
 0x71d   :  { %v9175_v15 = vpop.xlane.xlu0 %2294  ;;  %v2750_v25 = vmul.f32 0.2, %v2734_v30  ;;  %v2742_v6 = vadd.f32 %v9150_v39, %v9120_v45  ;;  %v2302_v2 = vadd.f32 %v9147_v12, %v9114_v13 }
 0x71e   :  { %v2347_v52 = vmax.f32 %v2315_v47, %v2331_v50  ;;  %v7793_v47 = vld [vmem:[#allocation5 + $0x68] sm:$0xff]  ;;  %v2764_v50 = vmax.f32 %v2732_v22, %v2748_v8  ;;  %v2733_v22 = vadd.f32 %v9150_v39, %v9126_v41 }
 0x71f   :  { %2791 = vmax.xlane.f32.xlu0 %v9180_v57  ;;  %2384 = vmax.xlane.f32.xlu1 %v9182_v14 }
 0x720   :  { %v9202_v5 = vadd.f32 %v7793_v47, %v2347_v52  ;;  %v9213_v31 = vadd.f32 %v9210_v49, %v2764_v50  ;;  %v2763_v52 = vmax.f32 %v2731_v16, %v2747_v1  ;;  %v9227_v16 = vld [vmem:[#allocation5 + $0x38] sm:$0xff] }
 0x721   :  { %v2297_v28 = vpop.xlane.xlu0 %2296 }
 0x722   :  { %v2317_v63 = vadd.f32 %v9147_v12, %v2297_v28  ;;  %v7794_v28 = vld [vmem:[#allocation5 + $0x78] sm:$0xff]  ;;  %v9222_v8 = vadd.f32 %v9219_v36, %v2763_v52  ;;  %v9235_v52 = vld [vmem:[#allocation5 + $0x30] sm:$0xff] }
 0x723   :  { %2797 = vmax.xlane.f32.xlu0 %v9190_v56  ;;  %2388 = vmax.xlane.f32.xlu1 %v9192_v51 }
 0x724   :  { %v2333_v37 = vmul.f32 0.2, %v2317_v63 }
 0x726   :  { %v2349_v26 = vmax.f32 %v2317_v63, %v2333_v37  ;;  %v2749_v63 = vmul.f32 0.2, %v2733_v22  ;;  %v2736_v37 = vadd.f32 %v9150_v39, %v9112_v3 }
 0x727   :  { %2795 = vmax.xlane.f32.xlu0 %v9200_v19  ;;  %2392 = vmax.xlane.f32.xlu1 %v9202_v5 }
 0x728   :  { %v9208_v43 = vadd.f32 %v7794_v28, %v2349_v26  ;;  %v2766_v26 = vmax.f32 %v2734_v30, %v2750_v25  ;;  %v2765_v50 = vmax.f32 %v2733_v22, %v2749_v63  ;;  %v2752_v1 = vmul.f32 0.2, %v2736_v37 }
 0x729   :  { %v2751_v30 = vmul.f32 0.2, %v2735_v34  ;;  %v2754_v63 = vmul.f32 0.2, %v2738_v27 }
 0x72a   :  { %v9230_v41 = vadd.f32 %v9227_v16, %v2766_v26  ;;  %v9238_v25 = vadd.f32 %v9235_v52, %v2765_v50  ;;  %v2768_v3 = vmax.f32 %v2736_v37, %v2752_v1  ;;  %v2753_v1 = vmul.f32 0.2, %v2737_v53 }
 0x72b   :  { %2801 = vmax.xlane.f32.xlu0 %v9213_v31  ;;  %2396 = vmax.xlane.f32.xlu1 %v9208_v43  ;;  %v2767_v22 = vmax.f32 %v2735_v34, %v2751_v30  ;;  %v2770_v37 = vmax.f32 %v2738_v27, %v2754_v63  ;;  %v9261_v30 = vld [vmem:[#allocation5 + $0x50] sm:$0xff]  ;;  %v2755_v63 = vmul.f32 0.2, %v2739_v7 }
 0x72c   :  { %v9243_v26 = vadd.f32 %v7789_v35, %v2768_v3  ;;  %v2769_v34 = vmax.f32 %v2737_v53, %v2753_v1  ;;  %v2756_v3 = vmul.f32 0.2, %v2740_v33  ;;  %v7801_v1 = vld [vmem:[#allocation5 + $0x60] sm:$0xff] }
 0x72d   :  { %v9251_v50 = vadd.f32 %v9248_v62, %v2767_v22  ;;  %v9256_v35 = vadd.f32 %v7791_v18, %v2770_v37  ;;  %v2771_v53 = vmax.f32 %v2739_v7, %v2755_v63  ;;  %v2758_v37 = vmul.f32 0.2, %v2742_v6 }
 0x72e   :  { %v9264_v22 = vadd.f32 %v9261_v30, %v2769_v34  ;;  %v2772_v27 = vmax.f32 %v2740_v33, %v2756_v3  ;;  %v2318_v33 = vmul.f32 0.2, %v2302_v2  ;;  %v2303_v3 = vadd.f32 %v9147_v12, %v9107_v38 }
 0x72f   :  { %2799 = vmax.xlane.f32.xlu0 %v9222_v8  ;;  %v9274_v9 = vadd.f32 %v7801_v1, %v2771_v53  ;;  %v2774_v34 = vmax.f32 %v2742_v6, %v2758_v37  ;;  %v2304_v7 = vadd.f32 %v9147_v12, %v9122_v24  ;;  %v2305_v6 = vadd.f32 %v9147_v12, %v9124_v4 }
 0x730   :  { %v9269_v18 = vadd.f32 %v7793_v47, %v2772_v27  ;;  %v2334_v39 = vmax.f32 %v2302_v2, %v2318_v33  ;;  %v2319_v47 = vmul.f32 0.2, %v2303_v3  ;;  %v2306_v24 = vadd.f32 %v9147_v12, %v9128_v32 }
 0x731   :  { %v9279_v45 = vadd.f32 %v7794_v28, %v2774_v34  ;;  %v2320_v63 = vmul.f32 0.2, %v2304_v7  ;;  %v2321_v53 = vmul.f32 0.2, %v2305_v6  ;;  %v2307_v4 = vadd.f32 %v9147_v12, %v9130_v60 }
 0x732   :  { %v9285_v13 = vadd.f32 %v9177_v17, %v2334_v39  ;;  %v2335_v27 = vmax.f32 %v2303_v3, %v2319_v47  ;;  %v2322_v2 = vmul.f32 0.2, %v2306_v24  ;;  %v2308_v32 = vadd.f32 %v9147_v12, %v9134_v48 }
 0x733   :  { %2805 = vmax.xlane.f32.xlu0 %v9230_v41  ;;  %v2336_v28 = vmax.f32 %v2304_v7, %v2320_v63  ;;  %v2337_v37 = vmax.f32 %v2305_v6, %v2321_v53  ;;  %v2323_v33 = vmul.f32 0.2, %v2307_v4  ;;  %v2309_v60 = vadd.f32 %v9147_v12, %v9138_v10 }
 0x734   :  { %v9291_v38 = vadd.f32 %v9166_v21, %v2335_v27  ;;  %v2338_v34 = vmax.f32 %v2306_v24, %v2322_v2  ;;  %v2324_v39 = vmul.f32 0.2, %v2308_v32  ;;  %v2310_v48 = vadd.f32 %v9147_v12, %v9140_v44 }
 0x735   :  { %v9297_v17 = vadd.f32 %v9197_v11, %v2336_v28  ;;  %v9303_v21 = vadd.f32 %v9187_v20, %v2337_v37  ;;  %v2339_v3 = vmax.f32 %v2307_v4, %v2323_v33  ;;  %v2325_v7 = vmul.f32 0.2, %v2309_v60 }
 0x736   :  { %v9309_v11 = vadd.f32 %v9219_v36, %v2338_v34  ;;  %v2340_v47 = vmax.f32 %v2308_v32, %v2324_v39  ;;  %v2326_v63 = vmul.f32 0.2, %v2310_v48  ;;  %v2312_v10 = vadd.f32 %v9147_v12, %v9144_v40 }
 0x737   :  { %2803 = vmax.xlane.f32.xlu0 %v9238_v25  ;;  %v9315_v20 = vadd.f32 %v9210_v49, %v2339_v3  ;;  %v2341_v27 = vmax.f32 %v2309_v60, %v2325_v7  ;;  %v2314_v49 = vadd.f32 %v9147_v12, %v9158_v59 }
 0x738   :  { %v9321_v36 = vadd.f32 %v9235_v52, %v2340_v47  ;;  %v2342_v28 = vmax.f32 %v2310_v48, %v2326_v63  ;;  %v2328_v44 = vmul.f32 0.2, %v2312_v10  ;;  %v2316_v52 = vadd.f32 %v9147_v12, %v9175_v15 }
 0x739   :  { %v9329_v6 = vadd.f32 %v9227_v16, %v2341_v27  ;;  %v2330_v53 = vmul.f32 0.2, %v2314_v49 }
 0x73a   :  { %v9335_v24 = vadd.f32 %v9248_v62, %v2342_v28  ;;  %v2344_v40 = vmax.f32 %v2312_v10, %v2328_v44  ;;  %v2332_v2 = vmul.f32 0.2, %v2316_v52 }
 0x73b   :  { %2809 = vmax.xlane.f32.xlu0 %v9243_v26  ;;  %v2346_v37 = vmax.f32 %v2314_v49, %v2330_v53 }
 0x73c   :  { %v9339_v59 = vadd.f32 %v9261_v30, %v2344_v40  ;;  %v2348_v16 = vmax.f32 %v2316_v52, %v2332_v2 }
 0x73d   :  { %v9342_v4 = vadd.f32 %v7801_v1, %v2346_v37 }
 0x73e   :  { %v9346_v12 = vadd.f32 %v9161_v0, %v2348_v16 }
 0x73f   :  { %2807 = vmax.xlane.f32.xlu0 %v9251_v50 }
 0x743   :  { %2813 = vmax.xlane.f32.xlu0 %v9256_v35 }
 0x747   :  { %2811 = vmax.xlane.f32.xlu0 %v9264_v22 }
 0x74b   :  { %2817 = vmax.xlane.f32.xlu0 %v9269_v18 }
 0x74f   :  { %2815 = vmax.xlane.f32.xlu0 %v9274_v9 }
 0x753   :  { %2821 = vmax.xlane.f32.xlu0 %v9279_v45 }
 0x757   :  { %2366 = vmax.xlane.f32.xlu0 %v9285_v13 }
 0x75b   :  { %2368 = vmax.xlane.f32.xlu0 %v9291_v38 }
 0x75f   :  { %2370 = vmax.xlane.f32.xlu0 %v9297_v17 }
 0x763   :  { %2372 = vmax.xlane.f32.xlu0 %v9303_v21 }
 0x767   :  { %2374 = vmax.xlane.f32.xlu0 %v9309_v11 }
 0x76b   :  { %2376 = vmax.xlane.f32.xlu0 %v9315_v20 }
 0x76f   :  { %2378 = vmax.xlane.f32.xlu0 %v9321_v36 }
 0x773   :  { %2380 = vmax.xlane.f32.xlu0 %v9329_v6 }
 0x777   :  { %2382 = vmax.xlane.f32.xlu0 %v9335_v24 }
 0x77b   :  { %2386 = vmax.xlane.f32.xlu0 %v9339_v59 }
 0x77f   :  { %2390 = vmax.xlane.f32.xlu0 %v9342_v4 }
 0x783   :  { %2394 = vmax.xlane.f32.xlu0 %v9346_v12 }
 0x7a8   :  { %v2794_v62 = vpop.xlane.xlu0 %2793 }
 0x7a9   :  { %v2824_v15 = vsub.f32 %v9169_v23, %v2794_v62 }
 0x7ab   :  { %v2841_v34 = vmul.f32 1.442695, %v2824_v15 }
 0x7ac   :  { %v2792_v33 = vpop.xlane.xlu0 %2791 }
 0x7ad   :  { %v2823_v30 = vsub.f32 %v9180_v57, %v2792_v33  ;;  %7419 = vpow2.f32 %v2841_v34 }
 0x7af   :  { %v2839_v32 = vmul.f32 1.442695, %v2823_v30 }
 0x7b0   :  { %v2798_v3 = vpop.xlane.xlu0 %2797 }
 0x7b1   :  { %7421 = vpow2.f32 %v2839_v32  ;;  %v2826_v1 = vsub.f32 %v9190_v56, %v2798_v3 }
 0x7b3   :  { %v2845_v39 = vmul.f32 1.442695, %v2826_v1 }
 0x7b4   :  { %v2796_v60 = vpop.xlane.xlu0 %2795 }
 0x7b5   :  { %7423 = vpow2.f32 %v2845_v39  ;;  %v2825_v0 = vsub.f32 %v9200_v19, %v2796_v60 }
 0x7b7   :  { %v2843_v47 = vmul.f32 1.442695, %v2825_v0  ;;  %v9353_v7 = vpop.eup %7419  ;;  %v2820_v0 = vpop.xlane.xlu1 %2819 }
 0x7b8   :  { %v2802_v48 = vpop.xlane.xlu0 %2801  ;;  %2873 = vadd.xlane.f32.xlu1 %v9353_v7 }
 0x7b9   :  { %7425 = vpow2.f32 %v2843_v47  ;;  %v2828_v23 = vsub.f32 %v9213_v31, %v2802_v48 }
 0x7bb   :  { %v9357_v57 = vpop.eup %7421  ;;  %v2849_v27 = vmul.f32 1.442695, %v2828_v23  ;;  %v2837_v23 = vsub.f32 %v9164_v54, %v2820_v0 }
 0x7bc   :  { %v2800_v63 = vpop.xlane.xlu0 %2799  ;;  %2871 = vadd.xlane.f32.xlu0 %v9357_v57 }
 0x7bd   :  { %7427 = vpow2.f32 %v2849_v27  ;;  %v2827_v56 = vsub.f32 %v9222_v8, %v2800_v63 }
 0x7bf   :  { %v9361_v10 = vpop.eup %7423  ;;  %v2847_v19 = vmul.f32 1.442695, %v2827_v56 }
 0x7c0   :  { %v2806_v49 = vpop.xlane.xlu0 %2805  ;;  %2877 = vadd.xlane.f32.xlu1 %v9361_v10 }
 0x7c1   :  { %7429 = vpow2.f32 %v2847_v19  ;;  %v2830_v31 = vsub.f32 %v9230_v41, %v2806_v49  ;;  %v2867_v19 = vmul.f32 1.442695, %v2837_v23 }
 0x7c3   :  { %v9365_v28 = vpop.eup %7425  ;;  %v2853_v44 = vmul.f32 1.442695, %v2830_v31 }
 0x7c4   :  { %v2804_v53 = vpop.xlane.xlu0 %2803  ;;  %2875 = vadd.xlane.f32.xlu0 %v9365_v28 }
 0x7c5   :  { %7431 = vpow2.f32 %v2853_v44  ;;  %v2829_v52 = vsub.f32 %v9238_v25, %v2804_v53 }
 0x7c7   :  { %v9369_v40 = vpop.eup %7427  ;;  %v2851_v8 = vmul.f32 1.442695, %v2829_v52 }
 0x7c8   :  { %v2810_v37 = vpop.xlane.xlu0 %2809  ;;  %2881 = vadd.xlane.f32.xlu1 %v9369_v40 }
 0x7c9   :  { %7433 = vpow2.f32 %v2851_v8  ;;  %v2832_v2 = vsub.f32 %v9243_v26, %v2810_v37 }
 0x7cb   :  { %v9373_v16 = vpop.eup %7429  ;;  %v2857_v41 = vmul.f32 1.442695, %v2832_v2 }
 0x7cc   :  { %v2808_v62 = vpop.xlane.xlu0 %2807  ;;  %2879 = vadd.xlane.f32.xlu0 %v9373_v16 }
 0x7cd   :  { %7435 = vpow2.f32 %v2857_v41  ;;  %v2831_v15 = vsub.f32 %v9251_v50, %v2808_v62 }
 0x7cf   :  { %v9377_v34 = vpop.eup %7431  ;;  %v2855_v25 = vmul.f32 1.442695, %v2831_v15 }
 0x7d0   :  { %v2814_v33 = vpop.xlane.xlu0 %2813  ;;  %2885 = vadd.xlane.f32.xlu1 %v9377_v34 }
 0x7d1   :  { %7437 = vpow2.f32 %v2855_v25  ;;  %v2834_v30 = vsub.f32 %v9256_v35, %v2814_v33 }
 0x7d3   :  { %v9381_v32 = vpop.eup %7433  ;;  %v2861_v26 = vmul.f32 1.442695, %v2834_v30 }
 0x7d4   :  { %v2812_v3 = vpop.xlane.xlu0 %2811  ;;  %2883 = vadd.xlane.f32.xlu0 %v9381_v32 }
 0x7d5   :  { %7439 = vpow2.f32 %v2861_v26  ;;  %v2833_v1 = vsub.f32 %v9264_v22, %v2812_v3 }
 0x7d7   :  { %v9385_v39 = vpop.eup %7435  ;;  %v2859_v50 = vmul.f32 1.442695, %v2833_v1 }
 0x7d8   :  { %v2818_v60 = vpop.xlane.xlu0 %2817  ;;  %2889 = vadd.xlane.f32.xlu1 %v9385_v39 }
 0x7d9   :  { %7441 = vpow2.f32 %v2859_v50  ;;  %v2836_v47 = vsub.f32 %v9269_v18, %v2818_v60  ;;  %v2385_v50 = vpop.xlane.xlu1 %2384 }
 0x7db   :  { %v9389_v35 = vpop.eup %7437  ;;  %v2865_v48 = vmul.f32 1.442695, %v2836_v47 }
 0x7dc   :  { %v2816_v27 = vpop.xlane.xlu0 %2815  ;;  %2887 = vadd.xlane.f32.xlu0 %v9389_v35 }
 0x7dd   :  { %7443 = vpow2.f32 %v2865_v48  ;;  %v2835_v22 = vsub.f32 %v9274_v9, %v2816_v27  ;;  %v2389_v27 = vpop.xlane.xlu1 %2388 }
 0x7df   :  { %v9394_v63 = vpop.eup %7439  ;;  %v2863_v56 = vmul.f32 1.442695, %v2835_v22 }
 0x7e0   :  { %v2822_v49 = vpop.xlane.xlu0 %2821  ;;  %2893 = vadd.xlane.f32.xlu1 %v9394_v63 }
 0x7e1   :  { %7445 = vpow2.f32 %v2863_v56  ;;  %v2838_v18 = vsub.f32 %v9279_v45, %v2822_v49 }
 0x7e2   :  { %7447 = vpow2.f32 %v2867_v19  ;;  %v2407_v19 = vsub.f32 %v9182_v14, %v2385_v50 }
 0x7e3   :  { %v9398_v31 = vpop.eup %7441  ;;  %v2869_v44 = vmul.f32 1.442695, %v2838_v18 }
 0x7e4   :  { %2891 = vadd.xlane.f32.xlu0 %v9398_v31  ;;  %v2367_v54 = vpop.xlane.xlu0 %2366 }
 0x7e5   :  { %7449 = vpow2.f32 %v2869_v44  ;;  %v2398_v9 = vsub.f32 %v9285_v13, %v2367_v54  ;;  %v2393_v44 = vpop.xlane.xlu1 %2392 }
 0x7e7   :  { %v9402_v53 = vpop.eup %7443  ;;  %v2414_v52 = vmul.f32 1.442695, %v2398_v9  ;;  %v2432_v9 = vmul.f32 1.442695, %v2407_v19 }
 0x7e8   :  { %2897 = vadd.xlane.f32.xlu1 %v9402_v53  ;;  %v2369_v8 = vpop.xlane.xlu0 %2368 }
 0x7e9   :  { %7451 = vpow2.f32 %v2414_v52  ;;  %v2399_v37 = vsub.f32 %v9291_v38, %v2369_v8  ;;  %v2409_v52 = vsub.f32 %v9192_v51, %v2389_v27 }
 0x7eb   :  { %v9406_v45 = vpop.eup %7445  ;;  %v2416_v2 = vmul.f32 1.442695, %v2399_v37 }
 0x7ec   :  { %2895 = vadd.xlane.f32.xlu0 %v9406_v45  ;;  %v2371_v41 = vpop.xlane.xlu0 %2370  ;;  %v9410_v15 = vpop.eup %7447 }
 0x7ed   :  { %7453 = vpow2.f32 %v2416_v2  ;;  %v2400_v62 = vsub.f32 %v9297_v17, %v2371_v41  ;;  %v2436_v2 = vmul.f32 1.442695, %v2409_v52 }
 0x7ef   :  { %v9412_v13 = vpop.eup %7449  ;;  %v2418_v25 = vmul.f32 1.442695, %v2400_v62  ;;  %v2397_v62 = vpop.xlane.xlu1 %2396 }
 0x7f0   :  { %2901 = vadd.xlane.f32.xlu1 %v9412_v13  ;;  %2899 = vadd.xlane.f32.xlu0 %v9410_v15  ;;  %v2373_v33 = vpop.xlane.xlu0 %2372 }
 0x7f1   :  { %7455 = vpow2.f32 %v2418_v25  ;;  %v2401_v38 = vsub.f32 %v9303_v21, %v2373_v33 }
 0x7f3   :  { %v9417_v30 = vpop.eup %7451  ;;  %v2420_v26 = vmul.f32 1.442695, %v2401_v38 }
 0x7f4   :  { %2446 = vadd.xlane.f32.xlu0 %v9417_v30  ;;  %v2375_v3 = vpop.xlane.xlu0 %2374 }
 0x7f5   :  { %7457 = vpow2.f32 %v2420_v26  ;;  %v2402_v17 = vsub.f32 %v9309_v11, %v2375_v3 }
 0x7f7   :  { %v9421_v1 = vpop.eup %7453  ;;  %v2422_v60 = vmul.f32 1.442695, %v2402_v17 }
 0x7f8   :  { %2448 = vadd.xlane.f32.xlu1 %v9421_v1  ;;  %v2377_v0 = vpop.xlane.xlu0 %2376 }
 0x7f9   :  { %7459 = vpow2.f32 %v2422_v60  ;;  %v2403_v47 = vsub.f32 %v9315_v20, %v2377_v0 }
 0x7fb   :  { %v9425_v21 = vpop.eup %7455  ;;  %v2424_v48 = vmul.f32 1.442695, %v2403_v47 }
 0x7fc   :  { %2450 = vadd.xlane.f32.xlu0 %v9425_v21  ;;  %v2379_v23 = vpop.xlane.xlu0 %2378 }
 0x7fd   :  { %7461 = vpow2.f32 %v2424_v48  ;;  %v2404_v11 = vsub.f32 %v9321_v36, %v2379_v23 }
 0x7ff   :  { %v9429_v22 = vpop.eup %7457  ;;  %v2426_v56 = vmul.f32 1.442695, %v2404_v11 }
 0x800   :  { %2452 = vadd.xlane.f32.xlu1 %v9429_v22  ;;  %v2381_v49 = vpop.xlane.xlu0 %2380 }
 0x801   :  { %7463 = vpow2.f32 %v2426_v56  ;;  %v2405_v20 = vsub.f32 %v9329_v6, %v2381_v49  ;;  %v2411_v6 = vsub.f32 %v9202_v5, %v2393_v44 }
 0x803   :  { %v9434_v18 = vpop.eup %7459  ;;  %v2428_v54 = vmul.f32 1.442695, %v2405_v20  ;;  %v2440_v38 = vmul.f32 1.442695, %v2411_v6 }
 0x804   :  { %2454 = vadd.xlane.f32.xlu0 %v9434_v18  ;;  %v2383_v36 = vpop.xlane.xlu0 %2382 }
 0x805   :  { %7465 = vpow2.f32 %v2428_v54  ;;  %v2406_v8 = vsub.f32 %v9335_v24, %v2383_v36  ;;  %v2413_v24 = vsub.f32 %v9208_v43, %v2397_v62 }
 0x806   :  { %7467 = vpow2.f32 %v2432_v9 }
 0x807   :  { %v9439_v14 = vpop.eup %7461  ;;  %v2430_v37 = vmul.f32 1.442695, %v2406_v8  ;;  %v2444_v50 = vmul.f32 1.442695, %v2413_v24  ;;  %v10145_v24 = vld [vmem:[#allocation13_spill] sm:$0xff] }
 0x808   :  { %2456 = vadd.xlane.f32.xlu1 %v9439_v14  ;;  %v2387_v41 = vpop.xlane.xlu0 %2386 }
 0x809   :  { %7469 = vpow2.f32 %v2430_v37  ;;  %v2408_v51 = vsub.f32 %v9339_v59, %v2387_v41 }
 0x80a   :  { %7471 = vpow2.f32 %v2436_v2 }
 0x80b   :  { %v9444_v25 = vpop.eup %7463  ;;  %v2434_v33 = vmul.f32 1.442695, %v2408_v51 }
 0x80c   :  { %2458 = vadd.xlane.f32.xlu0 %v9444_v25  ;;  %v2391_v26 = vpop.xlane.xlu0 %2390 }
 0x80d   :  { %7473 = vpow2.f32 %v2434_v33  ;;  %v2410_v5 = vsub.f32 %v9342_v4, %v2391_v26 }
 0x80e   :  { %7475 = vpow2.f32 %v2440_v38  ;;  %v10144_v38 = vld [vmem:[#allocation30_spill] sm:$0xff] }
 0x80f   :  { %v9449_v3 = vpop.eup %7465  ;;  %v2438_v17 = vmul.f32 1.442695, %v2410_v5 }
 0x810   :  { %2460 = vadd.xlane.f32.xlu1 %v9449_v3  ;;  %v2395_v59 = vpop.xlane.xlu0 %2394  ;;  %v9453_v0 = vpop.eup %7467 }
 0x811   :  { %7477 = vpow2.f32 %v2438_v17  ;;  %v2412_v60 = vsub.f32 %v9346_v12, %v2395_v59 }
 0x812   :  { %7479 = vpow2.f32 %v2444_v50 }
 0x813   :  { %v9455_v43 = vpop.eup %7469  ;;  %v2442_v47 = vmul.f32 1.442695, %v2412_v60 }
 0x814   :  { %2464 = vadd.xlane.f32.xlu1 %v9453_v0  ;;  %2462 = vadd.xlane.f32.xlu0 %v9455_v43  ;;  %v9459_v4 = vpop.eup %7471 }
 0x815   :  { %7481 = vpow2.f32 %v2442_v47 }
 0x817   :  { %v9461_v48 = vpop.eup %7473 }
 0x818   :  { %2468 = vadd.xlane.f32.xlu1 %v9459_v4  ;;  %2466 = vadd.xlane.f32.xlu0 %v9461_v48  ;;  %v9465_v12 = vpop.eup %7475 }
 0x81b   :  { %v9467_v23 = vpop.eup %7477 }
 0x81c   :  { %2472 = vadd.xlane.f32.xlu1 %v9465_v12  ;;  %2470 = vadd.xlane.f32.xlu0 %v9467_v23  ;;  %v9471_v27 = vpop.eup %7479 }
 0x81f   :  { %v9473_v11 = vpop.eup %7481 }
 0x820   :  { %2476 = vadd.xlane.f32.xlu1 %v9471_v27  ;;  %2474 = vadd.xlane.f32.xlu0 %v9473_v11 }
 0x845   :  { %v2874_v56 = vpop.xlane.xlu1 %2873 }
 0x846   :  { %7483 = vrcp.f32 %v2874_v56 }
 0x849   :  { %v2872_v19 = vpop.xlane.xlu0 %2871 }
 0x84a   :  { %7485 = vrcp.f32 %v2872_v19 }
 0x84d   :  { %v2878_v49 = vpop.xlane.xlu1 %2877 }
 0x84e   :  { %7487 = vrcp.f32 %v2878_v49 }
 0x850   :  { %v7484_v44 = vpop.eup %7483 }
 0x851   :  { %v2876_v20 = vpop.xlane.xlu0 %2875  ;;  %v2906_v36 = vmul.f32 %v7484_v44, %v9353_v7 }
 0x852   :  { %7489 = vrcp.f32 %v2876_v20 }
 0x854   :  { %v7486_v54 = vpop.eup %7485 }
 0x855   :  { %v2904_v9 = vmul.f32 %v7486_v54, %v9357_v57  ;;  %v2882_v52 = vpop.xlane.xlu1 %2881 }
 0x856   :  { %7491 = vrcp.f32 %v2882_v52 }
 0x857   :  { %6245 = vmatprep.mubr.f32.mxu1 %v2904_v9 }
 0x858   :  { %6246 = vmatmul.mubr.f32.vlgmr.msra.gmra.mrb[48].mxu1 %v2906_v36  ;;  %v7488_v37 = vpop.eup %7487 }
 0x859   :  { %6984 = vmatpush3.bf16.msra.mxu1 %v8986_v42  ;;  %v2880_v8 = vpop.xlane.xlu0 %2879  ;;  %v2910_v7 = vmul.f32 %v7488_v37, %v9361_v10 }
 0x85a   :  { %6986 = vmatprep.subr.bf16.mxu1 %v8996_v58  ;;  %7493 = vrcp.f32 %v2880_v8 }
 0x85c   :  { %v7490_v2 = vpop.eup %7489 }
 0x85d   :  { %6988 = vmatpush3.bf16.msra.mxu1 %v8996_v58  ;;  %v2908_v6 = vmul.f32 %v7490_v2, %v9365_v28  ;;  %v2886_v41 = vpop.xlane.xlu1 %2885 }
 0x85e   :  { %6990 = vmatprep.subr.bf16.mxu1 %v9006_v29  ;;  %7495 = vrcp.f32 %v2886_v41 }
 0x85f   :  { %6248 = vmatprep.mubr.f32.mxu1 %v2908_v6 }
 0x860   :  { %6249 = vmatmul.mubr.f32.gmra.mrb[50].mxu1 %v2910_v7  ;;  %v7492_v57 = vpop.eup %7491 }
 0x861   :  { %6992 = vmatpush3.bf16.msra.mxu1 %v9006_v29  ;;  %v2884_v42 = vpop.xlane.xlu0 %2883  ;;  %v2914_v10 = vmul.f32 %v7492_v57, %v9369_v40 }
 0x862   :  { %6994 = vmatprep.subr.bf16.mxu1 %v9016_v55  ;;  %7497 = vrcp.f32 %v2884_v42 }
 0x864   :  { %v7494_v62 = vpop.eup %7493 }
 0x865   :  { %6996 = vmatpush3.bf16.msra.mxu1 %v9016_v55  ;;  %v2912_v58 = vmul.f32 %v7494_v62, %v9373_v16  ;;  %v2890_v28 = vpop.xlane.xlu1 %2889 }
 0x866   :  { %6998 = vmatprep.subr.bf16.mxu1 %v9026_v46  ;;  %7499 = vrcp.f32 %v2890_v28 }
 0x867   :  { %6251 = vmatprep.mubr.f32.mxu1 %v2912_v58 }
 0x868   :  { %6252 = vmatmul.mubr.f32.gmra.mrb[52].mxu1 %v2914_v10  ;;  %v7496_v51 = vpop.eup %7495 }
 0x869   :  { %7000 = vmatpush3.bf16.msra.mxu1 %v9026_v46  ;;  %v2888_v29 = vpop.xlane.xlu0 %2887  ;;  %v2918_v40 = vmul.f32 %v7496_v51, %v9377_v34 }
 0x86a   :  { %7002 = vmatprep.subr.bf16.mxu1 %v9036_v61  ;;  %7501 = vrcp.f32 %v2888_v29 }
 0x86c   :  { %v7498_v33 = vpop.eup %7497 }
 0x86d   :  { %7004 = vmatpush3.bf16.msra.mxu1 %v9036_v61  ;;  %v2916_v55 = vmul.f32 %v7498_v33, %v9381_v32  ;;  %v2894_v16 = vpop.xlane.xlu1 %2893 }
 0x86e   :  { %7006 = vmatprep.subr.bf16.mxu1 %v10144_v38  ;;  %7503 = vrcp.f32 %v2894_v16 }
 0x86f   :  { %6254 = vmatprep.mubr.f32.mxu1 %v2916_v55 }
 0x870   :  { %6255 = vmatmul.mubr.f32.gmra.mrb[54].mxu1 %v2918_v40  ;;  %v7500_v26 = vpop.eup %7499 }
 0x871   :  { %7008 = vmatpush3.bf16.msra.mxu1 %v10144_v38  ;;  %v2892_v46 = vpop.xlane.xlu0 %2891  ;;  %v2922_v17 = vmul.f32 %v7500_v26, %v9385_v39 }
 0x872   :  { %7010 = vmatprep.subr.bf16.mxu1 %v10145_v24  ;;  %7505 = vrcp.f32 %v2892_v46 }
 0x874   :  { %v7502_v5 = vpop.eup %7501 }
 0x875   :  { %7012 = vmatpush3.bf16.msra.mxu1 %v10145_v24  ;;  %v2920_v61 = vmul.f32 %v7502_v5, %v9389_v35  ;;  %v2898_v32 = vpop.xlane.xlu1 %2897 }
 0x876   :  { %7507 = vrcp.f32 %v2898_v32 }
 0x877   :  { %6257 = vmatprep.mubr.f32.mxu1 %v2920_v61 }
 0x878   :  { %6258 = vmatmul.mubr.f32.gmra.mrb[56].mxu1 %v2922_v17  ;;  %v7504_v50 = vpop.eup %7503 }
 0x879   :  { %v2896_v34 = vpop.xlane.xlu0 %2895  ;;  %v2926_v19 = vmul.f32 %v7504_v50, %v9394_v63 }
 0x87a   :  { %7509 = vrcp.f32 %v2896_v34 }
 0x87c   :  { %v7506_v59 = vpop.eup %7505 }
 0x87d   :  { %v2902_v60 = vpop.xlane.xlu1 %2901  ;;  %v2900_v47 = vpop.xlane.xlu0 %2899  ;;  %v2924_v56 = vmul.f32 %v7506_v59, %v9398_v31 }
 0x87e   :  { %7511 = vrcp.f32 %v2902_v60 }
 0x87f   :  { %7513 = vrcp.f32 %v2900_v47  ;;  %6260 = vmatprep.mubr.f32.mxu1 %v2924_v56 }
 0x880   :  { %6261 = vmatmul.mubr.f32.gmra.mrb[58].mxu1 %v2926_v19  ;;  %v7508_v39 = vpop.eup %7507  ;;  %v3241_v19 = vld [vmem:[#allocation7 + $0x3b0] sm:$0xff] }
 0x881   :  { %v2447_v35 = vpop.xlane.xlu0 %2446  ;;  %v2930_v54 = vmul.f32 %v7508_v39, %v9402_v53 }
 0x882   :  { %7515 = vrcp.f32 %v2447_v35  ;;  %v10146_v35 = vld [vmem:[#allocation12_spill] sm:$0xff] }
 0x884   :  { %v7510_v49 = vpop.eup %7509 }
 0x885   :  { %v2449_v20 = vpop.xlane.xlu1 %2448  ;;  %v2928_v44 = vmul.f32 %v7510_v49, %v9406_v45 }
 0x886   :  { %7517 = vrcp.f32 %v2449_v20 }
 0x887   :  { %6263 = vmatprep.mubr.f32.mxu1 %v2928_v44 }
 0x888   :  { %v7512_v9 = vpop.eup %7511  ;;  %6264 = vmatmul.mubr.f32.gmra.mrb[60].mxu1 %v2930_v54 }
 0x889   :  { %v7514_v31 = vpop.eup %7513  ;;  %v2451_v52 = vpop.xlane.xlu0 %2450  ;;  %v2934_v63 = vmul.f32 %v7512_v9, %v9412_v13 }
 0x88a   :  { %7519 = vrcp.f32 %v2451_v52  ;;  %v2932_v36 = vmul.f32 %v7514_v31, %v9410_v15 }
 0x88c   :  { %v7516_v8 = vpop.eup %7515  ;;  %6266 = vmatprep.mubr.f32.mxu1 %v2932_v36 }
 0x88d   :  { %6267 = vmatmul.mubr.f32.gmra.mrb[62].mxu1 %v2934_v63  ;;  %v2453_v37 = vpop.xlane.xlu1 %2452  ;;  %v2479_v2 = vmul.f32 %v7516_v8, %v9417_v30 }
 0x88e   :  { %7521 = vrcp.f32 %v2453_v37 }
 0x88f   :  { %6301 = vmatprep.mubr.f32.mxu1 %v2479_v2 }
 0x890   :  { %v7518_v45 = vpop.eup %7517 }
 0x891   :  { %v2455_v53 = vpop.xlane.xlu0 %2454  ;;  %v2481_v6 = vmul.f32 %v7518_v45, %v9421_v1 }
 0x892   :  { %7523 = vrcp.f32 %v2455_v53 }
 0x893   :  { %6302 = vmatmul.mubr.f32.vlgmr.msra.gmra.mrb[48].mxu1 %v2481_v6 }
 0x894   :  { %v7520_v41 = vpop.eup %7519 }
 0x895   :  { %v2457_v7 = vpop.xlane.xlu1 %2456  ;;  %v2483_v13 = vmul.f32 %v7520_v41, %v9425_v21 }
 0x896   :  { %7525 = vrcp.f32 %v2457_v7 }
 0x897   :  { %6304 = vmatprep.mubr.f32.mxu1 %v2483_v13 }
 0x898   :  { %v7522_v15 = vpop.eup %7521 }
 0x899   :  { %v2459_v42 = vpop.xlane.xlu0 %2458  ;;  %v2485_v57 = vmul.f32 %v7522_v15, %v9429_v22  ;;  %v3530_v15 = vld [vmem:[#allocation7 + $0x458] sm:$0xff] }
 0x89a   :  { %7527 = vrcp.f32 %v2459_v42  ;;  %v3531_v42 = vld [vmem:[#allocation7 + $0x460] sm:$0xff] }
 0x89b   :  { %6305 = vmatmul.mubr.f32.gmra.mrb[50].mxu1 %v2485_v57 }
 0x89c   :  { %v7524_v30 = vpop.eup %7523 }
 0x89d   :  { %v2461_v62 = vpop.xlane.xlu1 %2460  ;;  %v2487_v58 = vmul.f32 %v7524_v30, %v9434_v18  ;;  %v7017_v30 = vpack.c.bf16 %v3531_v42, %v3530_v15 }
 0x89e   :  { %7529 = vrcp.f32 %v2461_v62 }
 0x89f   :  { %6307 = vmatprep.mubr.f32.mxu1 %v2487_v58 }
 0x8a0   :  { %v7526_v1 = vpop.eup %7525 }
 0x8a1   :  { %v2465_v28 = vpop.xlane.xlu1 %2464  ;;  %v2463_v10 = vpop.xlane.xlu0 %2462  ;;  %v2489_v29 = vmul.f32 %v7526_v1, %v9439_v14 }
 0x8a2   :  { %7531 = vrcp.f32 %v2465_v28 }
 0x8a3   :  { %7533 = vrcp.f32 %v2463_v10  ;;  %6308 = vmatmul.mubr.f32.gmra.mrb[52].mxu1 %v2489_v29 }
 0x8a4   :  { %v7528_v21 = vpop.eup %7527 }
 0x8a5   :  { %v2469_v51 = vpop.xlane.xlu1 %2468  ;;  %v2467_v33 = vpop.xlane.xlu0 %2466  ;;  %v2491_v22 = vmul.f32 %v7528_v21, %v9444_v25 }
 0x8a6   :  { %7535 = vrcp.f32 %v2469_v51 }
 0x8a7   :  { %7537 = vrcp.f32 %v2467_v33  ;;  %6310 = vmatprep.mubr.f32.mxu1 %v2491_v22 }
 0x8a8   :  { %v7530_v55 = vpop.eup %7529 }
 0x8a9   :  { %v2473_v18 = vpop.xlane.xlu1 %2472  ;;  %v2471_v16 = vpop.xlane.xlu0 %2470  ;;  %v2493_v38 = vmul.f32 %v7530_v55, %v9449_v3 }
 0x8aa   :  { %7539 = vrcp.f32 %v2473_v18 }
 0x8ab   :  { %7541 = vrcp.f32 %v2471_v16  ;;  %6311 = vmatmul.mubr.f32.gmra.mrb[54].mxu1 %v2493_v38 }
 0x8ac   :  { %v7532_v14 = vpop.eup %7531 }
 0x8ad   :  { %v7534_v40 = vpop.eup %7533  ;;  %v2477_v46 = vpop.xlane.xlu1 %2476  ;;  %v2497_v26 = vmul.f32 %v7532_v14, %v9453_v0 }
 0x8ae   :  { %v2475_v24 = vpop.xlane.xlu0 %2474  ;;  %7543 = vrcp.f32 %v2477_v46  ;;  %v2495_v25 = vmul.f32 %v7534_v40, %v9455_v43 }
 0x8af   :  { %7545 = vrcp.f32 %v2475_v24 }
 0x8b0   :  { %v7536_v5 = vpop.eup %7535  ;;  %6313 = vmatprep.mubr.f32.mxu1 %v2495_v25 }
 0x8b1   :  { %v7538_v61 = vpop.eup %7537  ;;  %6314 = vmatmul.mubr.f32.gmra.mrb[56].mxu1 %v2497_v26  ;;  %v2501_v32 = vmul.f32 %v7536_v5, %v9459_v4  ;;  %v3528_v4 = vld [vmem:[#allocation7 + $0x448] sm:$0xff] }
 0x8b2   :  { %v2499_v3 = vmul.f32 %v7538_v61, %v9461_v48  ;;  %v3529_v48 = vld [vmem:[#allocation7 + $0x450] sm:$0xff] }
 0x8b3   :  { %v7013_v56 = vpack.c.bf16 %v3529_v48, %v3528_v4 }
 0x8b4   :  { %v7540_v17 = vpop.eup %7539  ;;  %6316 = vmatprep.mubr.f32.mxu1 %v2499_v3  ;;  %v3532_v3 = vld [vmem:[#allocation7 + $0x468] sm:$0xff] }
 0x8b5   :  { %v7542_v34 = vpop.eup %7541  ;;  %6317 = vmatmul.mubr.f32.gmra.mrb[58].mxu1 %v2501_v32  ;;  %v2505_v50 = vmul.f32 %v7540_v17, %v9465_v12  ;;  %7014 = vmatprep.subr.bf16.mxu0 %v7013_v56  ;;  %v9525_v12 = vrot.slane %v3241_v19, %v10146_v35  ;;  %v3533_v17 = vld [vmem:[#allocation7 + $0x470] sm:$0xff] }
 0x8b6   :  { %v2503_v0 = vmul.f32 %v7542_v34, %v9467_v23  ;;  %7016 = vmatpush3.bf16.msra.mxu0 %v7013_v56  ;;  %v3534_v34 = vld [vmem:[#allocation7 + $0x478] sm:$0xff] }
 0x8b7   :  { %7018 = vmatprep.subr.bf16.mxu0 %v7017_v30 }
 0x8b8   :  { %v7544_v59 = vpop.eup %7543  ;;  %6319 = vmatprep.mubr.f32.mxu1 %v2503_v0  ;;  %v3535_v0 = vld [vmem:[#allocation7 + $0x480] sm:$0xff] }
 0x8b9   :  { %v7546_v43 = vpop.eup %7545  ;;  %6320 = vmatmul.mubr.f32.gmra.mrb[60].mxu1 %v2505_v50  ;;  %v2509_v60 = vmul.f32 %v7544_v59, %v9471_v27  ;;  %v7021_v50 = vpack.c.bf16 %v3533_v17, %v3532_v3 }
 0x8ba   :  { %v2507_v47 = vmul.f32 %v7546_v43, %v9473_v11  ;;  %7020 = vmatpush3.bf16.msra.mxu0 %v7017_v30  ;;  %v7025_v43 = vpack.c.bf16 %v3535_v0, %v3534_v34 }
 0x8bb   :  { %7022 = vmatprep.subr.bf16.mxu0 %v7021_v50 }
 0x8bc   :  { %6322 = vmatprep.mubr.f32.mxu1 %v2507_v47  ;;  %v3537_v47 = vld [vmem:[#allocation7 + $0x490] sm:$0xff] }
 0x8bd   :  { %6323 = vmatmul.mubr.f32.gmra.mrb[62].mxu1 %v2509_v60  ;;  %v3536_v60 = vld [vmem:[#allocation7 + $0x488] sm:$0xff] }
 0x8be   :  { %7024 = vmatpush3.bf16.msra.mxu0 %v7021_v50  ;;  %v7029_v19 = vpack.c.bf16 %v3537_v47, %v3536_v60 }
 0x8bf   :  { %7026 = vmatprep.subr.bf16.mxu0 %v7025_v43 }
 0x8c2   :  { %7028 = vmatpush3.bf16.msra.mxu0 %v7025_v43 }
 0x8c3   :  { %7030 = vmatprep.subr.bf16.mxu0 %v7029_v19 }
 0x8c6   :  { %7032 = vmatpush3.bf16.msra.mxu0 %v7029_v19 }
 0x966   :  { %v6303_v23 = vpop.f32.mrb[48].mxu1 }
 0x967   :  { %v3226_v39 = vmul.f32 0.5, %v6303_v23  ;;  %v3146_v49 = vpop.f32.mrb[49].mxu1  ;;  %v3538_v23 = vld [vmem:[#allocation7 + $0x498] sm:$0xff] }
 0x968   :  { %v3225_v20 = vmul.f32 0.5, %v3146_v49 }
 0x969   :  { %v9528_v44 = vadd.f32 %v9525_v12, %v3226_v39  ;;  %v3539_v39 = vld [vmem:[#allocation7 + $0x4a0] sm:$0xff] }
 0x96a   :  { %v9531_v27 = vadd.f32 %v9525_v12, %v3225_v20 }
 0x96b   :  { %3266 = vadd.xlane.f32.xlu1 %v9528_v44  ;;  %v3313_v11 = vmul.f32 %v9528_v44, %v9528_v44 }
 0x96c   :  { %3264 = vadd.xlane.f32.xlu0 %v9531_v27  ;;  %v3312_v9 = vmul.f32 %v9531_v27, %v9531_v27 }
 0x96e   :  { %v6306_v54 = vpop.f32.mrb[50].mxu1 }
 0x96f   :  { %v3228_v31 = vmul.f32 0.5, %v6306_v54  ;;  %3330 = vadd.xlane.f32.xlu1 %v3313_v11  ;;  %v3156_v52 = vpop.f32.mrb[51].mxu1 }
 0x970   :  { %v3227_v63 = vmul.f32 0.5, %v3156_v52  ;;  %3328 = vadd.xlane.f32.xlu0 %v3312_v9  ;;  %v7033_v9 = vpack.c.bf16 %v3539_v39, %v3538_v23  ;;  %v3541_v52 = vld [vmem:[#allocation7 + $0x4b0] sm:$0xff] }
 0x971   :  { %v9540_v36 = vadd.f32 %v9525_v12, %v3228_v31  ;;  %v3540_v31 = vld [vmem:[#allocation7 + $0x4a8] sm:$0xff] }
 0x972   :  { %v9543_v8 = vadd.f32 %v9525_v12, %v3227_v63  ;;  %7034 = vmatprep.subr.bf16.mxu0 %v7033_v9 }
 0x973   :  { %3270 = vadd.xlane.f32.xlu1 %v9540_v36  ;;  %v3315_v37 = vmul.f32 %v9540_v36, %v9540_v36  ;;  %7036 = vmatpush3.bf16.msra.mxu0 %v7033_v9 }
 0x974   :  { %3268 = vadd.xlane.f32.xlu0 %v9543_v8  ;;  %v3314_v45 = vmul.f32 %v9543_v8, %v9543_v8 }
 0x976   :  { %v6309_v2 = vpop.f32.mrb[52].mxu1 }
 0x977   :  { %v3230_v53 = vmul.f32 0.5, %v6309_v2  ;;  %3334 = vadd.xlane.f32.xlu1 %v3315_v37  ;;  %v3166_v6 = vpop.f32.mrb[53].mxu1  ;;  %v7037_v2 = vpack.c.bf16 %v3541_v52, %v3540_v31  ;;  %v3263_v52 = vld [vmem:[#allocation7 + $0x3c0] sm:$0xff] }
 0x978   :  { %v3229_v41 = vmul.f32 0.5, %v3166_v6  ;;  %3332 = vadd.xlane.f32.xlu0 %v3314_v45  ;;  %v3542_v45 = vld [vmem:[#allocation7 + $0x4b8] sm:$0xff] }
 0x979   :  { %v9552_v7 = vadd.f32 %v9525_v12, %v3230_v53  ;;  %v3543_v53 = vld [vmem:[#allocation7 + $0x4c0] sm:$0xff]  ;;  %7038 = vmatprep.subr.bf16.mxu0 %v7037_v2 }
 0x97a   :  { %v9555_v13 = vadd.f32 %v9525_v12, %v3229_v41  ;;  %7040 = vmatpush3.bf16.msra.mxu0 %v7037_v2 }
 0x97b   :  { %3274 = vadd.xlane.f32.xlu1 %v9552_v7  ;;  %v3317_v57 = vmul.f32 %v9552_v7, %v9552_v7 }
 0x97c   :  { %3272 = vadd.xlane.f32.xlu0 %v9555_v13  ;;  %v3316_v58 = vmul.f32 %v9555_v13, %v9555_v13 }
 0x97e   :  { %v6312_v62 = vpop.f32.mrb[54].mxu1 }
 0x97f   :  { %v3232_v1 = vmul.f32 0.5, %v6312_v62  ;;  %3338 = vadd.xlane.f32.xlu1 %v3317_v57  ;;  %v3176_v28 = vpop.f32.mrb[55].mxu1  ;;  %v7041_v57 = vpack.c.bf16 %v3543_v53, %v3542_v45 }
 0x980   :  { %v3231_v10 = vmul.f32 0.5, %v3176_v28  ;;  %3336 = vadd.xlane.f32.xlu0 %v3316_v58  ;;  %v3722_v28 = vld [vmem:[#allocation7 + $0x3c8] sm:$0xff] }
 0x981   :  { %v9564_v29 = vadd.f32 %v9525_v12, %v3232_v1  ;;  %7042 = vmatprep.subr.bf16.mxu0 %v7041_v57 }
 0x982   :  { %v9567_v21 = vadd.f32 %v9525_v12, %v3231_v10  ;;  %7044 = vmatpush3.bf16.msra.mxu0 %v7041_v57  ;;  %v3723_v10 = vld [vmem:[#allocation7 + $0x3d0] sm:$0xff] }
 0x983   :  { %3278 = vadd.xlane.f32.xlu1 %v9564_v29  ;;  %v3319_v55 = vmul.f32 %v9564_v29, %v9564_v29 }
 0x984   :  { %v6315_v51 = vpop.f32.mrb[56].mxu1  ;;  %3276 = vadd.xlane.f32.xlu0 %v9567_v21  ;;  %v3318_v16 = vmul.f32 %v9567_v21, %v9567_v21 }
 0x985   :  { %v3234_v33 = vmul.f32 0.5, %v6315_v51  ;;  %v3186_v22 = vpop.f32.mrb[57].mxu1  ;;  %v9623_v51 = vpack.c.bf16 %v3723_v10, %v3722_v28 }
 0x986   :  { %v3233_v18 = vmul.f32 0.5, %v3186_v22 }
 0x987   :  { %3342 = vadd.xlane.f32.xlu1 %v3319_v55  ;;  %v9576_v14 = vadd.f32 %v9525_v12, %v3234_v33  ;;  %7046 = vmatprep.subr.bf16.mxu0 %v9623_v51 }
 0x988   :  { %v6318_v38 = vpop.f32.mrb[58].mxu1  ;;  %3340 = vadd.xlane.f32.xlu0 %v3318_v16  ;;  %v9579_v46 = vadd.f32 %v9525_v12, %v3233_v18 }
 0x989   :  { %v3196_v40 = vpop.f32.mrb[59].mxu1  ;;  %v3236_v26 = vmul.f32 0.5, %v6318_v38  ;;  %v3321_v5 = vmul.f32 %v9576_v14, %v9576_v14 }
 0x98a   :  { %v3235_v61 = vmul.f32 0.5, %v3196_v40  ;;  %v3320_v32 = vmul.f32 %v9579_v46, %v9579_v46 }
 0x98b   :  { %3282 = vadd.xlane.f32.xlu1 %v9576_v14  ;;  %v9588_v4 = vadd.f32 %v9525_v12, %v3236_v26 }
 0x98c   :  { %v6321_v24 = vpop.f32.mrb[60].mxu1  ;;  %3280 = vadd.xlane.f32.xlu0 %v9579_v46  ;;  %v9591_v56 = vadd.f32 %v9525_v12, %v3235_v61 }
 0x98d   :  { %v3206_v25 = vpop.f32.mrb[61].mxu1  ;;  %v3238_v49 = vmul.f32 0.5, %v6321_v24  ;;  %v3323_v20 = vmul.f32 %v9588_v4, %v9588_v4 }
 0x98e   :  { %v3237_v11 = vmul.f32 0.5, %v3206_v25  ;;  %v3322_v54 = vmul.f32 %v9591_v56, %v9591_v56 }
 0x98f   :  { %3346 = vadd.xlane.f32.xlu1 %v3321_v5  ;;  %v9600_v63 = vadd.f32 %v9525_v12, %v3238_v49 }
 0x990   :  { %v6324_v59 = vpop.f32.mrb[62].mxu1  ;;  %3344 = vadd.xlane.f32.xlu0 %v3320_v32  ;;  %v9603_v37 = vadd.f32 %v9525_v12, %v3237_v11 }
 0x991   :  { %v3216_v48 = vpop.f32.mrb[63].mxu1  ;;  %v3240_v6 = vmul.f32 0.5, %v6324_v59  ;;  %v3325_v41 = vmul.f32 %v9600_v63, %v9600_v63 }
 0x992   :  { %v3239_v15 = vmul.f32 0.5, %v3216_v48  ;;  %v3324_v42 = vmul.f32 %v9603_v37, %v9603_v37 }
 0x993   :  { %3286 = vadd.xlane.f32.xlu1 %v9588_v4  ;;  %v9612_v30 = vadd.f32 %v9525_v12, %v3240_v6 }
 0x994   :  { %3284 = vadd.xlane.f32.xlu0 %v9591_v56  ;;  %v9615_v62 = vadd.f32 %v9525_v12, %v3239_v15 }
 0x995   :  { %v3327_v58 = vmul.f32 %v9612_v30, %v9612_v30 }
 0x996   :  { %v3326_v1 = vmul.f32 %v9615_v62, %v9615_v62 }
 0x997   :  { %3350 = vadd.xlane.f32.xlu1 %v3323_v20 }
 0x998   :  { %3348 = vadd.xlane.f32.xlu0 %v3322_v54  ;;  %v3262_v54 = vld [vmem:[#allocation7 + $0x3b8] sm:$0xff] }
 0x999   :  { %v9640_v53 = vrot.slane %v3262_v54, %v10146_v35 }
 0x99b   :  { %3290 = vadd.xlane.f32.xlu1 %v9600_v63 }
 0x99c   :  { %3288 = vadd.xlane.f32.xlu0 %v9603_v37 }
 0x99f   :  { %3354 = vadd.xlane.f32.xlu1 %v3325_v41 }
 0x9a0   :  { %3352 = vadd.xlane.f32.xlu0 %v3324_v42 }
 0x9a3   :  { %3294 = vadd.xlane.f32.xlu1 %v9612_v30 }
 0x9a4   :  { %3292 = vadd.xlane.f32.xlu0 %v9615_v62 }
 0x9a7   :  { %3358 = vadd.xlane.f32.xlu1 %v3327_v58 }
 0x9a8   :  { %3356 = vadd.xlane.f32.xlu0 %v3326_v1 }
 0x9f8   :  { %v3267_v12 = vpop.xlane.xlu1 %3266 }
 0x9f9   :  { %v3297_v33 = vmul.f32 0.03125, %v3267_v12  ;;  %v3265_v22 = vpop.xlane.xlu0 %3264 }
 0x9fa   :  { %v3296_v55 = vmul.f32 0.03125, %v3265_v22 }
 0x9fb   :  { %v3377_v16 = vmul.f32 %v3297_v33, %v3297_v33  ;;  %v3409_v2 = vsub.f32 %v9528_v44, %v3297_v33  ;;  %v9648_v44 = vrot.slane %v3263_v52, %v10146_v35  ;;  %v3727_v52 = vld [vmem:[#allocation7 + $0x3f0] sm:$0xff] }
 0x9fc   :  { %v3331_v18 = vpop.xlane.xlu1 %3330  ;;  %v3376_v24 = vmul.f32 %v3296_v55, %v3296_v55  ;;  %v3408_v41 = vsub.f32 %v9531_v27, %v3296_v55 }
 0x9fd   :  { %v3361_v38 = vmul.f32 0.03125, %v3331_v18  ;;  %v3329_v40 = vpop.xlane.xlu0 %3328 }
 0x9fe   :  { %v3360_v26 = vmul.f32 0.03125, %v3329_v40 }
 0x9ff   :  { %v3393_v25 = vsub.f32 %v3361_v38, %v3377_v16 }
 0xa00   :  { %v3392_v5 = vsub.f32 %v3360_v26, %v3376_v24  ;;  %v3271_v61 = vpop.xlane.xlu1 %3270  ;;  %v3724_v24 = vld [vmem:[#allocation7 + $0x3d8] sm:$0xff]  ;;  %v3725_v26 = vld [vmem:[#allocation7 + $0x3e0] sm:$0xff] }
 0xa01   :  { %v3425_v32 = vadd.f32 1e-05, %v3393_v25  ;;  %v9626_v3 = vmul.f32 0.03125, %v3271_v61  ;;  %v3269_v17 = vpop.xlane.xlu0 %3268 }
 0xa02   :  { %v3424_v34 = vadd.f32 1e-05, %v3392_v5  ;;  %v9628_v50 = vmul.f32 0.03125, %v3269_v17 }
 0xa03   :  { %7547 = vrsqrt.f32 %v3425_v32  ;;  %v3379_v59 = vmul.f32 %v9626_v3, %v9626_v3  ;;  %v3411_v17 = vsub.f32 %v9540_v36, %v9626_v3  ;;  %v10148_v3 = vld [vmem:[#allocation15_spill] sm:$0xff] }
 0xa04   :  { %7549 = vrsqrt.f32 %v3424_v34  ;;  %v3335_v0 = vpop.xlane.xlu1 %3334  ;;  %v3378_v47 = vmul.f32 %v9628_v50, %v9628_v50 }
 0xa05   :  { %v3363_v43 = vmul.f32 0.03125, %v3335_v0  ;;  %v3333_v60 = vpop.xlane.xlu0 %3332  ;;  %v7049_v0 = vpack.c.bf16 %v3725_v26, %v3724_v24 }
 0xa06   :  { %v3362_v48 = vmul.f32 0.03125, %v3333_v60 }
 0xa07   :  { %v3395_v19 = vsub.f32 %v3363_v43, %v3379_v59  ;;  %v3410_v43 = vsub.f32 %v9543_v8, %v9628_v50  ;;  %v3726_v50 = vld [vmem:[#allocation7 + $0x3e8] sm:$0xff] }
 0xa08   :  { %v3394_v23 = vsub.f32 %v3362_v48, %v3378_v47  ;;  %v3275_v39 = vpop.xlane.xlu1 %3274 }
 0xa09   :  { %v3427_v49 = vadd.f32 1e-05, %v3395_v19  ;;  %v9634_v20 = vmul.f32 0.03125, %v3275_v39  ;;  %v3273_v11 = vpop.xlane.xlu0 %3272  ;;  %v10147_v19 = vld [vmem:[#allocation14_spill] sm:$0xff] }
 0xa0a   :  { %v3426_v9 = vadd.f32 1e-05, %v3394_v23  ;;  %v9636_v31 = vmul.f32 0.03125, %v3273_v11 }
 0xa0b   :  { %7551 = vrsqrt.f32 %v3427_v49  ;;  %v3381_v15 = vmul.f32 %v9634_v20, %v9634_v20 }
 0xa0c   :  { %7553 = vrsqrt.f32 %v3426_v9  ;;  %v3339_v45 = vpop.xlane.xlu1 %3338  ;;  %v3380_v28 = vmul.f32 %v9636_v31, %v9636_v31 }
 0xa0d   :  { %v7548_v6 = vpop.eup %7547  ;;  %v3365_v42 = vmul.f32 0.03125, %v3339_v45  ;;  %v3337_v57 = vpop.xlane.xlu0 %3336 }
 0xa0e   :  { %v7550_v58 = vpop.eup %7549  ;;  %v3457_v1 = vmul.f32 %v7548_v6, %v3409_v2  ;;  %v3364_v10 = vmul.f32 0.03125, %v3337_v57 }
 0xa0f   :  { %v3397_v12 = vsub.f32 %v3365_v42, %v3381_v15  ;;  %v3456_v33 = vmul.f32 %v7550_v58, %v3408_v41  ;;  %v3728_v58 = vld [vmem:[#allocation7 + $0x3f8] sm:$0xff] }
 0xa10   :  { %v3396_v22 = vsub.f32 %v3364_v10, %v3380_v28  ;;  %v3279_v18 = vpop.xlane.xlu1 %3278  ;;  %v3477_v27 = vmul.f32 %v9640_v53, %v3457_v1  ;;  %v3729_v1 = vld [vmem:[#allocation7 + $0x400] sm:$0xff] }
 0xa11   :  { %v3429_v55 = vadd.f32 1e-05, %v3397_v12  ;;  %v9651_v16 = vmul.f32 0.03125, %v3279_v18  ;;  %v3277_v38 = vpop.xlane.xlu0 %3276  ;;  %v3476_v40 = vmul.f32 %v9640_v53, %v3456_v33  ;;  %v7053_v33 = vpack.c.bf16 %v3727_v52, %v3726_v50 }
 0xa12   :  { %v3428_v25 = vadd.f32 1e-05, %v3396_v22  ;;  %v9654_v5 = vmul.f32 0.03125, %v3277_v38  ;;  %v3497_v61 = vadd.f32 %v9648_v44, %v3477_v27  ;;  %v3413_v18 = vsub.f32 %v9552_v7, %v9634_v20 }
 0xa13   :  { %7555 = vrsqrt.f32 %v3429_v55  ;;  %v3496_v32 = vadd.f32 %v9648_v44, %v3476_v40  ;;  %v3383_v60 = vmul.f32 %v9651_v16, %v9651_v16  ;;  %v7057_v55 = vpack.c.bf16 %v3729_v1, %v3728_v58 }
 0xa14   :  { %7557 = vrsqrt.f32 %v3428_v25  ;;  %v3343_v34 = vpop.xlane.xlu1 %3342  ;;  %v3382_v49 = vmul.f32 %v9654_v5, %v9654_v5  ;;  %v9670_v11 = vadd.f32 %v3497_v61, %v10148_v3  ;;  %v10149_v25 = vld [vmem:[#allocation16_spill] sm:$0xff]  ;;  %v3732_v3 = vld [vmem:[#allocation7 + $0x418] sm:$0xff] }
 0xa15   :  { %v7552_v59 = vpop.eup %7551  ;;  %v3367_v47 = vmul.f32 0.03125, %v3343_v34  ;;  %v3341_v48 = vpop.xlane.xlu0 %3340  ;;  %v9665_v23 = vadd.f32 %v3496_v32, %v10147_v19 }
 0xa16   :  { %v7554_v39 = vpop.eup %7553  ;;  %v3366_v36 = vmul.f32 0.03125, %v3341_v48  ;;  %v3459_v54 = vmul.f32 %v7552_v59, %v3411_v17  ;;  %v10150_v17 = vld [vmem:[#allocation17_spill] sm:$0xff] }
 0xa17   :  { %v3399_v9 = vsub.f32 %v3367_v47, %v3383_v60  ;;  %6357 = vmatprep.mubr.f32.mxu0 %v9665_v23  ;;  %v3458_v8 = vmul.f32 %v7554_v39, %v3410_v43  ;;  %v3730_v43 = vld [vmem:[#allocation7 + $0x408] sm:$0xff]  ;;  %v3731_v60 = vld [vmem:[#allocation7 + $0x410] sm:$0xff] }
 0xa18   :  { %v3398_v2 = vsub.f32 %v3366_v36, %v3382_v49  ;;  %v3283_v45 = vpop.xlane.xlu1 %3282  ;;  %6358 = vmatmul.mubr.f32.vlgmr.msra.gmra.mrb[80].mxu0 %v9670_v11  ;;  %v3479_v6 = vmul.f32 %v9640_v53, %v3459_v54  ;;  %v3733_v54 = vld [vmem:[#allocation7 + $0x420] sm:$0xff]  ;;  %v7061_v52 = vpack.c.bf16 %v3731_v60, %v3730_v43 }
 0xa19   :  { %v3431_v41 = vadd.f32 1e-05, %v3399_v9  ;;  %v9675_v15 = vmul.f32 0.03125, %v3283_v45  ;;  %v3281_v42 = vpop.xlane.xlu0 %3280  ;;  %v3478_v57 = vmul.f32 %v9640_v53, %v3458_v8  ;;  %7048 = vmatpush3.bf16.msra.mxu0 %v9623_v51  ;;  %v3412_v51 = vsub.f32 %v9555_v13, %v9636_v31 }
 0xa1a   :  { %v3430_v28 = vadd.f32 1e-05, %v3398_v2  ;;  %v9679_v10 = vmul.f32 0.03125, %v3281_v42  ;;  %v3499_v12 = vadd.f32 %v9648_v44, %v3479_v6  ;;  %7050 = vmatprep.subr.bf16.mxu0 %v7049_v0  ;;  %v3415_v45 = vsub.f32 %v9564_v29, %v9651_v16 }
 0xa1b   :  { %7559 = vrsqrt.f32 %v3431_v41  ;;  %v3498_v22 = vadd.f32 %v9648_v44, %v3478_v57  ;;  %v3385_v40 = vmul.f32 %v9675_v15, %v9675_v15  ;;  %v7065_v41 = vpack.c.bf16 %v3733_v54, %v3732_v3 }
 0xa1c   :  { %7561 = vrsqrt.f32 %v3430_v28  ;;  %v3347_v27 = vpop.xlane.xlu1 %3346  ;;  %v3384_v7 = vmul.f32 %v9679_v10, %v9679_v10  ;;  %v9695_v34 = vadd.f32 %v3499_v12, %v10150_v17  ;;  %v3414_v57 = vsub.f32 %v9567_v21, %v9654_v5  ;;  %v10151_v12 = vld [vmem:[#allocation18_spill] sm:$0xff]  ;;  %v3736_v17 = vld [vmem:[#allocation7 + $0x438] sm:$0xff] }
 0xa1d   :  { %v7556_v38 = vpop.eup %7555  ;;  %v3369_v24 = vmul.f32 0.03125, %v3347_v27  ;;  %v3345_v26 = vpop.xlane.xlu0 %3344  ;;  %v9690_v61 = vadd.f32 %v3498_v22, %v10149_v25  ;;  %7052 = vmatpush3.bf16.msra.mxu0 %v7049_v0 }
 0xa1e   :  { %v7558_v32 = vpop.eup %7557  ;;  %v3368_v20 = vmul.f32 0.03125, %v3345_v26  ;;  %v3461_v59 = vmul.f32 %v7556_v38, %v3413_v18  ;;  %7054 = vmatprep.subr.bf16.mxu0 %v7053_v33  ;;  %v10152_v18 = vld [vmem:[#allocation19_spill] sm:$0xff] }
 0xa1f   :  { %v3401_v13 = vsub.f32 %v3369_v24, %v3385_v40  ;;  %6360 = vmatprep.mubr.f32.mxu0 %v9690_v61  ;;  %v3460_v31 = vmul.f32 %v7558_v32, %v3412_v51  ;;  %v3734_v51 = vld [vmem:[#allocation7 + $0x428] sm:$0xff]  ;;  %v3735_v40 = vld [vmem:[#allocation7 + $0x430] sm:$0xff] }
 0xa20   :  { %v3400_v47 = vsub.f32 %v3368_v20, %v3384_v7  ;;  %v3287_v48 = vpop.xlane.xlu1 %3286  ;;  %6361 = vmatmul.mubr.f32.gmra.mrb[82].mxu0 %v9695_v34  ;;  %v3481_v0 = vmul.f32 %v9640_v53, %v3461_v59  ;;  %v3737_v59 = vld [vmem:[#allocation7 + $0x440] sm:$0xff]  ;;  %v7069_v60 = vpack.c.bf16 %v3735_v40, %v3734_v51 }
 0xa21   :  { %v3433_v19 = vadd.f32 1e-05, %v3401_v13  ;;  %v9700_v39 = vmul.f32 0.03125, %v3287_v48  ;;  %v3285_v49 = vpop.xlane.xlu0 %3284  ;;  %v3480_v36 = vmul.f32 %v9640_v53, %v3460_v31  ;;  %7056 = vmatpush3.bf16.msra.mxu0 %v7053_v33  ;;  %v3417_v48 = vsub.f32 %v9576_v14, %v9675_v15 }
 0xa22   :  { %v3432_v9 = vadd.f32 1e-05, %v3400_v47  ;;  %v9703_v8 = vmul.f32 0.03125, %v3285_v49  ;;  %v3501_v50 = vadd.f32 %v9648_v44, %v3481_v0  ;;  %7058 = vmatprep.subr.bf16.mxu0 %v7057_v55 }
 0xa23   :  { %7563 = vrsqrt.f32 %v3433_v19  ;;  %v3500_v2 = vadd.f32 %v9648_v44, %v3480_v36  ;;  %v3387_v58 = vmul.f32 %v9700_v39, %v9700_v39  ;;  %v7073_v19 = vpack.c.bf16 %v3737_v59, %v3736_v17 }
 0xa24   :  { %7565 = vrsqrt.f32 %v3432_v9  ;;  %v3351_v6 = vpop.xlane.xlu1 %3350  ;;  %v3386_v29 = vmul.f32 %v9703_v8, %v9703_v8  ;;  %v9719_v27 = vadd.f32 %v3501_v50, %v10152_v18  ;;  %v3416_v36 = vsub.f32 %v9579_v46, %v9679_v10  ;;  %v10153_v50 = vld [vmem:[#allocation20_spill] sm:$0xff] }
 0xa25   :  { %v7560_v42 = vpop.eup %7559  ;;  %v3371_v1 = vmul.f32 0.03125, %v3351_v6  ;;  %v3349_v28 = vpop.xlane.xlu0 %3348  ;;  %v9714_v33 = vadd.f32 %v3500_v2, %v10151_v12  ;;  %7060 = vmatpush3.bf16.msra.mxu0 %v7057_v55  ;;  %v3418_v40 = vsub.f32 %v9591_v56, %v9703_v8 }
 0xa26   :  { %v7562_v22 = vpop.eup %7561  ;;  %v3370_v16 = vmul.f32 0.03125, %v3349_v28  ;;  %v3463_v38 = vmul.f32 %v7560_v42, %v3415_v45  ;;  %7062 = vmatprep.subr.bf16.mxu0 %v7061_v52  ;;  %v10154_v45 = vld [vmem:[#allocation21_spill] sm:$0xff] }
 0xa27   :  { %v3403_v21 = vsub.f32 %v3371_v1, %v3387_v58  ;;  %6363 = vmatprep.mubr.f32.mxu0 %v9714_v33  ;;  %v3462_v5 = vmul.f32 %v7562_v22, %v3414_v57 }
 0xa28   :  { %v3402_v24 = vsub.f32 %v3370_v16, %v3386_v29  ;;  %v3291_v26 = vpop.xlane.xlu1 %3290  ;;  %6364 = vmatmul.mubr.f32.gmra.mrb[84].mxu0 %v9719_v27  ;;  %v3483_v55 = vmul.f32 %v9640_v53, %v3463_v38 }
 0xa29   :  { %v3435_v25 = vadd.f32 1e-05, %v3403_v21  ;;  %v9724_v32 = vmul.f32 0.03125, %v3291_v26  ;;  %v3289_v7 = vpop.xlane.xlu0 %3288  ;;  %v3482_v20 = vmul.f32 %v9640_v53, %v3462_v5  ;;  %7064 = vmatpush3.bf16.msra.mxu0 %v7061_v52  ;;  %v3419_v21 = vsub.f32 %v9588_v4, %v9700_v39 }
 0xa2a   :  { %v3434_v13 = vadd.f32 1e-05, %v3402_v24  ;;  %v9727_v31 = vmul.f32 0.03125, %v3289_v7  ;;  %v3503_v43 = vadd.f32 %v9648_v44, %v3483_v55  ;;  %7066 = vmatprep.subr.bf16.mxu0 %v7065_v41 }
 0xa2b   :  { %7567 = vrsqrt.f32 %v3435_v25  ;;  %v3502_v47 = vadd.f32 %v9648_v44, %v3482_v20  ;;  %v3389_v3 = vmul.f32 %v9724_v32, %v9724_v32  ;;  %v10155_v25 = vld [vmem:[#allocation22_spill] sm:$0xff] }
 0xa2c   :  { %7569 = vrsqrt.f32 %v3434_v13  ;;  %v3355_v0 = vpop.xlane.xlu1 %3354  ;;  %v3388_v14 = vmul.f32 %v9727_v31, %v9727_v31  ;;  %v9743_v6 = vadd.f32 %v3503_v43, %v10154_v45  ;;  %v10156_v13 = vld [vmem:[#allocation23_spill] sm:$0xff] }
 0xa2d   :  { %v7564_v49 = vpop.eup %7563  ;;  %v3373_v54 = vmul.f32 0.03125, %v3355_v0  ;;  %v3353_v9 = vpop.xlane.xlu0 %3352  ;;  %v9738_v52 = vadd.f32 %v3502_v47, %v10153_v50  ;;  %7068 = vmatpush3.bf16.msra.mxu0 %v7065_v41 }
 0xa2e   :  { %v7566_v2 = vpop.eup %7565  ;;  %v3372_v15 = vmul.f32 0.03125, %v3353_v9  ;;  %v3465_v42 = vmul.f32 %v7564_v49, %v3417_v48  ;;  %7070 = vmatprep.subr.bf16.mxu0 %v7069_v60  ;;  %v10157_v9 = vld [vmem:[#allocation24_spill] sm:$0xff] }
 0xa2f   :  { %v3405_v46 = vsub.f32 %v3373_v54, %v3389_v3  ;;  %6366 = vmatprep.mubr.f32.mxu0 %v9738_v52  ;;  %v3464_v10 = vmul.f32 %v7566_v2, %v3416_v36  ;;  %v3421_v36 = vsub.f32 %v9600_v63, %v9724_v32  ;;  %v3420_v54 = vsub.f32 %v9603_v37, %v9727_v31 }
 0xa30   :  { %v3404_v57 = vsub.f32 %v3372_v15, %v3388_v14  ;;  %v3295_v58 = vpop.xlane.xlu1 %3294  ;;  %6367 = vmatmul.mubr.f32.gmra.mrb[86].mxu0 %v9743_v6  ;;  %v3485_v41 = vmul.f32 %v9640_v53, %v3465_v42  ;;  %v10158_v14 = vld [vmem:[#allocation25_spill] sm:$0xff] }
 0xa31   :  { %v3437_v1 = vadd.f32 1e-05, %v3405_v46  ;;  %v3311_v28 = vmul.f32 0.03125, %v3295_v58  ;;  %v3293_v12 = vpop.xlane.xlu0 %3292  ;;  %v3484_v22 = vmul.f32 %v9640_v53, %v3464_v10  ;;  %7072 = vmatpush3.bf16.msra.mxu0 %v7069_v60  ;;  %v10159_v58 = vld [vmem:[#allocation26_spill] sm:$0xff] }
 0xa32   :  { %v3436_v29 = vadd.f32 1e-05, %v3404_v57  ;;  %v3310_v16 = vmul.f32 0.03125, %v3293_v12  ;;  %v3505_v18 = vadd.f32 %v9648_v44, %v3485_v41  ;;  %7074 = vmatprep.subr.bf16.mxu0 %v7073_v19  ;;  %v10160_v12 = vld [vmem:[#allocation27_spill] sm:$0xff] }
 0xa33   :  { %7571 = vrsqrt.f32 %v3437_v1  ;;  %v3504_v38 = vadd.f32 %v9648_v44, %v3484_v22  ;;  %v3391_v24 = vmul.f32 %v3311_v28, %v3311_v28  ;;  %v3423_v57 = vsub.f32 %v9612_v30, %v3311_v28  ;;  %v10161_v28 = vld [vmem:[#allocation28_spill] sm:$0xff] }
 0xa34   :  { %7573 = vrsqrt.f32 %v3436_v29  ;;  %v3359_v5 = vpop.xlane.xlu1 %3358  ;;  %v3390_v17 = vmul.f32 %v3310_v16, %v3310_v16  ;;  %v3521_v43 = vadd.f32 %v3505_v18, %v10156_v13  ;;  %v3422_v31 = vsub.f32 %v9615_v62, %v3310_v16  ;;  %v10162_v62 = vld [vmem:[#allocation29_spill] sm:$0xff] }
 0xa35   :  { %v7568_v51 = vpop.eup %7567  ;;  %v3375_v26 = vmul.f32 0.03125, %v3359_v5  ;;  %v3357_v55 = vpop.xlane.xlu0 %3356  ;;  %v3520_v7 = vadd.f32 %v3504_v38, %v10155_v25  ;;  %7076 = vmatpush3.bf16.msra.mxu0 %v7073_v19  ;;  %v3721_v25 = vld [vmem:[#allocation7 + $0x4c8] sm:$0xff] }
 0xa36   :  { %v7570_v20 = vpop.eup %7569  ;;  %v3374_v59 = vmul.f32 0.03125, %v3357_v55  ;;  %v3467_v60 = vmul.f32 %v7568_v51, %v3419_v21 }
 0xa37   :  { %v3407_v47 = vsub.f32 %v3375_v26, %v3391_v24  ;;  %6369 = vmatprep.mubr.f32.mxu0 %v3520_v7  ;;  %v3466_v4 = vmul.f32 %v7570_v20, %v3418_v40 }
 0xa38   :  { %v3406_v39 = vsub.f32 %v3374_v59, %v3390_v17  ;;  %6370 = vmatmul.mubr.f32.gmra.mrb[88].mxu0 %v3521_v43  ;;  %v3487_v48 = vmul.f32 %v9640_v53, %v3467_v60  ;;  %v9822_v17 = vrot.slane %v3721_v25, %v10146_v35 }
 0xa39   :  { %v3439_v56 = vadd.f32 1e-05, %v3407_v47  ;;  %v3486_v8 = vmul.f32 %v9640_v53, %v3466_v4 }
 0xa3a   :  { %v3438_v0 = vadd.f32 1e-05, %v3406_v39  ;;  %v3507_v49 = vadd.f32 %v9648_v44, %v3487_v48 }
 0xa3b   :  { %7575 = vrsqrt.f32 %v3439_v56  ;;  %v3506_v19 = vadd.f32 %v9648_v44, %v3486_v8 }
 0xa3c   :  { %7577 = vrsqrt.f32 %v3438_v0  ;;  %v3523_v15 = vadd.f32 %v3507_v49, %v10158_v14 }
 0xa3d   :  { %v7572_v3 = vpop.eup %7571  ;;  %v3522_v50 = vadd.f32 %v3506_v19, %v10157_v9 }
 0xa3e   :  { %v7574_v2 = vpop.eup %7573  ;;  %v3469_v45 = vmul.f32 %v7572_v3, %v3421_v36 }
 0xa3f   :  { %6372 = vmatprep.mubr.f32.mxu0 %v3522_v50  ;;  %v3468_v42 = vmul.f32 %v7574_v2, %v3420_v54 }
 0xa40   :  { %6373 = vmatmul.mubr.f32.gmra.mrb[90].mxu0 %v3523_v15  ;;  %v3489_v46 = vmul.f32 %v9640_v53, %v3469_v45 }
 0xa41   :  { %v3488_v10 = vmul.f32 %v9640_v53, %v3468_v42 }
 0xa42   :  { %v3509_v63 = vadd.f32 %v9648_v44, %v3489_v46 }
 0xa43   :  { %v3508_v32 = vadd.f32 %v9648_v44, %v3488_v10 }
 0xa44   :  { %v3525_v22 = vadd.f32 %v3509_v63, %v10160_v12 }
 0xa45   :  { %v7576_v37 = vpop.eup %7575  ;;  %v3524_v41 = vadd.f32 %v3508_v32, %v10159_v58 }
 0xa46   :  { %v7578_v1 = vpop.eup %7577  ;;  %v3471_v29 = vmul.f32 %v7576_v37, %v3423_v57 }
 0xa47   :  { %6375 = vmatprep.mubr.f32.mxu0 %v3524_v41  ;;  %v3470_v18 = vmul.f32 %v7578_v1, %v3422_v31 }
 0xa48   :  { %6376 = vmatmul.mubr.f32.gmra.mrb[92].mxu0 %v3525_v22  ;;  %v3491_v38 = vmul.f32 %v9640_v53, %v3471_v29 }
 0xa49   :  { %v3490_v21 = vmul.f32 %v9640_v53, %v3470_v18 }
 0xa4a   :  { %v3511_v5 = vadd.f32 %v9648_v44, %v3491_v38 }
 0xa4b   :  { %v3510_v30 = vadd.f32 %v9648_v44, %v3490_v21 }
 0xa4c   :  { %v3527_v16 = vadd.f32 %v3511_v5, %v10162_v62 }
 0xa4d   :  { %v3526_v51 = vadd.f32 %v3510_v30, %v10161_v28 }
 0xa4f   :  { %6378 = vmatprep.mubr.f32.mxu0 %v3526_v51 }
 0xa50   :  { %6379 = vmatmul.mubr.f32.gmra.mrb[94].mxu0 %v3527_v16 }
 0xa51   :  { %6413 = vmatprep.mubr.f32.mxu0 %v9665_v23 }
 0xa54   :  { %6414 = vmatmul.mubr.f32.vlgmr.msra.gmra.mrb[96].mxu0 %v9670_v11 }
 0xa55   :  { %6416 = vmatprep.mubr.f32.mxu0 %v9690_v61 }
 0xa58   :  { %6417 = vmatmul.mubr.f32.gmra.mrb[98].mxu0 %v9695_v34 }
 0xa59   :  { %6419 = vmatprep.mubr.f32.mxu0 %v9714_v33 }
 0xa5c   :  { %6420 = vmatmul.mubr.f32.gmra.mrb[100].mxu0 %v9719_v27 }
 0xa5d   :  { %6422 = vmatprep.mubr.f32.mxu0 %v9738_v52 }
 0xa60   :  { %6423 = vmatmul.mubr.f32.gmra.mrb[102].mxu0 %v9743_v6 }
 0xa61   :  { %6425 = vmatprep.mubr.f32.mxu0 %v3520_v7 }
 0xa64   :  { %6426 = vmatmul.mubr.f32.gmra.mrb[104].mxu0 %v3521_v43 }
 0xa65   :  { %6428 = vmatprep.mubr.f32.mxu0 %v3522_v50 }
 0xa68   :  { %6429 = vmatmul.mubr.f32.gmra.mrb[106].mxu0 %v3523_v15 }
 0xa69   :  { %6431 = vmatprep.mubr.f32.mxu0 %v3524_v41 }
 0xa6c   :  { %6432 = vmatmul.mubr.f32.gmra.mrb[108].mxu0 %v3525_v22 }
 0xa6d   :  { %6434 = vmatprep.mubr.f32.mxu0 %v3526_v51 }
 0xa70   :  { %6435 = vmatmul.mubr.f32.gmra.mrb[110].mxu0 %v3527_v16 }
 0xaeb   :  { %v9789_v53 = vpop.f32.mrb[80].mxu0 }
 0xaec   :  { %v9791_v44 = vpop.f32.mrb[81].mxu0 }
 0xaf3   :  { %v9793_v23 = vpop.f32.mrb[82].mxu0 }
 0xaf4   :  { %v9795_v11 = vpop.f32.mrb[83].mxu0 }
 0xafb   :  { %v9797_v61 = vpop.f32.mrb[84].mxu0 }
 0xafc   :  { %v9799_v34 = vpop.f32.mrb[85].mxu0 }
 0xb03   :  { %v9801_v33 = vpop.f32.mrb[86].mxu0 }
 0xb04   :  { %v9803_v27 = vpop.f32.mrb[87].mxu0 }
 0xb0b   :  { %v9805_v52 = vpop.f32.mrb[88].mxu0 }
 0xb0c   :  { %v9807_v6 = vpop.f32.mrb[89].mxu0 }
 0xb13   :  { %v9809_v40 = vpop.f32.mrb[90].mxu0 }
 0xb14   :  { %v9811_v24 = vpop.f32.mrb[91].mxu0 }
 0xb1b   :  { %v9813_v26 = vpop.f32.mrb[92].mxu0 }
 0xb1c   :  { %v9815_v55 = vpop.f32.mrb[93].mxu0 }
 0xb23   :  { %v9817_v7 = vpop.f32.mrb[94].mxu0 }
 0xb24   :  { %v9819_v20 = vpop.f32.mrb[95].mxu0 }
 0xb27   :  { %v6415_v59 = vpop.f32.mrb[96].mxu0 }
 0xb28   :  { %v3888_v13 = vmul.f32 %v6415_v59, %v9822_v17  ;;  %v3804_v43 = vpop.f32.mrb[97].mxu0 }
 0xb29   :  { %v3887_v60 = vmul.f32 %v9822_v17, %v3804_v43  ;;  %v7077_v47 = vpack.c.bf16 %v6415_v59, %v3804_v43 }
 0xb2a   :  { %3905 = vadd.xlane.f32.xlu1 %v3888_v13  ;;  %v7803_v13 = vld [vmem:[#allocation5] sm:$0xff] }
 0xb2b   :  { %7078 = vmatprep.subr.bf16.mxu1 %v7077_v47  ;;  %3903 = vadd.xlane.f32.xlu0 %v3887_v60  ;;  %v6418_v4 = vpop.f32.mrb[98].mxu0 }
 0xb2c   :  { %v3890_v39 = vmul.f32 %v6418_v4, %v9822_v17  ;;  %v3814_v48 = vpop.f32.mrb[99].mxu0  ;;  %7080 = vmatpush3.bf16.msra.mxu1 %v7077_v47 }
 0xb2d   :  { %v3889_v56 = vmul.f32 %v9822_v17, %v3814_v48  ;;  %v7081_v8 = vpack.c.bf16 %v6418_v4, %v3814_v48 }
 0xb2e   :  { %3909 = vadd.xlane.f32.xlu1 %v3890_v39  ;;  %v7804_v39 = vld [vmem:[#allocation5 + $0x18] sm:$0xff] }
 0xb2f   :  { %7082 = vmatprep.subr.bf16.mxu1 %v7081_v8  ;;  %3907 = vadd.xlane.f32.xlu0 %v3889_v56  ;;  %v6421_v0 = vpop.f32.mrb[100].mxu0 }
 0xb30   :  { %v3892_v49 = vmul.f32 %v6421_v0, %v9822_v17  ;;  %v3824_v19 = vpop.f32.mrb[101].mxu0  ;;  %7084 = vmatpush3.bf16.msra.mxu1 %v7081_v8 }
 0xb31   :  { %v3891_v36 = vmul.f32 %v9822_v17, %v3824_v19  ;;  %v7085_v3 = vpack.c.bf16 %v6421_v0, %v3824_v19  ;;  %v7805_v19 = vld [vmem:[#allocation5 + $0x10] sm:$0xff] }
 0xb32   :  { %3913 = vadd.xlane.f32.xlu1 %v3892_v49 }
 0xb33   :  { %7086 = vmatprep.subr.bf16.mxu1 %v7085_v3  ;;  %3911 = vadd.xlane.f32.xlu0 %v3891_v36  ;;  %v6424_v54 = vpop.f32.mrb[102].mxu0 }
 0xb34   :  { %v3894_v9 = vmul.f32 %v6424_v54, %v9822_v17  ;;  %v3834_v50 = vpop.f32.mrb[103].mxu0  ;;  %7088 = vmatpush3.bf16.msra.mxu1 %v7085_v3 }
 0xb35   :  { %v3893_v2 = vmul.f32 %v9822_v17, %v3834_v50  ;;  %v7089_v14 = vpack.c.bf16 %v6424_v54, %v3834_v50  ;;  %v7806_v50 = vld [vmem:[#allocation5 + $0x28] sm:$0xff] }
 0xb36   :  { %3917 = vadd.xlane.f32.xlu1 %v3894_v9 }
 0xb37   :  { %7090 = vmatprep.subr.bf16.mxu1 %v7089_v14  ;;  %3915 = vadd.xlane.f32.xlu0 %v3893_v2  ;;  %v6427_v15 = vpop.f32.mrb[104].mxu0 }
 0xb38   :  { %v3896_v45 = vmul.f32 %v6427_v15, %v9822_v17  ;;  %v3844_v42 = vpop.f32.mrb[105].mxu0  ;;  %7092 = vmatpush3.bf16.msra.mxu1 %v7089_v14 }
 0xb39   :  { %v3895_v46 = vmul.f32 %v9822_v17, %v3844_v42  ;;  %v7093_v10 = vpack.c.bf16 %v6427_v15, %v3844_v42 }
 0xb3a   :  { %3921 = vadd.xlane.f32.xlu1 %v3896_v45 }
 0xb3b   :  { %7094 = vmatprep.subr.bf16.mxu1 %v7093_v10  ;;  %3919 = vadd.xlane.f32.xlu0 %v3895_v46  ;;  %v6430_v63 = vpop.f32.mrb[106].mxu0  ;;  %v7807_v46 = vld [vmem:[#allocation5 + $0x20] sm:$0xff] }
 0xb3c   :  { %v3898_v32 = vmul.f32 %v6430_v63, %v9822_v17  ;;  %v3854_v57 = vpop.f32.mrb[107].mxu0  ;;  %7096 = vmatpush3.bf16.msra.mxu1 %v7093_v10 }
 0xb3d   :  { %v3897_v37 = vmul.f32 %v9822_v17, %v3854_v57  ;;  %v7097_v31 = vpack.c.bf16 %v6430_v63, %v3854_v57 }
 0xb3e   :  { %3925 = vadd.xlane.f32.xlu1 %v3898_v32 }
 0xb3f   :  { %7098 = vmatprep.subr.bf16.mxu1 %v7097_v31  ;;  %3923 = vadd.xlane.f32.xlu0 %v3897_v37  ;;  %v6433_v58 = vpop.f32.mrb[108].mxu0  ;;  %v7808_v37 = vld [vmem:[#allocation5 + $0x38] sm:$0xff] }
 0xb40   :  { %v3900_v41 = vmul.f32 %v6433_v58, %v9822_v17  ;;  %v3864_v1 = vpop.f32.mrb[109].mxu0  ;;  %7100 = vmatpush3.bf16.msra.mxu1 %v7097_v31 }
 0xb41   :  { %v3899_v12 = vmul.f32 %v9822_v17, %v3864_v1  ;;  %v7101_v22 = vpack.c.bf16 %v6433_v58, %v3864_v1 }
 0xb42   :  { %3929 = vadd.xlane.f32.xlu1 %v3900_v41 }
 0xb43   :  { %7102 = vmatprep.subr.bf16.mxu1 %v7101_v22  ;;  %3927 = vadd.xlane.f32.xlu0 %v3899_v12  ;;  %v6436_v29 = vpop.f32.mrb[110].mxu0 }
 0xb44   :  { %v3902_v18 = vmul.f32 %v6436_v29, %v9822_v17  ;;  %v3874_v38 = vpop.f32.mrb[111].mxu0  ;;  %7104 = vmatpush3.bf16.msra.mxu1 %v7101_v22  ;;  %v7809_v22 = vld [vmem:[#allocation5 + $0x30] sm:$0xff] }
 0xb45   :  { %v3901_v21 = vmul.f32 %v9822_v17, %v3874_v38  ;;  %v7105_v5 = vpack.c.bf16 %v6436_v29, %v3874_v38 }
 0xb46   :  { %3933 = vadd.xlane.f32.xlu1 %v3902_v18 }
 0xb47   :  { %7106 = vmatprep.subr.bf16.mxu1 %v7105_v5  ;;  %3931 = vadd.xlane.f32.xlu0 %v3901_v21 }
 0xb48   :  { %7108 = vmatpush3.bf16.msra.mxu1 %v7105_v5  ;;  %v7810_v5 = vld [vmem:[#allocation5 + $0x48] sm:$0xff] }
 0xb74   :  { %3689 = vxpose.xlu0.b32.start [1/16] (narrow) %v9791_v44, 8 }
 0xb78   :  { %3690 = vxpose.xlu0.b32.cont [2/16] (narrow) %v9789_v53, 8 }
 0xb7c   :  { %3691 = vxpose.xlu0.b32.cont [3/16] (narrow) %v9795_v11, 8 }
 0xb80   :  { %3692 = vxpose.xlu0.b32.cont [4/16] (narrow) %v9793_v23, 8 }
 0xb84   :  { %3693 = vxpose.xlu0.b32.cont [5/16] (narrow) %v9799_v34, 8 }
 0xb88   :  { %3694 = vxpose.xlu0.b32.cont [6/16] (narrow) %v9797_v61, 8 }
 0xb8c   :  { %3695 = vxpose.xlu0.b32.cont [7/16] (narrow) %v9803_v27, 8 }
 0xb90   :  { %3696 = vxpose.xlu0.b32.cont [8/16] (narrow) %v9801_v33, 8 }
 0xb94   :  { %3697 = vxpose.xlu0.b32.cont [9/16] (narrow) %v9807_v6, 8 }
 0xb98   :  { %3698 = vxpose.xlu0.b32.cont [10/16] (narrow) %v9805_v52, 8 }
 0xb9c   :  { %3699 = vxpose.xlu0.b32.cont [11/16] (narrow) %v9811_v24, 8 }
 0xba0   :  { %3700 = vxpose.xlu0.b32.cont [12/16] (narrow) %v9809_v40, 8 }
 0xba4   :  { %3701 = vxpose.xlu0.b32.cont [13/16] (narrow) %v9815_v55, 8  ;;  %v7802_v55 = vld [vmem:[#allocation5 + $0x8] sm:$0xff] }
 0xba8   :  { %3702 = vxpose.xlu0.b32.cont [14/16] (narrow) %v9813_v26, 8 }
 0xbac   :  { %3703 = vxpose.xlu0.b32.cont [15/16] (narrow) %v9819_v20, 8 }
 0xbb0   :  { %3704 = vxpose.xlu0.b32.end [16/16] (narrow) %v9817_v7, 8 }
 0xbb7   :  { %v3906_v11 = vpop.xlane.xlu1 %3905 }
 0xbb8   :  { %v3904_v30 = vpop.xlane.xlu0 %3903 }
 0xbbb   :  { %v3910_v52 = vpop.xlane.xlu1 %3909 }
 0xbbc   :  { %v3908_v28 = vpop.xlane.xlu0 %3907 }
 0xbbf   :  { %v3914_v59 = vpop.xlane.xlu1 %3913 }
 0xbc0   :  { %v3912_v51 = vpop.xlane.xlu0 %3911 }
 0xbc3   :  { %v3918_v49 = vpop.xlane.xlu1 %3917 }
 0xbc4   :  { %v3916_v62 = vpop.xlane.xlu0 %3915 }
 0xbc7   :  { %v3922_v42 = vpop.xlane.xlu1 %3921 }
 0xbc8   :  { %v3920_v16 = vpop.xlane.xlu0 %3919 }
 0xbcb   :  { %v3926_v12 = vpop.xlane.xlu1 %3925 }
 0xbcc   :  { %v9856_v53 = vpop.xlane.xlu0 %3923 }
 0xbd0   :  { %v9858_v44 = vpop.xlane.xlu0 %3927 }
 0xbd4   :  { %v9860_v23 = vpop.xlane.xlu0 %3931 }
 0xbf4   :  { %v3705_v61 = vpop.trf.xlu0 }
 0xbf5   :  { %v9863_v34 = vrot.slane %v3705_v61, %v10146_v35 }
 0xbf7   :  { %v3940_v33 = vadd.f32 %v9863_v34, %v3906_v11  ;;  %v3939_v27 = vadd.f32 %v9863_v34, %v3904_v30  ;;  %v3942_v24 = vadd.f32 %v9863_v34, %v3910_v52  ;;  %v3941_v17 = vadd.f32 %v9863_v34, %v3908_v28  ;;  %v7811_v11 = vld [vmem:[#allocation5 + $0x40] sm:$0xff] }
 0xbf8   :  { %v3944_v4 = vadd.f32 %v9863_v34, %v3914_v59  ;;  %v3943_v0 = vadd.f32 %v9863_v34, %v3912_v51  ;;  %v3946_v9 = vadd.f32 %v9863_v34, %v3918_v49  ;;  %v3945_v45 = vadd.f32 %v9863_v34, %v3916_v62 }
 0xbf9   :  { %v3956_v6 = vmul.f32 0.2, %v3940_v33  ;;  %v3955_v40 = vmul.f32 0.2, %v3939_v27  ;;  %v3958_v20 = vmul.f32 0.2, %v3942_v24  ;;  %v3948_v57 = vadd.f32 %v9863_v34, %v3922_v42 }
 0xbfa   :  { %v3957_v47 = vmul.f32 0.2, %v3941_v17  ;;  %v3960_v8 = vmul.f32 0.2, %v3944_v4  ;;  %v3959_v54 = vmul.f32 0.2, %v3943_v0  ;;  %v3947_v1 = vadd.f32 %v9863_v34, %v3920_v16  ;;  %v3930_v16 = vpop.xlane.xlu1 %3929 }
 0xbfb   :  { %v3972_v26 = vmax.f32 %v3940_v33, %v3956_v6  ;;  %v3971_v7 = vmax.f32 %v3939_v27, %v3955_v40  ;;  %v3974_v60 = vmax.f32 %v3942_v24, %v3958_v20  ;;  %v3962_v15 = vmul.f32 0.2, %v3946_v9  ;;  %v7812_v6 = vld [vmem:[#allocation5 + $0x58] sm:$0xff] }
 0xbfc   :  { %v3973_v56 = vmax.f32 %v3941_v17, %v3957_v47  ;;  %v3976_v3 = vmax.f32 %v3944_v4, %v3960_v8  ;;  %v3975_v14 = vmax.f32 %v3943_v0, %v3959_v54  ;;  %v3961_v32 = vmul.f32 0.2, %v3945_v45  ;;  %v7817_v54 = vld [vmem:[#allocation5 + $0x78] sm:$0xff] }
 0xbfd   :  { %v9868_v25 = vadd.f32 %v7802_v55, %v3972_v26  ;;  %v9872_v43 = vadd.f32 %v7803_v13, %v3971_v7  ;;  %v9876_v48 = vadd.f32 %v7804_v39, %v3974_v60  ;;  %v3978_v63 = vmax.f32 %v3946_v9, %v3962_v15  ;;  %v7813_v55 = vld [vmem:[#allocation5 + $0x50] sm:$0xff]  ;;  %v7814_v60 = vld [vmem:[#allocation5 + $0x68] sm:$0xff] }
 0xbfe   :  { %v9880_v36 = vadd.f32 %v7805_v19, %v3973_v56  ;;  %v9884_v2 = vadd.f32 %v7806_v50, %v3976_v3  ;;  %v9888_v10 = vadd.f32 %v7807_v46, %v3975_v14  ;;  %v3977_v58 = vmax.f32 %v3945_v45, %v3961_v32  ;;  %v3934_v13 = vpop.xlane.xlu1 %3933  ;;  %v7815_v56 = vld [vmem:[#allocation5 + $0x60] sm:$0xff] }
 0xbff   :  { %4005 = vmax.xlane.f32.xlu1 %v9868_v25  ;;  %v9892_v31 = vadd.f32 %v7808_v37, %v3978_v63  ;;  %v3964_v41 = vmul.f32 0.2, %v3948_v57  ;;  %v3963_v38 = vmul.f32 0.2, %v3947_v1  ;;  %v3950_v21 = vadd.f32 %v9863_v34, %v3926_v12 }
 0xc00   :  { %v9896_v29 = vadd.f32 %v7809_v22, %v3977_v58  ;;  %v3949_v62 = vadd.f32 %v9863_v34, %v9856_v53  ;;  %v3952_v52 = vadd.f32 %v9863_v34, %v3930_v16  ;;  %v3951_v53 = vadd.f32 %v9863_v34, %v9858_v44 }
 0xc01   :  { %v3980_v18 = vmax.f32 %v3948_v57, %v3964_v41  ;;  %v3979_v28 = vmax.f32 %v3947_v1, %v3963_v38  ;;  %v3966_v51 = vmul.f32 0.2, %v3950_v21  ;;  %v3953_v59 = vadd.f32 %v9863_v34, %v9860_v23  ;;  %v7816_v23 = vld [vmem:[#allocation5 + $0x70] sm:$0xff] }
 0xc02   :  { %v3965_v27 = vmul.f32 0.2, %v3949_v62  ;;  %v3968_v26 = vmul.f32 0.2, %v3952_v52  ;;  %v3967_v17 = vmul.f32 0.2, %v3951_v53  ;;  %v3954_v44 = vadd.f32 %v9863_v34, %v3934_v13 }
 0xc03   :  { %4003 = vmax.xlane.f32.xlu1 %v9872_v43  ;;  %v9900_v30 = vadd.f32 %v7810_v5, %v3980_v18  ;;  %v9905_v61 = vadd.f32 %v7811_v11, %v3979_v28  ;;  %v3982_v33 = vmax.f32 %v3950_v21, %v3966_v51  ;;  %v3969_v39 = vmul.f32 0.2, %v3953_v59 }
 0xc04   :  { %v3981_v24 = vmax.f32 %v3949_v62, %v3965_v27  ;;  %v3984_v20 = vmax.f32 %v3952_v52, %v3968_v26  ;;  %v3983_v4 = vmax.f32 %v3951_v53, %v3967_v17  ;;  %v3970_v49 = vmul.f32 0.2, %v3954_v44 }
 0xc05   :  { %v9909_v40 = vadd.f32 %v7812_v6, %v3982_v33  ;;  %v3985_v0 = vmax.f32 %v3953_v59, %v3969_v39 }
 0xc06   :  { %v9914_v7 = vadd.f32 %v7813_v55, %v3981_v24  ;;  %v9919_v47 = vadd.f32 %v7814_v60, %v3984_v20  ;;  %v9923_v8 = vadd.f32 %v7815_v56, %v3983_v4  ;;  %v3986_v3 = vmax.f32 %v3954_v44, %v3970_v49 }
 0xc07   :  { %4009 = vmax.xlane.f32.xlu1 %v9876_v48  ;;  %v9926_v19 = vadd.f32 %v7816_v23, %v3985_v0 }
 0xc08   :  { %v9929_v9 = vadd.f32 %v7817_v54, %v3986_v3 }
 0xc0b   :  { %4007 = vmax.xlane.f32.xlu1 %v9880_v36 }
 0xc0f   :  { %4013 = vmax.xlane.f32.xlu1 %v9884_v2 }
 0xc13   :  { %4011 = vmax.xlane.f32.xlu1 %v9888_v10 }
 0xc17   :  { %4017 = vmax.xlane.f32.xlu1 %v9892_v31 }
 0xc1b   :  { %4015 = vmax.xlane.f32.xlu1 %v9896_v29 }
 0xc1f   :  { %4021 = vmax.xlane.f32.xlu1 %v9900_v30 }
 0xc23   :  { %4019 = vmax.xlane.f32.xlu1 %v9905_v61 }
 0xc27   :  { %4025 = vmax.xlane.f32.xlu1 %v9909_v40 }
 0xc2b   :  { %4023 = vmax.xlane.f32.xlu1 %v9914_v7 }
 0xc2f   :  { %4029 = vmax.xlane.f32.xlu1 %v9919_v47 }
 0xc33   :  { %4027 = vmax.xlane.f32.xlu1 %v9923_v8 }
 0xc37   :  { %4031 = vmax.xlane.f32.xlu1 %v9926_v19 }
 0xc3b   :  { %4033 = vmax.xlane.f32.xlu1 %v9929_v9 }
 0xc8c   :  { %v4006_v34 = vpop.xlane.xlu1 %4005 }
 0xc8d   :  { %v4036_v50 = vsub.f32 %v9868_v25, %v4006_v34 }
 0xc8f   :  { %v4053_v14 = vmul.f32 1.442695, %v4036_v50 }
 0xc90   :  { %v4004_v15 = vpop.xlane.xlu1 %4003 }
 0xc91   :  { %7579 = vpow2.f32 %v4053_v14  ;;  %v4035_v45 = vsub.f32 %v9872_v43, %v4004_v15  ;;  %v4297_v14 = vld [vmem:[#allocation7 + $0x4d8] sm:$0xff]  ;;  %v4299_v15 = vld [vmem:[#allocation7 + $0x4e8] sm:$0xff] }
 0xc93   :  { %v4051_v42 = vmul.f32 1.442695, %v4035_v45 }
 0xc94   :  { %v4010_v46 = vpop.xlane.xlu1 %4009 }
 0xc95   :  { %7581 = vpow2.f32 %v4051_v42  ;;  %v4038_v63 = vsub.f32 %v9876_v48, %v4010_v46  ;;  %v4300_v42 = vld [vmem:[#allocation7 + $0x4f0] sm:$0xff] }
 0xc96   :  { %v7113_v46 = vpack.c.bf16 %v4300_v42, %v4299_v15 }
 0xc97   :  { %v4057_v32 = vmul.f32 1.442695, %v4038_v63  ;;  %v4301_v63 = vld [vmem:[#allocation7 + $0x4f8] sm:$0xff] }
 0xc98   :  { %v4008_v57 = vpop.xlane.xlu1 %4007 }
 0xc99   :  { %7583 = vpow2.f32 %v4057_v32  ;;  %v4037_v37 = vsub.f32 %v9880_v36, %v4008_v57  ;;  %v4302_v32 = vld [vmem:[#allocation7 + $0x500] sm:$0xff] }
 0xc9a   :  { %v7117_v57 = vpack.c.bf16 %v4302_v32, %v4301_v63 }
 0xc9b   :  { %v9936_v58 = vpop.eup %7579  ;;  %v4055_v41 = vmul.f32 1.442695, %v4037_v37  ;;  %v4303_v37 = vld [vmem:[#allocation7 + $0x508] sm:$0xff] }
 0xc9c   :  { %4085 = vadd.xlane.f32.xlu1 %v9936_v58  ;;  %v4014_v25 = vpop.xlane.xlu1 %4013 }
 0xc9d   :  { %7585 = vpow2.f32 %v4055_v41  ;;  %v4040_v1 = vsub.f32 %v9884_v2, %v4014_v25  ;;  %v4304_v41 = vld [vmem:[#allocation7 + $0x510] sm:$0xff] }
 0xc9e   :  { %v7121_v25 = vpack.c.bf16 %v4304_v41, %v4303_v37 }
 0xc9f   :  { %v9940_v43 = vpop.eup %7581  ;;  %v4061_v12 = vmul.f32 1.442695, %v4040_v1  ;;  %v4305_v1 = vld [vmem:[#allocation7 + $0x518] sm:$0xff] }
 0xca0   :  { %4083 = vadd.xlane.f32.xlu1 %v9940_v43  ;;  %v4012_v48 = vpop.xlane.xlu1 %4011 }
 0xca1   :  { %7587 = vpow2.f32 %v4061_v12  ;;  %v4039_v22 = vsub.f32 %v9888_v10, %v4012_v48  ;;  %v4306_v12 = vld [vmem:[#allocation7 + $0x520] sm:$0xff] }
 0xca2   :  { %v7125_v48 = vpack.c.bf16 %v4306_v12, %v4305_v1  ;;  %v4559_v12 = vld [vmem:[#allocation7 + $0x560] sm:$0xff] }
 0xca3   :  { %v9944_v18 = vpop.eup %7583  ;;  %v4059_v36 = vmul.f32 1.442695, %v4039_v22  ;;  %v4307_v22 = vld [vmem:[#allocation7 + $0x528] sm:$0xff] }
 0xca4   :  { %4089 = vadd.xlane.f32.xlu1 %v9944_v18  ;;  %v4018_v38 = vpop.xlane.xlu1 %4017 }
 0xca5   :  { %7589 = vpow2.f32 %v4059_v36  ;;  %v4042_v21 = vsub.f32 %v9892_v31, %v4018_v38  ;;  %v4308_v36 = vld [vmem:[#allocation7 + $0x530] sm:$0xff] }
 0xca6   :  { %v7129_v38 = vpack.c.bf16 %v4308_v36, %v4307_v22 }
 0xca7   :  { %v9948_v5 = vpop.eup %7585  ;;  %v4065_v2 = vmul.f32 1.442695, %v4042_v21  ;;  %v4309_v21 = vld [vmem:[#allocation7 + $0x538] sm:$0xff] }
 0xca8   :  { %4087 = vadd.xlane.f32.xlu1 %v9948_v5  ;;  %v4016_v28 = vpop.xlane.xlu1 %4015 }
 0xca9   :  { %7591 = vpow2.f32 %v4065_v2  ;;  %v4041_v51 = vsub.f32 %v9896_v29, %v4016_v28  ;;  %v4310_v2 = vld [vmem:[#allocation7 + $0x540] sm:$0xff] }
 0xcaa   :  { %v7133_v28 = vpack.c.bf16 %v4310_v2, %v4309_v21  ;;  %v4564_v21 = vld [vmem:[#allocation7 + $0x588] sm:$0xff] }
 0xcab   :  { %v9952_v62 = vpop.eup %7587  ;;  %v4063_v10 = vmul.f32 1.442695, %v4041_v51 }
 0xcac   :  { %4093 = vadd.xlane.f32.xlu1 %v9952_v62  ;;  %v4022_v16 = vpop.xlane.xlu1 %4021 }
 0xcad   :  { %7593 = vpow2.f32 %v4063_v10  ;;  %v4044_v11 = vsub.f32 %v9900_v30, %v4022_v16 }
 0xcaf   :  { %v9956_v33 = vpop.eup %7589  ;;  %v4069_v31 = vmul.f32 1.442695, %v4044_v11 }
 0xcb0   :  { %4091 = vadd.xlane.f32.xlu1 %v9956_v33  ;;  %v4020_v27 = vpop.xlane.xlu1 %4019 }
 0xcb1   :  { %7595 = vpow2.f32 %v4069_v31  ;;  %v4043_v52 = vsub.f32 %v9905_v61, %v4020_v27 }
 0xcb3   :  { %v9960_v6 = vpop.eup %7591  ;;  %v4067_v29 = vmul.f32 1.442695, %v4043_v52 }
 0xcb4   :  { %4097 = vadd.xlane.f32.xlu1 %v9960_v6  ;;  %v4026_v24 = vpop.xlane.xlu1 %4025 }
 0xcb5   :  { %7597 = vpow2.f32 %v4067_v29  ;;  %v4046_v26 = vsub.f32 %v9909_v40, %v4026_v24 }
 0xcb7   :  { %v9964_v53 = vpop.eup %7593  ;;  %v4073_v30 = vmul.f32 1.442695, %v4046_v26 }
 0xcb8   :  { %4095 = vadd.xlane.f32.xlu1 %v9964_v53  ;;  %v4024_v55 = vpop.xlane.xlu1 %4023 }
 0xcb9   :  { %7599 = vpow2.f32 %v4073_v30  ;;  %v4045_v20 = vsub.f32 %v9914_v7, %v4024_v55 }
 0xcbb   :  { %v9968_v17 = vpop.eup %7595  ;;  %v4071_v61 = vmul.f32 1.442695, %v4045_v20 }
 0xcbc   :  { %4101 = vadd.xlane.f32.xlu1 %v9968_v17  ;;  %v4030_v59 = vpop.xlane.xlu1 %4029 }
 0xcbd   :  { %7601 = vpow2.f32 %v4071_v61  ;;  %v4048_v13 = vsub.f32 %v9919_v47, %v4030_v59 }
 0xcbf   :  { %v9972_v60 = vpop.eup %7597  ;;  %v4077_v40 = vmul.f32 1.442695, %v4048_v13 }
 0xcc0   :  { %4099 = vadd.xlane.f32.xlu1 %v9972_v60  ;;  %v4028_v4 = vpop.xlane.xlu1 %4027 }
 0xcc1   :  { %7603 = vpow2.f32 %v4077_v40  ;;  %v4047_v39 = vsub.f32 %v9923_v8, %v4028_v4 }
 0xcc3   :  { %v9976_v44 = vpop.eup %7599  ;;  %v4075_v7 = vmul.f32 1.442695, %v4047_v39 }
 0xcc4   :  { %4105 = vadd.xlane.f32.xlu0 %v9976_v44  ;;  %v4032_v56 = vpop.xlane.xlu1 %4031 }
 0xcc5   :  { %7605 = vpow2.f32 %v4075_v7  ;;  %v4049_v0 = vsub.f32 %v9926_v19, %v4032_v56 }
 0xcc7   :  { %v9980_v49 = vpop.eup %7601  ;;  %v4079_v47 = vmul.f32 1.442695, %v4049_v0 }
 0xcc8   :  { %4103 = vadd.xlane.f32.xlu1 %v9980_v49  ;;  %v4034_v23 = vpop.xlane.xlu1 %4033 }
 0xcc9   :  { %7607 = vpow2.f32 %v4079_v47  ;;  %v4050_v3 = vsub.f32 %v9929_v9, %v4034_v23  ;;  %v4298_v9 = vld [vmem:[#allocation7 + $0x4e0] sm:$0xff] }
 0xcca   :  { %v7109_v45 = vpack.c.bf16 %v4298_v9, %v4297_v14 }
 0xccb   :  { %v9984_v54 = vpop.eup %7603  ;;  %v4081_v8 = vmul.f32 1.442695, %v4050_v3 }
 0xccc   :  { %4109 = vadd.xlane.f32.xlu1 %v9984_v54  ;;  %7110 = vmatprep.subr.bf16.mxu0 %v7109_v45 }
 0xccd   :  { %7609 = vpow2.f32 %v4081_v8  ;;  %7112 = vmatpush3.bf16.msra.mxu0 %v7109_v45 }
 0xcce   :  { %7114 = vmatprep.subr.bf16.mxu0 %v7113_v46 }
 0xccf   :  { %v9987_v34 = vpop.eup %7605 }
 0xcd0   :  { %4107 = vadd.xlane.f32.xlu1 %v9987_v34 }
 0xcd1   :  { %7116 = vmatpush3.bf16.msra.mxu0 %v7113_v46 }
 0xcd2   :  { %7118 = vmatprep.subr.bf16.mxu0 %v7117_v57 }
 0xcd3   :  { %v9990_v19 = vpop.eup %7607 }
 0xcd4   :  { %4111 = vadd.xlane.f32.xlu1 %v9990_v19 }
 0xcd5   :  { %7120 = vmatpush3.bf16.msra.mxu0 %v7117_v57 }
 0xcd6   :  { %7122 = vmatprep.subr.bf16.mxu0 %v7121_v25 }
 0xcd7   :  { %v9993_v50 = vpop.eup %7609 }
 0xcd8   :  { %4113 = vadd.xlane.f32.xlu1 %v9993_v50 }
 0xcd9   :  { %7124 = vmatpush3.bf16.msra.mxu0 %v7121_v25  ;;  %v4312_v25 = vld [vmem:[#allocation7 + $0x550] sm:$0xff] }
 0xcda   :  { %7126 = vmatprep.subr.bf16.mxu0 %v7125_v48 }
 0xcdd   :  { %7128 = vmatpush3.bf16.msra.mxu0 %v7125_v48  ;;  %v4560_v48 = vld [vmem:[#allocation7 + $0x568] sm:$0xff] }
 0xcde   :  { %7130 = vmatprep.subr.bf16.mxu0 %v7129_v38  ;;  %v7141_v22 = vpack.c.bf16 %v4560_v48, %v4559_v12  ;;  %v4825_v48 = vld [vmem:[#allocation7 + $0x608] sm:$0xff] }
 0xce0   :  { %7142 = vmatprep.subr.bf16.mxu1 %v7141_v22 }
 0xce1   :  { %7132 = vmatpush3.bf16.msra.mxu0 %v7129_v38  ;;  %v4563_v38 = vld [vmem:[#allocation7 + $0x580] sm:$0xff] }
 0xce2   :  { %7134 = vmatprep.subr.bf16.mxu0 %v7133_v28 }
 0xce5   :  { %7136 = vmatpush3.bf16.msra.mxu0 %v7133_v28 }
 0xd29   :  { %v4086_v51 = vpop.xlane.xlu1 %4085 }
 0xd2a   :  { %7611 = vrcp.f32 %v4086_v51 }
 0xd2d   :  { %v4084_v10 = vpop.xlane.xlu1 %4083 }
 0xd2e   :  { %7613 = vrcp.f32 %v4084_v10 }
 0xd31   :  { %v4090_v16 = vpop.xlane.xlu1 %4089 }
 0xd32   :  { %7615 = vrcp.f32 %v4090_v16 }
 0xd34   :  { %v7612_v31 = vpop.eup %7611 }
 0xd35   :  { %v4088_v11 = vpop.xlane.xlu1 %4087  ;;  %v4118_v24 = vmul.f32 %v7612_v31, %v9936_v58 }
 0xd36   :  { %7617 = vrcp.f32 %v4088_v11 }
 0xd38   :  { %v7614_v27 = vpop.eup %7613 }
 0xd39   :  { %v4094_v52 = vpop.xlane.xlu1 %4093  ;;  %v4116_v29 = vmul.f32 %v7614_v27, %v9940_v43 }
 0xd3a   :  { %7619 = vrcp.f32 %v4094_v52 }
 0xd3b   :  { %6469 = vmatprep.mubr.f32.mxu1 %v4116_v29 }
 0xd3c   :  { %6470 = vmatmul.mubr.f32.vlgmr.msra.gmra.mrb[64].mxu1 %v4118_v24  ;;  %v7616_v30 = vpop.eup %7615 }
 0xd3d   :  { %v4092_v26 = vpop.xlane.xlu1 %4091  ;;  %v4122_v59 = vmul.f32 %v7616_v30, %v9944_v18  ;;  %7144 = vmatpush3.bf16.msra.mxu1 %v7141_v22 }
 0xd3e   :  { %7621 = vrcp.f32 %v4092_v26 }
 0xd40   :  { %v7618_v55 = vpop.eup %7617 }
 0xd41   :  { %v4098_v20 = vpop.xlane.xlu1 %4097  ;;  %v4120_v61 = vmul.f32 %v7618_v55, %v9948_v5 }
 0xd42   :  { %7623 = vrcp.f32 %v4098_v20 }
 0xd43   :  { %6472 = vmatprep.mubr.f32.mxu1 %v4120_v61 }
 0xd44   :  { %6473 = vmatmul.mubr.f32.gmra.mrb[66].mxu1 %v4122_v59  ;;  %v7620_v43 = vpop.eup %7619 }
 0xd45   :  { %v4096_v13 = vpop.xlane.xlu1 %4095  ;;  %v4126_v39 = vmul.f32 %v7620_v43, %v9952_v62 }
 0xd46   :  { %7625 = vrcp.f32 %v4096_v13 }
 0xd48   :  { %v7622_v40 = vpop.eup %7621 }
 0xd49   :  { %v4102_v58 = vpop.xlane.xlu1 %4101  ;;  %v4124_v4 = vmul.f32 %v7622_v40, %v9956_v33 }
 0xd4a   :  { %7627 = vrcp.f32 %v4102_v58 }
 0xd4b   :  { %6475 = vmatprep.mubr.f32.mxu1 %v4124_v4 }
 0xd4c   :  { %6476 = vmatmul.mubr.f32.gmra.mrb[68].mxu1 %v4126_v39  ;;  %v7624_v5 = vpop.eup %7623 }
 0xd4d   :  { %v4100_v7 = vpop.xlane.xlu1 %4099  ;;  %v4130_v47 = vmul.f32 %v7624_v5, %v9960_v6 }
 0xd4e   :  { %7629 = vrcp.f32 %v4100_v7 }
 0xd50   :  { %v7626_v56 = vpop.eup %7625 }
 0xd51   :  { %v4128_v18 = vmul.f32 %v7626_v56, %v9964_v53  ;;  %v4106_v0 = vpop.xlane.xlu0 %4105 }
 0xd52   :  { %7631 = vrcp.f32 %v4106_v0 }
 0xd53   :  { %6478 = vmatprep.mubr.f32.mxu1 %v4128_v18 }
 0xd54   :  { %6479 = vmatmul.mubr.f32.gmra.mrb[70].mxu1 %v4130_v47  ;;  %v7628_v33 = vpop.eup %7627 }
 0xd55   :  { %v4104_v23 = vpop.xlane.xlu1 %4103  ;;  %v4134_v14 = vmul.f32 %v7628_v33, %v9968_v17 }
 0xd56   :  { %7633 = vrcp.f32 %v4104_v23 }
 0xd58   :  { %v7630_v3 = vpop.eup %7629 }
 0xd59   :  { %v4110_v62 = vpop.xlane.xlu1 %4109  ;;  %v4132_v8 = vmul.f32 %v7630_v3, %v9972_v60 }
 0xd5a   :  { %7635 = vrcp.f32 %v4110_v62 }
 0xd5b   :  { %6481 = vmatprep.mubr.f32.mxu1 %v4132_v8  ;;  %v4565_v8 = vld [vmem:[#allocation7 + $0x590] sm:$0xff] }
 0xd5c   :  { %6482 = vmatmul.mubr.f32.gmra.mrb[72].mxu1 %v4134_v14  ;;  %v7632_v53 = vpop.eup %7631  ;;  %v4566_v14 = vld [vmem:[#allocation7 + $0x598] sm:$0xff] }
 0xd5d   :  { %v4108_v9 = vpop.xlane.xlu1 %4107  ;;  %v4138_v42 = vmul.f32 %v7632_v53, %v9976_v44  ;;  %v4311_v44 = vld [vmem:[#allocation7 + $0x548] sm:$0xff]  ;;  %v7153_v53 = vpack.c.bf16 %v4566_v14, %v4565_v8 }
 0xd5e   :  { %7637 = vrcp.f32 %v4108_v9  ;;  %v7137_v1 = vpack.c.bf16 %v4312_v25, %v4311_v44  ;;  %v4567_v9 = vld [vmem:[#allocation7 + $0x5a0] sm:$0xff]  ;;  %v4823_v44 = vld [vmem:[#allocation7 + $0x5f8] sm:$0xff] }
 0xd60   :  { %v7634_v15 = vpop.eup %7633  ;;  %7138 = vmatprep.subr.bf16.mxu0 %v7137_v1 }
 0xd61   :  { %v4112_v6 = vpop.xlane.xlu1 %4111  ;;  %v4136_v45 = vmul.f32 %v7634_v15, %v9980_v49  ;;  %7140 = vmatpush3.bf16.msra.mxu0 %v7137_v1  ;;  %v4568_v15 = vld [vmem:[#allocation7 + $0x5a8] sm:$0xff]  ;;  %v4824_v1 = vld [vmem:[#allocation7 + $0x600] sm:$0xff] }
 0xd62   :  { %7639 = vrcp.f32 %v4112_v6  ;;  %v7157_v6 = vpack.c.bf16 %v4568_v15, %v4567_v9  ;;  %v10013_v12 = vpack.c.bf16 %v4824_v1, %v4823_v44 }
 0xd63   :  { %6484 = vmatprep.mubr.f32.mxu1 %v4136_v45  ;;  %v4569_v45 = vld [vmem:[#allocation7 + $0x5b0] sm:$0xff] }
 0xd64   :  { %6485 = vmatmul.mubr.f32.gmra.mrb[74].mxu1 %v4138_v42  ;;  %v7636_v60 = vpop.eup %7635  ;;  %v4570_v42 = vld [vmem:[#allocation7 + $0x5b8] sm:$0xff] }
 0xd65   :  { %v4114_v46 = vpop.xlane.xlu1 %4113  ;;  %v4142_v32 = vmul.f32 %v7636_v60, %v9984_v54  ;;  %v4562_v54 = vld [vmem:[#allocation7 + $0x578] sm:$0xff]  ;;  %v4571_v60 = vld [vmem:[#allocation7 + $0x5c0] sm:$0xff] }
 0xd66   :  { %7641 = vrcp.f32 %v4114_v46  ;;  %v7161_v46 = vpack.c.bf16 %v4570_v42, %v4569_v45 }
 0xd68   :  { %v7638_v63 = vpop.eup %7637 }
 0xd69   :  { %v4140_v17 = vmul.f32 %v7638_v63, %v9987_v34  ;;  %v4561_v34 = vld [vmem:[#allocation7 + $0x570] sm:$0xff]  ;;  %v4572_v63 = vld [vmem:[#allocation7 + $0x5c8] sm:$0xff] }
 0xd6a   :  { %v7145_v36 = vpack.c.bf16 %v4562_v54, %v4561_v34  ;;  %v4826_v34 = vld [vmem:[#allocation7 + $0x610] sm:$0xff]  ;;  %v4313_v54 = vld [vmem:[#allocation7 + $0x558] sm:$0xff] }
 0xd6b   :  { %6487 = vmatprep.mubr.f32.mxu1 %v4140_v17  ;;  %v7165_v17 = vpack.c.bf16 %v4572_v63, %v4571_v60  ;;  %v10016_v22 = vpack.c.bf16 %v4826_v34, %v4825_v48 }
 0xd6c   :  { %v7640_v57 = vpop.eup %7639  ;;  %6488 = vmatmul.mubr.f32.gmra.mrb[76].mxu1 %v4142_v32  ;;  %7146 = vmatprep.subr.bf16.mxu1 %v7145_v36  ;;  %v4573_v32 = vld [vmem:[#allocation7 + $0x5d0] sm:$0xff] }
 0xd6d   :  { %v4144_v37 = vmul.f32 %v7640_v57, %v9990_v19  ;;  %v7149_v19 = vpack.c.bf16 %v4564_v21, %v4563_v38  ;;  %7148 = vmatpush3.bf16.msra.mxu1 %v7145_v36  ;;  %v4574_v57 = vld [vmem:[#allocation7 + $0x5d8] sm:$0xff]  ;;  %v10022_v36 = vrot.slane %v4313_v54, %v10146_v35 }
 0xd6f   :  { %6490 = vmatprep.mubr.f32.mxu1 %v4144_v37  ;;  %7150 = vmatprep.subr.bf16.mxu1 %v7149_v19  ;;  %v7169_v37 = vpack.c.bf16 %v4574_v57, %v4573_v32 }
 0xd70   :  { %v7642_v49 = vpop.eup %7641 }
 0xd71   :  { %v4146_v41 = vmul.f32 %v7642_v49, %v9993_v50  ;;  %7152 = vmatpush3.bf16.msra.mxu1 %v7149_v19  ;;  %v4147_v50 = vld [vmem:[#allocation7 + $0x4d0] sm:$0xff]  ;;  %v4821_v49 = vld [vmem:[#allocation7 + $0x5e8] sm:$0xff] }
 0xd72   :  { %v4151_v2 = vrot.slane %v4147_v50, %v10146_v35  ;;  %7154 = vmatprep.subr.bf16.mxu1 %v7153_v53 }
 0xd73   :  { %6491 = vmatmul.mubr.f32.gmra.mrb[78].mxu1 %v4146_v41  ;;  %v4822_v41 = vld [vmem:[#allocation7 + $0x5f0] sm:$0xff] }
 0xd74   :  { %v7173_v25 = vpack.c.bf16 %v4822_v41, %v4821_v49 }
 0xd75   :  { %7156 = vmatpush3.bf16.msra.mxu1 %v7153_v53 }
 0xd76   :  { %7158 = vmatprep.subr.bf16.mxu1 %v7157_v6  ;;  %7174 = vmatprep.subr.bf16.mxu0 %v7173_v25 }
 0xd79   :  { %7160 = vmatpush3.bf16.msra.mxu1 %v7157_v6 }
 0xd7a   :  { %7162 = vmatprep.subr.bf16.mxu1 %v7161_v46 }
 0xd7d   :  { %7164 = vmatpush3.bf16.msra.mxu1 %v7161_v46 }
 0xd7e   :  { %7166 = vmatprep.subr.bf16.mxu1 %v7165_v17 }
 0xd81   :  { %7168 = vmatpush3.bf16.msra.mxu1 %v7165_v17 }
 0xd82   :  { %7170 = vmatprep.subr.bf16.mxu1 %v7169_v37 }
 0xd85   :  { %7172 = vmatpush3.bf16.msra.mxu1 %v7169_v37 }
 0xd86   :  { %7205 = vmatprep.subr.bf16.mxu1 %v7173_v25 }
 0xe0f   :  { %v6471_v28 = vpop.f32.mrb[64].mxu1 }
 0xe10   :  { %v4218_v51 = vpop.f32.mrb[65].mxu1  ;;  %v4224_v16 = vadd.f32 %v6471_v28, %v4151_v2 }
 0xe11   :  { %v4219_v10 = vadd.f32 %v4218_v51, %v4151_v2 }
 0xe13   :  { %6525 = vmatprep.mubr.f32.mxu0 %v4219_v10 }
 0xe14   :  { %6526 = vmatmul.mubr.f32.vlgmr.msra.gmra.mrb[112].mxu0 %v4224_v16 }
 0xe15   :  { %7176 = vmatpush3.bf16.msra.mxu0 %v7173_v25 }
 0xe16   :  { %7178 = vmatprep.subr.bf16.mxu0 %v10013_v12 }
 0xe17   :  { %v6474_v11 = vpop.f32.mrb[66].mxu1 }
 0xe18   :  { %v4228_v31 = vpop.f32.mrb[67].mxu1  ;;  %v4234_v52 = vadd.f32 %v6474_v11, %v4151_v2 }
 0xe19   :  { %v4229_v27 = vadd.f32 %v4228_v31, %v4151_v2  ;;  %7180 = vmatpush3.bf16.msra.mxu0 %v10013_v12 }
 0xe1a   :  { %7182 = vmatprep.subr.bf16.mxu0 %v10016_v22 }
 0xe1b   :  { %6528 = vmatprep.mubr.f32.mxu0 %v4229_v27 }
 0xe1c   :  { %6529 = vmatmul.mubr.f32.gmra.mrb[114].mxu0 %v4234_v52 }
 0xe1d   :  { %7184 = vmatpush3.bf16.msra.mxu0 %v10016_v22 }
 0xe1f   :  { %v6477_v29 = vpop.f32.mrb[68].mxu1 }
 0xe20   :  { %v4238_v24 = vpop.f32.mrb[69].mxu1  ;;  %v4244_v30 = vadd.f32 %v6477_v29, %v4151_v2 }
 0xe21   :  { %v4239_v26 = vadd.f32 %v4238_v24, %v4151_v2 }
 0xe23   :  { %6531 = vmatprep.mubr.f32.mxu0 %v4239_v26 }
 0xe24   :  { %6532 = vmatmul.mubr.f32.gmra.mrb[116].mxu0 %v4244_v30 }
 0xe27   :  { %v6480_v55 = vpop.f32.mrb[70].mxu1 }
 0xe28   :  { %v4248_v20 = vpop.f32.mrb[71].mxu1  ;;  %v4254_v59 = vadd.f32 %v6480_v55, %v4151_v2 }
 0xe29   :  { %v4249_v61 = vadd.f32 %v4248_v20, %v4151_v2 }
 0xe2b   :  { %6534 = vmatprep.mubr.f32.mxu0 %v4249_v61 }
 0xe2c   :  { %6535 = vmatmul.mubr.f32.gmra.mrb[118].mxu0 %v4254_v59 }
 0xe2f   :  { %v6483_v13 = vpop.f32.mrb[72].mxu1 }
 0xe30   :  { %v4258_v43 = vpop.f32.mrb[73].mxu1  ;;  %v4264_v58 = vadd.f32 %v6483_v13, %v4151_v2 }
 0xe31   :  { %v4259_v40 = vadd.f32 %v4258_v43, %v4151_v2 }
 0xe33   :  { %6537 = vmatprep.mubr.f32.mxu0 %v4259_v40 }
 0xe34   :  { %6538 = vmatmul.mubr.f32.gmra.mrb[120].mxu0 %v4264_v58 }
 0xe37   :  { %v6486_v4 = vpop.f32.mrb[74].mxu1 }
 0xe38   :  { %v4268_v39 = vpop.f32.mrb[75].mxu1  ;;  %v4274_v5 = vadd.f32 %v6486_v4, %v4151_v2 }
 0xe39   :  { %v4269_v7 = vadd.f32 %v4268_v39, %v4151_v2 }
 0xe3b   :  { %6540 = vmatprep.mubr.f32.mxu0 %v4269_v7 }
 0xe3c   :  { %6541 = vmatmul.mubr.f32.gmra.mrb[122].mxu0 %v4274_v5 }
 0xe3f   :  { %v6489_v56 = vpop.f32.mrb[76].mxu1 }
 0xe40   :  { %v4278_v18 = vpop.f32.mrb[77].mxu1  ;;  %v4284_v47 = vadd.f32 %v6489_v56, %v4151_v2 }
 0xe41   :  { %v4279_v0 = vadd.f32 %v4278_v18, %v4151_v2 }
 0xe43   :  { %6543 = vmatprep.mubr.f32.mxu0 %v4279_v0 }
 0xe44   :  { %6544 = vmatmul.mubr.f32.gmra.mrb[124].mxu0 %v4284_v47 }
 0xe46   :  { %v6492_v23 = vpop.f32.mrb[78].mxu1 }
 0xe47   :  { %v4288_v33 = vpop.f32.mrb[79].mxu1  ;;  %v4294_v62 = vadd.f32 %v6492_v23, %v4151_v2 }
 0xe48   :  { %v4289_v3 = vadd.f32 %v4288_v33, %v4151_v2 }
 0xe4a   :  { %6546 = vmatprep.mubr.f32.mxu0 %v4289_v3 }
 0xe4b   :  { %6547 = vmatmul.mubr.f32.gmra.mrb[126].mxu0 %v4294_v62 }
 0xee7   :  { %v6527_v38 = vpop.f32.mrb[112].mxu0 }
 0xee8   :  { %v4390_v21 = vadd.f32 %v6527_v38, %v10022_v36  ;;  %v4384_v19 = vpop.f32.mrb[113].mxu0 }
 0xee9   :  { %v4385_v50 = vadd.f32 %v4384_v19, %v10022_v36 }
 0xeea   :  { %v4480_v2 = vmin.f32 %v4390_v21, 0.0  ;;  %vm4464_vm1 = vcmp.gt.f32.partialorder %v4390_v21, 0.0 }
 0xeeb   :  { %v4479_v28 = vmin.f32 %v4385_v50, 0.0  ;;  %vm4463_vm0 = vcmp.gt.f32.partialorder %v4385_v50, 0.0 }
 0xeec   :  { %v4497_v51 = vmul.f32 1.442695, %v4480_v2 }
 0xeed   :  { %v4495_v10 = vmul.f32 1.442695, %v4479_v28 }
 0xeee   :  { %7643 = vpow2.f32 %v4497_v51 }
 0xeef   :  { %7645 = vpow2.f32 %v4495_v10  ;;  %v6530_v16 = vpop.f32.mrb[114].mxu0 }
 0xef0   :  { %v4400_v11 = vadd.f32 %v6530_v16, %v10022_v36  ;;  %v4394_v31 = vpop.f32.mrb[115].mxu0 }
 0xef1   :  { %v4395_v27 = vadd.f32 %v4394_v31, %v10022_v36 }
 0xef2   :  { %v4482_v52 = vmin.f32 %v4400_v11, 0.0  ;;  %vm4466_vm3 = vcmp.gt.f32.partialorder %v4400_v11, 0.0 }
 0xef3   :  { %v4481_v29 = vmin.f32 %v4395_v27, 0.0  ;;  %vm4465_vm2 = vcmp.gt.f32.partialorder %v4395_v27, 0.0 }
 0xef4   :  { %v4501_v24 = vmul.f32 1.442695, %v4482_v52 }
 0xef5   :  { %v4499_v26 = vmul.f32 1.442695, %v4481_v29 }
 0xef6   :  { %7647 = vpow2.f32 %v4501_v24 }
 0xef7   :  { %7649 = vpow2.f32 %v4499_v26  ;;  %v6533_v30 = vpop.f32.mrb[116].mxu0 }
 0xef8   :  { %v7644_v55 = vpop.eup %7643  ;;  %v4410_v20 = vadd.f32 %v6533_v30, %v10022_v36  ;;  %v4404_v61 = vpop.f32.mrb[117].mxu0 }
 0xef9   :  { %v7646_v59 = vpop.eup %7645  ;;  %v5118_v13 = vadd.f32 -1.0, %v7644_v55  ;;  %v4405_v43 = vadd.f32 %v4404_v61, %v10022_v36 }
 0xefa   :  { %v4484_v40 = vmin.f32 %v4410_v20, 0.0  ;;  %v5117_v58 = vadd.f32 -1.0, %v7646_v59  ;;  %vm4468_vm5 = vcmp.gt.f32.partialorder %v4410_v20, 0.0 }
 0xefb   :  { %v4483_v4 = vmin.f32 %v4405_v43, 0.0  ;;  %v4544_v5 = vsel %vm4464_vm1, %v4390_v21, %v5118_v13  ;;  %vm4467_vm4 = vcmp.gt.f32.partialorder %v4405_v43, 0.0 }
 0xefc   :  { %v4505_v39 = vmul.f32 1.442695, %v4484_v40  ;;  %v4543_v7 = vsel %vm4463_vm0, %v4385_v50, %v5117_v58 }
 0xefd   :  { %v4503_v56 = vmul.f32 1.442695, %v4483_v4  ;;  %6581 = vmatprep.mubr.f32.mxu1 %v4543_v7 }
 0xefe   :  { %7651 = vpow2.f32 %v4505_v39  ;;  %6582 = vmatmul.mubr.f32.vlgmr.msra.gmra.mrb[80].mxu1 %v4544_v5 }
 0xeff   :  { %7653 = vpow2.f32 %v4503_v56  ;;  %v6536_v18 = vpop.f32.mrb[118].mxu0  ;;  %7213 = vmatpush3.bf16.msra.mxu1 %v7173_v25 }
 0xf00   :  { %v7648_v0 = vpop.eup %7647  ;;  %v4420_v47 = vadd.f32 %v6536_v18, %v10022_v36  ;;  %v4414_v23 = vpop.f32.mrb[119].mxu0  ;;  %7206 = vmatprep.subr.bf16.mxu1 %v10013_v12 }
 0xf01   :  { %v7650_v33 = vpop.eup %7649  ;;  %v4415_v3 = vadd.f32 %v4414_v23, %v10022_v36  ;;  %v5120_v62 = vadd.f32 -1.0, %v7648_v0 }
 0xf02   :  { %v4486_v8 = vmin.f32 %v4420_v47, 0.0  ;;  %v5119_v14 = vadd.f32 -1.0, %v7650_v33  ;;  %vm4470_vm7 = vcmp.gt.f32.partialorder %v4420_v47, 0.0 }
 0xf03   :  { %v4485_v9 = vmin.f32 %v4415_v3, 0.0  ;;  %7214 = vmatpush3.bf16.msra.mxu1 %v10013_v12  ;;  %v4546_v45 = vsel %vm4466_vm3, %v4400_v11, %v5120_v62  ;;  %vm4469_vm6 = vcmp.gt.f32.partialorder %v4415_v3, 0.0 }
 0xf04   :  { %v4509_v53 = vmul.f32 1.442695, %v4486_v8  ;;  %v4545_v15 = vsel %vm4465_vm2, %v4395_v27, %v5119_v14  ;;  %7207 = vmatprep.subr.bf16.mxu1 %v10016_v22 }
 0xf05   :  { %v4507_v6 = vmul.f32 1.442695, %v4485_v9  ;;  %6584 = vmatprep.mubr.f32.mxu1 %v4545_v15 }
 0xf06   :  { %7655 = vpow2.f32 %v4509_v53  ;;  %6585 = vmatmul.mubr.f32.gmra.mrb[82].mxu1 %v4546_v45 }
 0xf07   :  { %7657 = vpow2.f32 %v4507_v6  ;;  %v6539_v42 = vpop.f32.mrb[120].mxu0  ;;  %7215 = vmatpush3.bf16.msra.mxu1 %v10016_v22 }
 0xf08   :  { %v7652_v46 = vpop.eup %7651  ;;  %v4430_v60 = vadd.f32 %v6539_v42, %v10022_v36  ;;  %v4424_v63 = vpop.f32.mrb[121].mxu0 }
 0xf09   :  { %v7654_v17 = vpop.eup %7653  ;;  %v4425_v32 = vadd.f32 %v4424_v63, %v10022_v36  ;;  %v5122_v57 = vadd.f32 -1.0, %v7652_v46 }
 0xf0a   :  { %v4488_v37 = vmin.f32 %v4430_v60, 0.0  ;;  %v5121_v49 = vadd.f32 -1.0, %v7654_v17  ;;  %vm4472_vm9 = vcmp.gt.f32.partialorder %v4430_v60, 0.0 }
 0xf0b   :  { %v4487_v41 = vmin.f32 %v4425_v32, 0.0  ;;  %v4548_v12 = vsel %vm4468_vm5, %v4410_v20, %v5122_v57  ;;  %vm4471_vm8 = vcmp.gt.f32.partialorder %v4425_v32, 0.0  ;;  %v4828_v57 = vld [vmem:[#allocation7 + $0x620] sm:$0xff] }
 0xf0c   :  { %v4513_v44 = vmul.f32 1.442695, %v4488_v37  ;;  %v4547_v25 = vsel %vm4467_vm4, %v4405_v43, %v5121_v49  ;;  %v4829_v37 = vld [vmem:[#allocation7 + $0x628] sm:$0xff] }
 0xf0d   :  { %v4511_v1 = vmul.f32 1.442695, %v4487_v41  ;;  %6587 = vmatprep.mubr.f32.mxu1 %v4547_v25  ;;  %v4830_v41 = vld [vmem:[#allocation7 + $0x630] sm:$0xff]  ;;  %v4831_v25 = vld [vmem:[#allocation7 + $0x638] sm:$0xff] }
 0xf0e   :  { %7659 = vpow2.f32 %v4513_v44  ;;  %6588 = vmatmul.mubr.f32.gmra.mrb[84].mxu1 %v4548_v12  ;;  %v7189_v44 = vpack.c.bf16 %v4830_v41, %v4829_v37 }
 0xf0f   :  { %7661 = vpow2.f32 %v4511_v1  ;;  %v6542_v48 = vpop.f32.mrb[122].mxu0  ;;  %v4832_v1 = vld [vmem:[#allocation7 + $0x640] sm:$0xff] }
 0xf10   :  { %v7656_v34 = vpop.eup %7655  ;;  %v4440_v22 = vadd.f32 %v6542_v48, %v10022_v36  ;;  %v4434_v54 = vpop.f32.mrb[123].mxu0  ;;  %v7193_v12 = vpack.c.bf16 %v4832_v1, %v4831_v25  ;;  %v4833_v48 = vld [vmem:[#allocation7 + $0x648] sm:$0xff] }
 0xf11   :  { %v7658_v38 = vpop.eup %7657  ;;  %v4435_v21 = vadd.f32 %v4434_v54, %v10022_v36  ;;  %v5124_v19 = vadd.f32 -1.0, %v7656_v34  ;;  %v4834_v34 = vld [vmem:[#allocation7 + $0x650] sm:$0xff]  ;;  %v4835_v54 = vld [vmem:[#allocation7 + $0x658] sm:$0xff] }
 0xf12   :  { %v4490_v50 = vmin.f32 %v4440_v22, 0.0  ;;  %v5123_v2 = vadd.f32 -1.0, %v7658_v38  ;;  %vm4474_vm11 = vcmp.gt.f32.partialorder %v4440_v22, 0.0  ;;  %v4836_v38 = vld [vmem:[#allocation7 + $0x660] sm:$0xff] }
 0xf13   :  { %v4489_v28 = vmin.f32 %v4435_v21, 0.0  ;;  %v4550_v11 = vsel %vm4470_vm7, %v4420_v47, %v5124_v19  ;;  %vm4473_vm10 = vcmp.gt.f32.partialorder %v4435_v21, 0.0  ;;  %v4575_v19 = vld [vmem:[#allocation7 + $0x5e0] sm:$0xff] }
 0xf14   :  { %v4517_v51 = vmul.f32 1.442695, %v4490_v50  ;;  %v4549_v10 = vsel %vm4469_vm6, %v4415_v3, %v5123_v2  ;;  %v10045_v50 = vrot.slane %v4575_v19, %v10146_v35 }
 0xf15   :  { %v4515_v16 = vmul.f32 1.442695, %v4489_v28  ;;  %6590 = vmatprep.mubr.f32.mxu1 %v4549_v10 }
 0xf16   :  { %7663 = vpow2.f32 %v4517_v51  ;;  %6591 = vmatmul.mubr.f32.gmra.mrb[86].mxu1 %v4550_v11 }
 0xf17   :  { %7665 = vpow2.f32 %v4515_v16  ;;  %v6545_v31 = vpop.f32.mrb[124].mxu0 }
 0xf18   :  { %v7660_v27 = vpop.eup %7659  ;;  %v4450_v52 = vadd.f32 %v6545_v31, %v10022_v36  ;;  %v4444_v29 = vpop.f32.mrb[125].mxu0 }
 0xf19   :  { %v7662_v24 = vpop.eup %7661  ;;  %v4445_v26 = vadd.f32 %v4444_v29, %v10022_v36  ;;  %v5126_v30 = vadd.f32 -1.0, %v7660_v27 }
 0xf1a   :  { %v4492_v55 = vmin.f32 %v4450_v52, 0.0  ;;  %v5125_v20 = vadd.f32 -1.0, %v7662_v24  ;;  %vm4476_vm13 = vcmp.gt.f32.partialorder %v4450_v52, 0.0 }
 0xf1b   :  { %v4491_v61 = vmin.f32 %v4445_v26, 0.0  ;;  %v4552_v40 = vsel %vm4472_vm9, %v4430_v60, %v5126_v30  ;;  %vm4475_vm12 = vcmp.gt.f32.partialorder %v4445_v26, 0.0 }
 0xf1c   :  { %v4521_v59 = vmul.f32 1.442695, %v4492_v55  ;;  %v4551_v13 = vsel %vm4471_vm8, %v4425_v32, %v5125_v20  ;;  %v4827_v32 = vld [vmem:[#allocation7 + $0x618] sm:$0xff] }
 0xf1d   :  { %v4519_v43 = vmul.f32 1.442695, %v4491_v61  ;;  %6593 = vmatprep.mubr.f32.mxu1 %v4551_v13  ;;  %v7185_v49 = vpack.c.bf16 %v4828_v57, %v4827_v32 }
 0xf1e   :  { %7667 = vpow2.f32 %v4521_v59  ;;  %v6548_v58 = vpop.f32.mrb[126].mxu0  ;;  %6594 = vmatmul.mubr.f32.gmra.mrb[88].mxu1 %v4552_v40 }
 0xf1f   :  { %7669 = vpow2.f32 %v4519_v43  ;;  %v4460_v4 = vadd.f32 %v6548_v58, %v10022_v36  ;;  %v4454_v39 = vpop.f32.mrb[127].mxu0  ;;  %7186 = vmatprep.subr.bf16.mxu0 %v7185_v49  ;;  %7208 = vmatprep.subr.bf16.mxu1 %v7185_v49 }
 0xf20   :  { %v7664_v7 = vpop.eup %7663  ;;  %v4455_v5 = vadd.f32 %v4454_v39, %v10022_v36  ;;  %7188 = vmatpush3.bf16.msra.mxu0 %v7185_v49  ;;  %7216 = vmatpush3.bf16.msra.mxu1 %v7185_v49 }
 0xf21   :  { %v7666_v56 = vpop.eup %7665  ;;  %v4494_v18 = vmin.f32 %v4460_v4, 0.0  ;;  %v5128_v0 = vadd.f32 -1.0, %v7664_v7  ;;  %vm4478_vm15 = vcmp.gt.f32.partialorder %v4460_v4, 0.0  ;;  %7190 = vmatprep.subr.bf16.mxu0 %v7189_v44  ;;  %7209 = vmatprep.subr.bf16.mxu1 %v7189_v44 }
 0xf22   :  { %v4493_v47 = vmin.f32 %v4455_v5, 0.0  ;;  %v5127_v23 = vadd.f32 -1.0, %v7666_v56  ;;  %vm4477_vm14 = vcmp.gt.f32.partialorder %v4455_v5, 0.0 }
 0xf23   :  { %v4525_v33 = vmul.f32 1.442695, %v4494_v18  ;;  %v4554_v8 = vsel %vm4474_vm11, %v4440_v22, %v5128_v0  ;;  %v7197_v22 = vpack.c.bf16 %v4834_v34, %v4833_v48 }
 0xf24   :  { %v4523_v3 = vmul.f32 1.442695, %v4493_v47  ;;  %v4553_v62 = vsel %vm4473_vm10, %v4435_v21, %v5127_v23  ;;  %7192 = vmatpush3.bf16.msra.mxu0 %v7189_v44  ;;  %7217 = vmatpush3.bf16.msra.mxu1 %v7189_v44  ;;  %v7201_v21 = vpack.c.bf16 %v4836_v38, %v4835_v54 }
 0xf25   :  { %7671 = vpow2.f32 %v4525_v33  ;;  %6596 = vmatprep.mubr.f32.mxu1 %v4553_v62  ;;  %7194 = vmatprep.subr.bf16.mxu0 %v7193_v12 }
 0xf26   :  { %7673 = vpow2.f32 %v4523_v3  ;;  %6597 = vmatmul.mubr.f32.gmra.mrb[90].mxu1 %v4554_v8  ;;  %7210 = vmatprep.subr.bf16.mxu1 %v7193_v12 }
 0xf28   :  { %v7668_v14 = vpop.eup %7667  ;;  %7196 = vmatpush3.bf16.msra.mxu0 %v7193_v12  ;;  %7218 = vmatpush3.bf16.msra.mxu1 %v7193_v12 }
 0xf29   :  { %v7670_v9 = vpop.eup %7669  ;;  %v5130_v53 = vadd.f32 -1.0, %v7668_v14  ;;  %7198 = vmatprep.subr.bf16.mxu0 %v7197_v22  ;;  %7211 = vmatprep.subr.bf16.mxu1 %v7197_v22 }
 0xf2a   :  { %v5129_v15 = vadd.f32 -1.0, %v7670_v9 }
 0xf2b   :  { %v4556_v6 = vsel %vm4476_vm13, %v4450_v52, %v5130_v53 }
 0xf2c   :  { %v4555_v36 = vsel %vm4475_vm12, %v4445_v26, %v5129_v15  ;;  %7200 = vmatpush3.bf16.msra.mxu0 %v7197_v22  ;;  %7219 = vmatpush3.bf16.msra.mxu1 %v7197_v22 }
 0xf2d   :  { %6599 = vmatprep.mubr.f32.mxu1 %v4555_v36  ;;  %7202 = vmatprep.subr.bf16.mxu0 %v7201_v21 }
 0xf2e   :  { %6600 = vmatmul.mubr.f32.gmra.mrb[92].mxu1 %v4556_v6  ;;  %7212 = vmatprep.subr.bf16.mxu1 %v7201_v21 }
 0xf2f   :  { %v7672_v45 = vpop.eup %7671 }
 0xf30   :  { %v7674_v42 = vpop.eup %7673  ;;  %v5132_v46 = vadd.f32 -1.0, %v7672_v45  ;;  %7204 = vmatpush3.bf16.msra.mxu0 %v7201_v21  ;;  %7220 = vmatpush3.bf16.msra.mxu1 %v7201_v21 }
 0xf31   :  { %v5131_v60 = vadd.f32 -1.0, %v7674_v42 }
 0xf32   :  { %v4558_v17 = vsel %vm4478_vm15, %v4460_v4, %v5132_v46 }
 0xf33   :  { %v4557_v63 = vsel %vm4477_vm14, %v4455_v5, %v5131_v60 }
 0xf34   :  { %6602 = vmatprep.mubr.f32.mxu1 %v4557_v63 }
 0xf35   :  { %6603 = vmatmul.mubr.f32.gmra.mrb[94].mxu1 %v4558_v17 }
 0xfd1   :  { %v6583_v2 = vpop.f32.mrb[80].mxu1 }
 0xfd2   :  { %v4652_v28 = vadd.f32 %v6583_v2, %v10045_v50  ;;  %v4646_v51 = vpop.f32.mrb[81].mxu1 }
 0xfd3   :  { %v4647_v10 = vadd.f32 %v4646_v51, %v10045_v50 }
 0xfd4   :  { %v4742_v16 = vmin.f32 %v4652_v28, 0.0  ;;  %vm4726_vm1 = vcmp.gt.f32.partialorder %v4652_v28, 0.0 }
 0xfd5   :  { %v4741_v11 = vmin.f32 %v4647_v10, 0.0  ;;  %vm4725_vm0 = vcmp.gt.f32.partialorder %v4647_v10, 0.0 }
 0xfd6   :  { %v4759_v31 = vmul.f32 1.442695, %v4742_v16 }
 0xfd7   :  { %v4757_v27 = vmul.f32 1.442695, %v4741_v11 }
 0xfd8   :  { %7675 = vpow2.f32 %v4759_v31 }
 0xfd9   :  { %7677 = vpow2.f32 %v4757_v27  ;;  %v6586_v52 = vpop.f32.mrb[82].mxu1 }
 0xfda   :  { %v4662_v29 = vadd.f32 %v6586_v52, %v10045_v50  ;;  %v4656_v24 = vpop.f32.mrb[83].mxu1 }
 0xfdb   :  { %v4657_v26 = vadd.f32 %v4656_v24, %v10045_v50 }
 0xfdc   :  { %v4744_v30 = vmin.f32 %v4662_v29, 0.0  ;;  %vm4728_vm3 = vcmp.gt.f32.partialorder %v4662_v29, 0.0 }
 0xfdd   :  { %v4743_v55 = vmin.f32 %v4657_v26, 0.0  ;;  %vm4727_vm2 = vcmp.gt.f32.partialorder %v4657_v26, 0.0 }
 0xfde   :  { %v4763_v20 = vmul.f32 1.442695, %v4744_v30 }
 0xfdf   :  { %v4761_v61 = vmul.f32 1.442695, %v4743_v55 }
 0xfe0   :  { %7679 = vpow2.f32 %v4763_v20 }
 0xfe1   :  { %7681 = vpow2.f32 %v4761_v61  ;;  %v6589_v59 = vpop.f32.mrb[84].mxu1 }
 0xfe2   :  { %v7676_v13 = vpop.eup %7675  ;;  %v4672_v43 = vadd.f32 %v6589_v59, %v10045_v50  ;;  %v4666_v40 = vpop.f32.mrb[85].mxu1 }
 0xfe3   :  { %v7678_v58 = vpop.eup %7677  ;;  %v5134_v4 = vadd.f32 -1.0, %v7676_v13  ;;  %v4667_v39 = vadd.f32 %v4666_v40, %v10045_v50 }
 0xfe4   :  { %v4746_v7 = vmin.f32 %v4672_v43, 0.0  ;;  %v5133_v5 = vadd.f32 -1.0, %v7678_v58  ;;  %vm4730_vm5 = vcmp.gt.f32.partialorder %v4672_v43, 0.0 }
 0xfe5   :  { %v4745_v56 = vmin.f32 %v4667_v39, 0.0  ;;  %v4806_v47 = vsel %vm4726_vm1, %v4652_v28, %v5134_v4  ;;  %vm4729_vm4 = vcmp.gt.f32.partialorder %v4667_v39, 0.0 }
 0xfe6   :  { %v4767_v18 = vmul.f32 1.442695, %v4746_v7  ;;  %v4805_v0 = vsel %vm4725_vm0, %v4647_v10, %v5133_v5 }
 0xfe7   :  { %v4765_v23 = vmul.f32 1.442695, %v4745_v56  ;;  %6637 = vmatprep.mubr.f32.mxu0 %v4805_v0 }
 0xfe8   :  { %7683 = vpow2.f32 %v4767_v18  ;;  %6638 = vmatmul.mubr.f32.vlgmr.msra.gmra.mrb[128].mxu0 %v4806_v47 }
 0xfe9   :  { %7685 = vpow2.f32 %v4765_v23  ;;  %v6592_v33 = vpop.f32.mrb[86].mxu1 }
 0xfea   :  { %v7680_v3 = vpop.eup %7679  ;;  %v4682_v62 = vadd.f32 %v6592_v33, %v10045_v50  ;;  %v4676_v8 = vpop.f32.mrb[87].mxu1 }
 0xfeb   :  { %v7682_v14 = vpop.eup %7681  ;;  %v4677_v9 = vadd.f32 %v4676_v8, %v10045_v50  ;;  %v5136_v53 = vadd.f32 -1.0, %v7680_v3 }
 0xfec   :  { %v4748_v15 = vmin.f32 %v4682_v62, 0.0  ;;  %v5135_v36 = vadd.f32 -1.0, %v7682_v14  ;;  %vm4732_vm7 = vcmp.gt.f32.partialorder %v4682_v62, 0.0 }
 0xfed   :  { %v4747_v6 = vmin.f32 %v4677_v9, 0.0  ;;  %v4808_v60 = vsel %vm4728_vm3, %v4662_v29, %v5136_v53  ;;  %vm4731_vm6 = vcmp.gt.f32.partialorder %v4677_v9, 0.0 }
 0xfee   :  { %v4771_v45 = vmul.f32 1.442695, %v4748_v15  ;;  %v4807_v42 = vsel %vm4727_vm2, %v4657_v26, %v5135_v36 }
 0xfef   :  { %v4769_v46 = vmul.f32 1.442695, %v4747_v6  ;;  %6640 = vmatprep.mubr.f32.mxu0 %v4807_v42 }
 0xff0   :  { %7687 = vpow2.f32 %v4771_v45  ;;  %6641 = vmatmul.mubr.f32.gmra.mrb[130].mxu0 %v4808_v60 }
 0xff1   :  { %7689 = vpow2.f32 %v4769_v46  ;;  %v6595_v63 = vpop.f32.mrb[88].mxu1 }
 0xff2   :  { %v7684_v17 = vpop.eup %7683  ;;  %v4692_v32 = vadd.f32 %v6595_v63, %v10045_v50  ;;  %v4686_v57 = vpop.f32.mrb[89].mxu1 }
 0xff3   :  { %v7686_v37 = vpop.eup %7685  ;;  %v4687_v49 = vadd.f32 %v4686_v57, %v10045_v50  ;;  %v5138_v41 = vadd.f32 -1.0, %v7684_v17 }
 0xff4   :  { %v4750_v44 = vmin.f32 %v4692_v32, 0.0  ;;  %v5137_v25 = vadd.f32 -1.0, %v7686_v37  ;;  %vm4734_vm9 = vcmp.gt.f32.partialorder %v4692_v32, 0.0 }
 0xff5   :  { %v4749_v1 = vmin.f32 %v4687_v49, 0.0  ;;  %v4810_v22 = vsel %vm4730_vm5, %v4672_v43, %v5138_v41  ;;  %vm4733_vm8 = vcmp.gt.f32.partialorder %v4687_v49, 0.0 }
 0xff6   :  { %v4775_v12 = vmul.f32 1.442695, %v4750_v44  ;;  %v4809_v48 = vsel %vm4729_vm4, %v4667_v39, %v5137_v25 }
 0xff7   :  { %v4773_v34 = vmul.f32 1.442695, %v4749_v1  ;;  %6643 = vmatprep.mubr.f32.mxu0 %v4809_v48 }
 0xff8   :  { %7691 = vpow2.f32 %v4775_v12  ;;  %6644 = vmatmul.mubr.f32.gmra.mrb[132].mxu0 %v4810_v22 }
 0xff9   :  { %7693 = vpow2.f32 %v4773_v34  ;;  %v6598_v54 = vpop.f32.mrb[90].mxu1 }
 0xffa   :  { %v7688_v38 = vpop.eup %7687  ;;  %v4702_v21 = vadd.f32 %v6598_v54, %v10045_v50  ;;  %v4696_v19 = vpop.f32.mrb[91].mxu1 }
 0xffb   :  { %v7690_v2 = vpop.eup %7689  ;;  %v4697_v28 = vadd.f32 %v4696_v19, %v10045_v50  ;;  %v5140_v51 = vadd.f32 -1.0, %v7688_v38 }
 0xffc   :  { %v4752_v10 = vmin.f32 %v4702_v21, 0.0  ;;  %v5139_v16 = vadd.f32 -1.0, %v7690_v2  ;;  %vm4736_vm11 = vcmp.gt.f32.partialorder %v4702_v21, 0.0 }
 0xffd   :  { %v4751_v11 = vmin.f32 %v4697_v28, 0.0  ;;  %v4812_v29 = vsel %vm4732_vm7, %v4682_v62, %v5140_v51  ;;  %vm4735_vm10 = vcmp.gt.f32.partialorder %v4697_v28, 0.0 }
 0xffe   :  { %v4779_v31 = vmul.f32 1.442695, %v4752_v10  ;;  %v4811_v27 = vsel %vm4731_vm6, %v4677_v9, %v5139_v16 }
 0xfff   :  { %v4777_v52 = vmul.f32 1.442695, %v4751_v11  ;;  %6646 = vmatprep.mubr.f32.mxu0 %v4811_v27 }
0x1000   :  { %7695 = vpow2.f32 %v4779_v31  ;;  %6647 = vmatmul.mubr.f32.gmra.mrb[134].mxu0 %v4812_v29 }
0x1001   :  { %7697 = vpow2.f32 %v4777_v52  ;;  %v6601_v24 = vpop.f32.mrb[92].mxu1 }
0x1002   :  { %v7692_v26 = vpop.eup %7691  ;;  %v4712_v30 = vadd.f32 %v6601_v24, %v10045_v50  ;;  %v4706_v55 = vpop.f32.mrb[93].mxu1 }
0x1003   :  { %v7694_v20 = vpop.eup %7693  ;;  %v5142_v61 = vadd.f32 -1.0, %v7692_v26  ;;  %v4707_v59 = vadd.f32 %v4706_v55, %v10045_v50 }
0x1004   :  { %v4754_v13 = vmin.f32 %v4712_v30, 0.0  ;;  %v5141_v43 = vadd.f32 -1.0, %v7694_v20  ;;  %vm4738_vm13 = vcmp.gt.f32.partialorder %v4712_v30, 0.0 }
0x1005   :  { %v4753_v40 = vmin.f32 %v4707_v59, 0.0  ;;  %v4814_v39 = vsel %vm4734_vm9, %v4692_v32, %v5142_v61  ;;  %vm4737_vm12 = vcmp.gt.f32.partialorder %v4707_v59, 0.0 }
0x1006   :  { %v4783_v58 = vmul.f32 1.442695, %v4754_v13  ;;  %v4813_v4 = vsel %vm4733_vm8, %v4687_v49, %v5141_v43  ;;  %v4837_v49 = vld [vmem:[#allocation7 + $0x668] sm:$0xff] }
0x1007   :  { %v4781_v7 = vmul.f32 1.442695, %v4753_v40  ;;  %6649 = vmatprep.mubr.f32.mxu1 %v4813_v4  ;;  %v10064_v41 = vrot.slane %v4837_v49, %v10146_v35 }
0x1008   :  { %7699 = vpow2.f32 %v4783_v58  ;;  %v6604_v5 = vpop.f32.mrb[94].mxu1  ;;  %6650 = vmatmul.mubr.f32.vlgmr.msra.gmra.mrb[96].mxu1 %v4814_v39 }
0x1009   :  { %7701 = vpow2.f32 %v4781_v7  ;;  %v4722_v56 = vadd.f32 %v6604_v5, %v10045_v50  ;;  %v4716_v18 = vpop.f32.mrb[95].mxu1 }
0x100a   :  { %v7696_v0 = vpop.eup %7695  ;;  %v4717_v47 = vadd.f32 %v4716_v18, %v10045_v50 }
0x100b   :  { %v7698_v23 = vpop.eup %7697  ;;  %v4756_v33 = vmin.f32 %v4722_v56, 0.0  ;;  %v5144_v3 = vadd.f32 -1.0, %v7696_v0  ;;  %vm4740_vm15 = vcmp.gt.f32.partialorder %v4722_v56, 0.0 }
0x100c   :  { %v4755_v62 = vmin.f32 %v4717_v47, 0.0  ;;  %v5143_v8 = vadd.f32 -1.0, %v7698_v23  ;;  %vm4739_vm14 = vcmp.gt.f32.partialorder %v4717_v47, 0.0 }
0x100d   :  { %v4787_v14 = vmul.f32 1.442695, %v4756_v33  ;;  %v4816_v15 = vsel %vm4736_vm11, %v4702_v21, %v5144_v3 }
0x100e   :  { %v4785_v9 = vmul.f32 1.442695, %v4755_v62  ;;  %v4815_v53 = vsel %vm4735_vm10, %v4697_v28, %v5143_v8 }
0x100f   :  { %7703 = vpow2.f32 %v4787_v14  ;;  %6652 = vmatprep.mubr.f32.mxu1 %v4815_v53 }
0x1010   :  { %7705 = vpow2.f32 %v4785_v9  ;;  %6653 = vmatmul.mubr.f32.gmra.mrb[98].mxu1 %v4816_v15 }
0x1012   :  { %v7700_v36 = vpop.eup %7699 }
0x1013   :  { %v7702_v6 = vpop.eup %7701  ;;  %v5146_v45 = vadd.f32 -1.0, %v7700_v36 }
0x1014   :  { %v5145_v42 = vadd.f32 -1.0, %v7702_v6 }
0x1015   :  { %v4818_v46 = vsel %vm4738_vm13, %v4712_v30, %v5146_v45 }
0x1016   :  { %v4817_v50 = vsel %vm4737_vm12, %v4707_v59, %v5145_v42 }
0x1017   :  { %6655 = vmatprep.mubr.f32.mxu1 %v4817_v50 }
0x1018   :  { %6656 = vmatmul.mubr.f32.gmra.mrb[100].mxu1 %v4818_v46 }
0x1019   :  { %v7704_v60 = vpop.eup %7703 }
0x101a   :  { %v7706_v63 = vpop.eup %7705  ;;  %v5148_v17 = vadd.f32 -1.0, %v7704_v60 }
0x101b   :  { %v5147_v32 = vadd.f32 -1.0, %v7706_v63 }
0x101c   :  { %v4820_v37 = vsel %vm4740_vm15, %v4722_v56, %v5148_v17 }
0x101d   :  { %v4819_v57 = vsel %vm4739_vm14, %v4717_v47, %v5147_v32 }
0x101e   :  { %6658 = vmatprep.mubr.f32.mxu1 %v4819_v57 }
0x101f   :  { %6659 = vmatmul.mubr.f32.gmra.mrb[102].mxu1 %v4820_v37 }
0x10bb   :  { %v6639_v44 = vpop.f32.mrb[128].mxu0 }
0x10bc   :  { %v4914_v25 = vadd.f32 %v6639_v44, %v10064_v41  ;;  %v4908_v1 = vpop.f32.mrb[129].mxu0 }
0x10bd   :  { %v4909_v12 = vadd.f32 %v4908_v1, %v10064_v41 }
0x10be   :  { %v5150_v48 = vmul.f32 -1.442695, %v4914_v25 }
0x10bf   :  { %v5149_v34 = vmul.f32 -1.442695, %v4909_v12 }
0x10c0   :  { %7707 = vpow2.f32 %v5150_v48 }
0x10c1   :  { %7709 = vpow2.f32 %v5149_v34 }
0x10c3   :  { %v6642_v22 = vpop.f32.mrb[130].mxu0 }
0x10c4   :  { %v4924_v54 = vadd.f32 %v6642_v22, %v10064_v41  ;;  %v4918_v38 = vpop.f32.mrb[131].mxu0 }
0x10c5   :  { %v4919_v21 = vadd.f32 %v4918_v38, %v10064_v41 }
0x10c6   :  { %v5152_v19 = vmul.f32 -1.442695, %v4924_v54 }
0x10c7   :  { %v5151_v2 = vmul.f32 -1.442695, %v4919_v21 }
0x10c8   :  { %7711 = vpow2.f32 %v5152_v19 }
0x10c9   :  { %7713 = vpow2.f32 %v5151_v2 }
0x10ca   :  { %v7708_v35 = vpop.eup %7707 }
0x10cb   :  { %v7710_v28 = vpop.eup %7709  ;;  %v5036_v51 = vadd.f32 1.0, %v7708_v35  ;;  %v6645_v10 = vpop.f32.mrb[132].mxu0 }
0x10cc   :  { %v5035_v16 = vadd.f32 1.0, %v7710_v28  ;;  %v4934_v11 = vadd.f32 %v6645_v10, %v10064_v41  ;;  %v4928_v31 = vpop.f32.mrb[133].mxu0 }
0x10cd   :  { %7715 = vrcp.f32 %v5036_v51  ;;  %v4929_v27 = vadd.f32 %v4928_v31, %v10064_v41 }
0x10ce   :  { %7717 = vrcp.f32 %v5035_v16  ;;  %v5154_v52 = vmul.f32 -1.442695, %v4934_v11 }
0x10cf   :  { %v5153_v29 = vmul.f32 -1.442695, %v4929_v27 }
0x10d0   :  { %7719 = vpow2.f32 %v5154_v52 }
0x10d1   :  { %7721 = vpow2.f32 %v5153_v29 }
0x10d2   :  { %v7712_v24 = vpop.eup %7711 }
0x10d3   :  { %v7714_v26 = vpop.eup %7713  ;;  %v5038_v30 = vadd.f32 1.0, %v7712_v24  ;;  %v6648_v55 = vpop.f32.mrb[134].mxu0 }
0x10d4   :  { %v5037_v20 = vadd.f32 1.0, %v7714_v26  ;;  %v4944_v61 = vadd.f32 %v6648_v55, %v10064_v41  ;;  %v4938_v59 = vpop.f32.mrb[135].mxu0 }
0x10d5   :  { %7723 = vrcp.f32 %v5038_v30  ;;  %v4939_v13 = vadd.f32 %v4938_v59, %v10064_v41 }
0x10d6   :  { %7725 = vrcp.f32 %v5037_v20  ;;  %v5156_v43 = vmul.f32 -1.442695, %v4944_v61 }
0x10d7   :  { %v7716_v40 = vpop.eup %7715  ;;  %v5155_v58 = vmul.f32 -1.442695, %v4939_v13 }
0x10d8   :  { %v7718_v4 = vpop.eup %7717  ;;  %5084 = vst [vmem:[#allocation8 + $0x8] sm:$0xff] %v7716_v40  ;;  %7727 = vpow2.f32 %v5156_v43 }
0x10d9   :  { %5083 = vst [vmem:[#allocation8] sm:$0xff] %v7718_v4  ;;  %7729 = vpow2.f32 %v5155_v58 }
0x10da   :  { %v7720_v39 = vpop.eup %7719 }
0x10db   :  { %v7722_v7 = vpop.eup %7721  ;;  %v5040_v5 = vadd.f32 1.0, %v7720_v39  ;;  %v6651_v56 = vpop.f32.mrb[96].mxu1 }
0x10dc   :  { %v5039_v18 = vadd.f32 1.0, %v7722_v7  ;;  %v4954_v0 = vadd.f32 %v6651_v56, %v10064_v41  ;;  %v4948_v47 = vpop.f32.mrb[97].mxu1 }
0x10dd   :  { %7731 = vrcp.f32 %v5040_v5  ;;  %v4949_v23 = vadd.f32 %v4948_v47, %v10064_v41 }
0x10de   :  { %7733 = vrcp.f32 %v5039_v18  ;;  %v5158_v33 = vmul.f32 -1.442695, %v4954_v0 }
0x10df   :  { %v7724_v3 = vpop.eup %7723  ;;  %v5157_v62 = vmul.f32 -1.442695, %v4949_v23 }
0x10e0   :  { %v7726_v8 = vpop.eup %7725  ;;  %5086 = vst [vmem:[#allocation8 + $0x18] sm:$0xff] %v7724_v3  ;;  %7735 = vpow2.f32 %v5158_v33 }
0x10e1   :  { %5085 = vst [vmem:[#allocation8 + $0x10] sm:$0xff] %v7726_v8  ;;  %7737 = vpow2.f32 %v5157_v62 }
0x10e2   :  { %v7728_v14 = vpop.eup %7727 }
0x10e3   :  { %v7730_v9 = vpop.eup %7729  ;;  %v5042_v53 = vadd.f32 1.0, %v7728_v14  ;;  %v6654_v15 = vpop.f32.mrb[98].mxu1 }
0x10e4   :  { %v5041_v36 = vadd.f32 1.0, %v7730_v9  ;;  %v4964_v6 = vadd.f32 %v6654_v15, %v10064_v41  ;;  %v4958_v45 = vpop.f32.mrb[99].mxu1 }
0x10e5   :  { %7739 = vrcp.f32 %v5042_v53  ;;  %v4959_v42 = vadd.f32 %v4958_v45, %v10064_v41 }
0x10e6   :  { %7741 = vrcp.f32 %v5041_v36  ;;  %v5160_v50 = vmul.f32 -1.442695, %v4964_v6 }
0x10e7   :  { %v7732_v46 = vpop.eup %7731  ;;  %v5159_v60 = vmul.f32 -1.442695, %v4959_v42 }
0x10e8   :  { %v7734_v63 = vpop.eup %7733  ;;  %5088 = vst [vmem:[#allocation8 + $0x28] sm:$0xff] %v7732_v46  ;;  %7743 = vpow2.f32 %v5160_v50 }
0x10e9   :  { %5087 = vst [vmem:[#allocation8 + $0x20] sm:$0xff] %v7734_v63  ;;  %7745 = vpow2.f32 %v5159_v60 }
0x10ea   :  { %v7736_v17 = vpop.eup %7735 }
0x10eb   :  { %v7738_v32 = vpop.eup %7737  ;;  %v5044_v57 = vadd.f32 1.0, %v7736_v17  ;;  %v6657_v37 = vpop.f32.mrb[100].mxu1 }
0x10ec   :  { %v5043_v49 = vadd.f32 1.0, %v7738_v32  ;;  %v4974_v44 = vadd.f32 %v6657_v37, %v10064_v41  ;;  %v4968_v25 = vpop.f32.mrb[101].mxu1 }
0x10ed   :  { %7747 = vrcp.f32 %v5044_v57  ;;  %v4969_v1 = vadd.f32 %v4968_v25, %v10064_v41 }
0x10ee   :  { %7749 = vrcp.f32 %v5043_v49  ;;  %v5162_v12 = vmul.f32 -1.442695, %v4974_v44 }
0x10ef   :  { %v7740_v48 = vpop.eup %7739  ;;  %v5161_v34 = vmul.f32 -1.442695, %v4969_v1 }
0x10f0   :  { %v7742_v22 = vpop.eup %7741  ;;  %5090 = vst [vmem:[#allocation8 + $0x38] sm:$0xff] %v7740_v48  ;;  %7751 = vpow2.f32 %v5162_v12 }
0x10f1   :  { %5089 = vst [vmem:[#allocation8 + $0x30] sm:$0xff] %v7742_v22  ;;  %7753 = vpow2.f32 %v5161_v34 }
0x10f2   :  { %v7744_v54 = vpop.eup %7743  ;;  %v6660_v38 = vpop.f32.mrb[102].mxu1 }
0x10f3   :  { %v7746_v21 = vpop.eup %7745  ;;  %v5046_v19 = vadd.f32 1.0, %v7744_v54  ;;  %v4984_v2 = vadd.f32 %v6660_v38, %v10064_v41  ;;  %v4978_v35 = vpop.f32.mrb[103].mxu1 }
0x10f4   :  { %v5045_v28 = vadd.f32 1.0, %v7746_v21  ;;  %v4979_v51 = vadd.f32 %v4978_v35, %v10064_v41 }
0x10f5   :  { %7755 = vrcp.f32 %v5046_v19  ;;  %v5164_v10 = vmul.f32 -1.442695, %v4984_v2 }
0x10f6   :  { %7757 = vrcp.f32 %v5045_v28  ;;  %v5163_v16 = vmul.f32 -1.442695, %v4979_v51 }
0x10f7   :  { %v7748_v11 = vpop.eup %7747  ;;  %7759 = vpow2.f32 %v5164_v10 }
0x10f8   :  { %v7750_v31 = vpop.eup %7749  ;;  %5092 = vst [vmem:[#allocation8 + $0x48] sm:$0xff] %v7748_v11  ;;  %7761 = vpow2.f32 %v5163_v16 }
0x10f9   :  { %5091 = vst [vmem:[#allocation8 + $0x40] sm:$0xff] %v7750_v31 }
0x10fa   :  { %v7752_v27 = vpop.eup %7751 }
0x10fb   :  { %v7754_v52 = vpop.eup %7753  ;;  %v5048_v29 = vadd.f32 1.0, %v7752_v27 }
0x10fc   :  { %v5047_v24 = vadd.f32 1.0, %v7754_v52 }
0x10fd   :  { %7763 = vrcp.f32 %v5048_v29 }
0x10fe   :  { %7765 = vrcp.f32 %v5047_v24 }
0x10ff   :  { %v7756_v26 = vpop.eup %7755 }
0x1100   :  { %v7758_v30 = vpop.eup %7757  ;;  %5094 = vst [vmem:[#allocation8 + $0x58] sm:$0xff] %v7756_v26 }
0x1101   :  { %v7760_v41 = vpop.eup %7759  ;;  %5093 = vst [vmem:[#allocation8 + $0x50] sm:$0xff] %v7758_v30 }
0x1102   :  { %v7762_v55 = vpop.eup %7761  ;;  %v5050_v20 = vadd.f32 1.0, %v7760_v41 }
0x1103   :  { %v5049_v61 = vadd.f32 1.0, %v7762_v55 }
0x1104   :  { %7767 = vrcp.f32 %v5050_v20 }
0x1105   :  { %7769 = vrcp.f32 %v5049_v61 }
0x1107   :  { %v7764_v59 = vpop.eup %7763 }
0x1108   :  { %v7766_v13 = vpop.eup %7765  ;;  %5096 = vst [vmem:[#allocation8 + $0x68] sm:$0xff] %v7764_v59 }
0x1109   :  { %5095 = vst [vmem:[#allocation8 + $0x60] sm:$0xff] %v7766_v13 }
0x110e   :  { %v7768_v43 = vpop.eup %7767 }
0x110f   :  { %v7770_v40 = vpop.eup %7769  ;;  %5098 = vst [vmem:[#allocation8 + $0x78] sm:$0xff] %v7768_v43 }
0x1110   :  { %5097 = vst [vmem:[#allocation8 + $0x70] sm:$0xff] %v7770_v40 }
0x1111   :  { %7895 = shalt.err (!%p7892_p0)
}
0x1112   :  { %s7896_s27 = scalar_lea.hbm %s10100_s3, 2048 }
0x1113   :  { %p7897_p1 = scmp.ne.s32.totalorder %s10100_s3, %s7896_s27  ;;  %p7900_p2 = scmp.lt.u32.totalorder %s7896_s27, %s10100_s3 }
0x1115   :  { %p7902_p3 = pnand %p7900_p2, %p7897_p1 }
0x1117   :  { %7905 = shalt.err (!%p7902_p3)
}
0x1118   :  { %5110 = dma.vmem_to_hbm [thread:$0]  %s5105_s21, 2048, %s10100_s3, [#allocation4], %s7914_s24, %s7914_s24, %s7915_s25  }
0x1119   :  { %7910 = dma.done.wait [#allocation4], 2048  }
0x111a   :  { %7911 = vsyncadd [#allocation4], 4294965248 }
0x111b   :  { %5114 = vsyncpa [#allocation3], 1 }
0x111c   :  { %5115 = vsyncpa [#allocation6], 1 }
0x111d   :  { %5116 = vsyncpa [#allocation4], 1 }

</bundles_post_ra>
